<compile_context>
chip_gen: v7x
topology: tpu7x:2x2x1
jax: 0.10.0
libtpu: 0.0.40
codegen_flags: <defaults>
</compile_context>

<pallas_src>
from functools import partial

import jax
import jax.numpy as jnp
from jax.experimental import pallas as pl
from jax.experimental.pallas import tpu as pltpu
import numpy as np


def _round_up(x, m):
    return (x + m - 1) // m * m


# --------------------------------------------------------------------------------
# Kernel: the whole network (recurrence + final Linear) is VMEM-resident, no grid.
# --------------------------------------------------------------------------------
def bigru_kernel(gi_ref, h0_ref, whh_ref, bhn_ref, w_fc_ref, b_fc_ref,
                 logits_ref, hout_ref):
    f32 = jnp.float32
    BP, G2 = h0_ref.shape            # (BP, 2G): h = [h_fwd | h_bwd], lane-concat
    G = G2 // 2
    T = gi_ref.shape[0] // BP        # gi rows: T blocks of BP

    # Loop invariants loaded / broadcast ONCE (single SSA value -> RHS can stay
    # latched in the MXU across the unrolled steps; no per-iteration broadcast).
    whh = whh_ref[...]                                   # (2G, 6G) f32
    bhn = jnp.broadcast_to(bhn_ref[...], (BP, G2))       # b_hh_n for both dirs

    def step(i, h):
        # ONE fused block-diagonal matmul covers both directions per step.
        gh = jnp.dot(h, whh, preferred_element_type=f32)         # (BP, 6G)
        gi = gi_ref[i * BP:(i + 1) * BP, :]                      # (BP, 6G)
        # Gate blocks (each 2G lanes = [fwd | bwd]); PyTorch order [r, z, n].
        r = jax.nn.sigmoid(gi[:, 0:G2] + gh[:, 0:G2])
        z = jax.nn.sigmoid(gi[:, G2:2 * G2] + gh[:, G2:2 * G2])
        n = jnp.tanh(gi[:, 2 * G2:3 * G2] + r * (gh[:, 2 * G2:3 * G2] + bhn))
        return n + z * (h - n)       # == (1-z)*n + z*h, one fewer dependent mul

    # Peel step 0: the backward direction's output at the LAST time index is its
    # hidden after its first step (wrapper time-reverses the backward gi half).
    h = step(0, h0_ref[...])
    bwd_at_last = h[:, G:G2]

    # Fully unrolled recurrence (T static & small; carry = one (BP, 2G) tile).
    for i in range(1, T):
        h = step(i, h)

    # Final Linear on concat(fwd@T-1, bwd@T-1); lane-dense padded output.
    feat = jnp.concatenate([h[:, 0:G], bwd_at_last], axis=-1)    # (BP, 2G)
    logits_ref[...] = (jnp.dot(feat, w_fc_ref[...],
                               preferred_element_type=f32) + b_fc_ref[...])
    hout_ref[...] = h


# --------------------------------------------------------------------------------
# One-time parameter packing (OFF the per-call path).
# --------------------------------------------------------------------------------
def pack_params(params):
    """Pack PyTorch-layout params into the lane-aligned fused layout, once."""
    f32 = jnp.float32
    emb = params["embedding"]
    max_apps, _ = emb.shape
    H = params["w_hh_f"].shape[0]
    G = _round_up(H, 128)            # per-gate/per-direction lane stride
    NP = _round_up(max_apps, 128)    # lane-dense logits

    def make_table(wih, bih, bhh, d):
        # (max_apps, 6G) per-token input projection with b_ih (all gates) and
        # b_hh (r,z gates) folded in.  Direction d lives at lanes
        # [g*2G + d*G : g*2G + d*G + H] of gate block g.
        gi = jnp.dot(emb, wih, preferred_element_type=f32) + bih   # (max_apps, 3H)
        tbl = jnp.zeros((max_apps, 6 * G), f32)
        for g in range(3):
            blk = gi[:, g * H:(g + 1) * H]
            if g < 2:
                blk = blk + bhh[:, g * H:(g + 1) * H]
            c0 = g * 2 * G + d * G
            tbl = tbl.at[:, c0:c0 + H].set(blk)
        return tbl

    table_f = make_table(params["w_ih_f"], params["b_ih_f"], params["b_hh_f"], 0)
    table_b = make_table(params["w_ih_b"], params["b_ih_b"], params["b_hh_b"], 1)

    # Block-diagonal recurrent weights: rows 0:G -> fwd, rows G:2G -> bwd.
    whh_cat = jnp.zeros((2 * G, 6 * G), f32)
    for g in range(3):
        c0 = g * 2 * G
        whh_cat = whh_cat.at[:H, c0:c0 + H].set(
            params["w_hh_f"][:, g * H:(g + 1) * H])
        whh_cat = whh_cat.at[G:G + H, c0 + G:c0 + G + H].set(
            params["w_hh_b"][:, g * H:(g + 1) * H])

    bhn_cat = jnp.zeros((1, 2 * G), f32)
    bhn_cat = bhn_cat.at[:, :H].set(params["b_hh_f"][:, 2 * H:3 * H])
    bhn_cat = bhn_cat.at[:, G:G + H].set(params["b_hh_b"][:, 2 * H:3 * H])

    w_fc = jnp.zeros((2 * G, NP), f32)
    w_fc = w_fc.at[:H, :max_apps].set(params["w_fc"][:H])
    w_fc = w_fc.at[G:G + H, :max_apps].set(params["w_fc"][H:])
    b_fc = jnp.zeros((1, NP), f32).at[:, :max_apps].set(params["b_fc"])

    return {"table_f": table_f, "table_b": table_b, "whh_cat": whh_cat,
            "bhn_cat": bhn_cat, "w_fc": w_fc, "b_fc": b_fc}


# --------------------------------------------------------------------------------
# Per-call forward (jitted): gather gate-input table, pad, run kernel, slice.
# --------------------------------------------------------------------------------
@partial(jax.jit, static_argnames=("max_apps",))
def bigru_forward(x_idx, h0, packed, *, max_apps):
    """x_idx: (B, T) int32 token ids; h0: (2, B, H) f32. Returns (logits, h_n)."""
    f32 = jnp.float32
    B, T = x_idx.shape
    H = h0.shape[-1]
    G = packed["whh_cat"].shape[0] // 2
    NP = packed["b_fc"].shape[-1]
    BP = _round_up(B, 8)             # sublane-aligned batch

    # Pad token ids to BP rows (padded rows reuse token 0; results sliced off).
    x_pad = jnp.zeros((BP, T), x_idx.dtype).at[:B].set(x_idx)
    xT = x_pad.T                                             # (T, BP)
    # Fused gate inputs: forward half reads time t=i, backward half t=T-1-i,
    # already laid out exactly as the kernel consumes them (one row-block / step).
    gi = (packed["table_f"][xT] + packed["table_b"][xT[::-1]]
          ).reshape(T * BP, 6 * G)                           # (T*BP, 6G) f32

    h0_pad = jnp.zeros((BP, 2 * G), f32)
    h0_pad = h0_pad.at[:B, :H].set(h0[0]).at[:B, G:G + H].set(h0[1])

    vmem = pl.BlockSpec(memory_space=pltpu.MemorySpace.VMEM)
    logits_pad, hcat = pl.pallas_call(
        bigru_kernel,
        out_shape=(jax.ShapeDtypeStruct((BP, NP), f32),
                   jax.ShapeDtypeStruct((BP, 2 * G), f32)),
        in_specs=[vmem] * 6,
        out_specs=(vmem, vmem),
    )(gi, h0_pad, packed["whh_cat"], packed["bhn_cat"],
      packed["w_fc"], packed["b_fc"])

    logits = logits_pad[:B, :max_apps]
    h_n = jnp.stack([hcat[:B, :H], hcat[:B, G:G + H]], axis=0)   # (2, B, H)
    return logits, h_n


# --------------------------------------------------------------------------------
# Pure-JAX f32 reference (mirrors the PyTorch module forward).
# --------------------------------------------------------------------------------
def _gru_cell_ref(x_t, h, wih, whh, bih, bhh, H):
    gi = jnp.dot(x_t, wih) + bih
    gh = jnp.dot(h, whh) + bhh
    r = jax.nn.sigmoid(gi[:, :H] + gh[:, :H])
    z = jax.nn.sigmoid(gi[:, H:2 * H] + gh[:, H:2 * H])
    n = jnp.tanh(gi[:, 2 * H:] + r * gh[:, 2 * H:])
    return (1.0 - z) * n + z * h


def bigru_reference(x_idx, h0, params):
    B, T = x_idx.shape
    H = h0.shape[-1]
    emb = params["embedding"][x_idx]                 # (B, T, D)
    # forward
    h = h0[0]
    for t in range(T):
        h = _gru_cell_ref(emb[:, t], h, params["w_ih_f"], params["w_hh_f"],
                          params["b_ih_f"], params["b_hh_f"], H)
    h_f = h
    # backward
    h = h0[1]
    bwd_out_last = None
    for i in range(T):
        t = T - 1 - i
        h = _gru_cell_ref(emb[:, t], h, params["w_ih_b"], params["w_hh_b"],
                          params["b_ih_b"], params["b_hh_b"], H)
        if i == 0:
            bwd_out_last = h
    h_b = h
    feat = jnp.concatenate([h_f, bwd_out_last], axis=-1)
    logits = jnp.dot(feat, params["w_fc"]) + params["b_fc"]
    return logits, jnp.stack([h_f, h_b], axis=0)


def init_params(key, max_apps, n_gru, src_dim):
    ks = jax.random.split(key, 12)
    k = 1.0 / np.sqrt(n_gru)
    u = lambda kk, shape: jax.random.uniform(kk, shape, jnp.float32, -k, k)
    params = {
        "embedding": jax.random.normal(ks[0], (max_apps, src_dim), jnp.float32),
        # GRU weights stored transposed relative to PyTorch: (in, 3H) / (H, 3H),
        # PyTorch gate order [r, z, n].
        "w_ih_f": u(ks[1], (src_dim, 3 * n_gru)),
        "w_hh_f": u(ks[2], (n_gru, 3 * n_gru)),
        "b_ih_f": u(ks[3], (1, 3 * n_gru)),
        "b_hh_f": u(ks[4], (1, 3 * n_gru)),
        "w_ih_b": u(ks[5], (src_dim, 3 * n_gru)),
        "w_hh_b": u(ks[6], (n_gru, 3 * n_gru)),
        "b_ih_b": u(ks[7], (1, 3 * n_gru)),
        "b_hh_b": u(ks[8], (1, 3 * n_gru)),
        # fc1: (2H, max_apps)
        "w_fc": u(ks[9], (2 * n_gru, max_apps)),
        "b_fc": u(ks[10], (1, max_apps)),
    }
    return params


if __name__ == "__main__":
    max_apps, n_gru, src_dim = 16, 32, 4
    B, T = 2, 8

    key = jax.random.PRNGKey(0)
    kp, kx = jax.random.split(key)
    params = init_params(kp, max_apps, n_gru, src_dim)
    packed = pack_params(params)        # one-time packing, off the per-call path

    x_idx = jax.random.randint(kx, (B, T), 0, max_apps, dtype=jnp.int32)
    h0 = jnp.zeros((2, B, n_gru), jnp.float32)   # == BiGRU.init_hidden(B)

    logits, h_out = bigru_forward(x_idx, h0, packed, max_apps=max_apps)
    jax.block_until_ready((logits, h_out))

    # Kernel and reference are both f32 end-to-end now; remaining differences are
    # only matmul pass ordering / EUP transcendental implementation details.
    ref_logits, ref_h = bigru_reference(x_idx, h0, params)
    np.testing.assert_allclose(np.asarray(logits), np.asarray(ref_logits),
                               rtol=2e-3, atol=2e-3)
    np.testing.assert_allclose(np.asarray(h_out), np.asarray(ref_h),
                               rtol=2e-3, atol=2e-3)

    print("KERNEL_OK")
</pallas_src>

<mosaic_0001>
module attributes {stable_mosaic.version = 11 : i64} {
  func.func @bigru_kernel(%arg0: memref<64x768xf32, #tpu.memory_space<vmem>>, %arg1: memref<8x256xf32, #tpu.memory_space<vmem>>, %arg2: memref<256x768xf32, #tpu.memory_space<vmem>>, %arg3: memref<1x256xf32, #tpu.memory_space<vmem>>, %arg4: memref<256x128xf32, #tpu.memory_space<vmem>>, %arg5: memref<1x128xf32, #tpu.memory_space<vmem>>, %arg6: memref<8x128xf32, #tpu.memory_space<vmem>>, %arg7: memref<8x256xf32, #tpu.memory_space<vmem>>) attributes {dimension_semantics = [], scalar_prefetch = 0 : i64, scratch_operands = 0 : i64, tpu.core_type = #tpu.core_type<tc>} {
    %c0 = arith.constant 0 : index
    %c0_0 = arith.constant 0 : index
    %0 = vector.load %arg2[%c0, %c0_0] : memref<256x768xf32, #tpu.memory_space<vmem>>, vector<256x768xf32>
    %c0_1 = arith.constant 0 : index
    %c0_2 = arith.constant 0 : index
    %1 = vector.load %arg3[%c0_1, %c0_2] : memref<1x256xf32, #tpu.memory_space<vmem>>, vector<1x256xf32>
    %2 = vector.shape_cast %1 : vector<1x256xf32> to vector<1x256xf32>
    %3 = vector.broadcast %2 : vector<1x256xf32> to vector<8x256xf32>
    %c0_3 = arith.constant 0 : index
    %c0_4 = arith.constant 0 : index
    %4 = vector.load %arg1[%c0_3, %c0_4] : memref<8x256xf32, #tpu.memory_space<vmem>>, vector<8x256xf32>
    %cst = arith.constant dense<0.000000e+00> : vector<8x768xf32>
    %5 = tpu.matmul %4, %0, %cst {dimension_numbers = #tpu.dot_dimension_numbers<[1], [0], [0], [1], [0, 0, 1, 1], [], []>} : vector<8x256xf32>, vector<256x768xf32>, vector<8x768xf32> -> vector<8x768xf32>
    %c0_5 = arith.constant 0 : index
    %c0_6 = arith.constant 0 : index
    %6 = vector.load %arg0[%c0_5, %c0_6] : memref<64x768xf32, #tpu.memory_space<vmem>>, vector<8x768xf32>
    %7 = vector.extract_strided_slice %6 {offsets = [0, 0], sizes = [8, 256], strides = [1, 1]} : vector<8x768xf32> to vector<8x256xf32>
    %8 = vector.extract_strided_slice %5 {offsets = [0, 0], sizes = [8, 256], strides = [1, 1]} : vector<8x768xf32> to vector<8x256xf32>
    %9 = arith.addf %7, %8 : vector<8x256xf32>
    %10 = arith.negf %9 : vector<8x256xf32>
    %11 = math.exp %10 : vector<8x256xf32>
    %cst_7 = arith.constant 1.000000e+00 : f32
    %12 = vector.broadcast %cst_7 : f32 to vector<8x256xf32>
    %13 = arith.addf %12, %11 : vector<8x256xf32>
    %14 = arith.divf %12, %13 : vector<8x256xf32>
    %15 = vector.extract_strided_slice %6 {offsets = [0, 256], sizes = [8, 256], strides = [1, 1]} : vector<8x768xf32> to vector<8x256xf32>
    %16 = vector.extract_strided_slice %5 {offsets = [0, 256], sizes = [8, 256], strides = [1, 1]} : vector<8x768xf32> to vector<8x256xf32>
    %17 = arith.addf %15, %16 : vector<8x256xf32>
    %18 = arith.negf %17 : vector<8x256xf32>
    %19 = math.exp %18 : vector<8x256xf32>
    %cst_8 = arith.constant 1.000000e+00 : f32
    %20 = vector.broadcast %cst_8 : f32 to vector<8x256xf32>
    %21 = arith.addf %20, %19 : vector<8x256xf32>
    %22 = arith.divf %20, %21 : vector<8x256xf32>
    %23 = vector.extract_strided_slice %6 {offsets = [0, 512], sizes = [8, 256], strides = [1, 1]} : vector<8x768xf32> to vector<8x256xf32>
    %24 = vector.extract_strided_slice %5 {offsets = [0, 512], sizes = [8, 256], strides = [1, 1]} : vector<8x768xf32> to vector<8x256xf32>
    %25 = arith.addf %24, %3 : vector<8x256xf32>
    %26 = arith.mulf %14, %25 : vector<8x256xf32>
    %27 = arith.addf %23, %26 : vector<8x256xf32>
    %28 = math.tanh %27 : vector<8x256xf32>
    %29 = arith.subf %4, %28 : vector<8x256xf32>
    %30 = arith.mulf %22, %29 : vector<8x256xf32>
    %31 = arith.addf %28, %30 : vector<8x256xf32>
    %32 = vector.extract_strided_slice %31 {offsets = [0, 128], sizes = [8, 128], strides = [1, 1]} : vector<8x256xf32> to vector<8x128xf32>
    %cst_9 = arith.constant dense<0.000000e+00> : vector<8x768xf32>
    %33 = tpu.matmul %31, %0, %cst_9 {dimension_numbers = #tpu.dot_dimension_numbers<[1], [0], [0], [1], [0, 0, 1, 1], [], []>} : vector<8x256xf32>, vector<256x768xf32>, vector<8x768xf32> -> vector<8x768xf32>
    %c8 = arith.constant 8 : index
    %c0_10 = arith.constant 0 : index
    %34 = vector.load %arg0[%c8, %c0_10] : memref<64x768xf32, #tpu.memory_space<vmem>>, vector<8x768xf32>
    %35 = vector.extract_strided_slice %34 {offsets = [0, 0], sizes = [8, 256], strides = [1, 1]} : vector<8x768xf32> to vector<8x256xf32>
    %36 = vector.extract_strided_slice %33 {offsets = [0, 0], sizes = [8, 256], strides = [1, 1]} : vector<8x768xf32> to vector<8x256xf32>
    %37 = arith.addf %35, %36 : vector<8x256xf32>
    %38 = arith.negf %37 : vector<8x256xf32>
    %39 = math.exp %38 : vector<8x256xf32>
    %cst_11 = arith.constant 1.000000e+00 : f32
    %40 = vector.broadcast %cst_11 : f32 to vector<8x256xf32>
    %41 = arith.addf %40, %39 : vector<8x256xf32>
    %42 = arith.divf %40, %41 : vector<8x256xf32>
    %43 = vector.extract_strided_slice %34 {offsets = [0, 256], sizes = [8, 256], strides = [1, 1]} : vector<8x768xf32> to vector<8x256xf32>
    %44 = vector.extract_strided_slice %33 {offsets = [0, 256], sizes = [8, 256], strides = [1, 1]} : vector<8x768xf32> to vector<8x256xf32>
    %45 = arith.addf %43, %44 : vector<8x256xf32>
    %46 = arith.negf %45 : vector<8x256xf32>
    %47 = math.exp %46 : vector<8x256xf32>
    %cst_12 = arith.constant 1.000000e+00 : f32
    %48 = vector.broadcast %cst_12 : f32 to vector<8x256xf32>
    %49 = arith.addf %48, %47 : vector<8x256xf32>
    %50 = arith.divf %48, %49 : vector<8x256xf32>
    %51 = vector.extract_strided_slice %34 {offsets = [0, 512], sizes = [8, 256], strides = [1, 1]} : vector<8x768xf32> to vector<8x256xf32>
    %52 = vector.extract_strided_slice %33 {offsets = [0, 512], sizes = [8, 256], strides = [1, 1]} : vector<8x768xf32> to vector<8x256xf32>
    %53 = arith.addf %52, %3 : vector<8x256xf32>
    %54 = arith.mulf %42, %53 : vector<8x256xf32>
    %55 = arith.addf %51, %54 : vector<8x256xf32>
    %56 = math.tanh %55 : vector<8x256xf32>
    %57 = arith.subf %31, %56 : vector<8x256xf32>
    %58 = arith.mulf %50, %57 : vector<8x256xf32>
    %59 = arith.addf %56, %58 : vector<8x256xf32>
    %cst_13 = arith.constant dense<0.000000e+00> : vector<8x768xf32>
    %60 = tpu.matmul %59, %0, %cst_13 {dimension_numbers = #tpu.dot_dimension_numbers<[1], [0], [0], [1], [0, 0, 1, 1], [], []>} : vector<8x256xf32>, vector<256x768xf32>, vector<8x768xf32> -> vector<8x768xf32>
    %c16 = arith.constant 16 : index
    %c0_14 = arith.constant 0 : index
    %61 = vector.load %arg0[%c16, %c0_14] : memref<64x768xf32, #tpu.memory_space<vmem>>, vector<8x768xf32>
    %62 = vector.extract_strided_slice %61 {offsets = [0, 0], sizes = [8, 256], strides = [1, 1]} : vector<8x768xf32> to vector<8x256xf32>
    %63 = vector.extract_strided_slice %60 {offsets = [0, 0], sizes = [8, 256], strides = [1, 1]} : vector<8x768xf32> to vector<8x256xf32>
    %64 = arith.addf %62, %63 : vector<8x256xf32>
    %65 = arith.negf %64 : vector<8x256xf32>
    %66 = math.exp %65 : vector<8x256xf32>
    %cst_15 = arith.constant 1.000000e+00 : f32
    %67 = vector.broadcast %cst_15 : f32 to vector<8x256xf32>
    %68 = arith.addf %67, %66 : vector<8x256xf32>
    %69 = arith.divf %67, %68 : vector<8x256xf32>
    %70 = vector.extract_strided_slice %61 {offsets = [0, 256], sizes = [8, 256], strides = [1, 1]} : vector<8x768xf32> to vector<8x256xf32>
    %71 = vector.extract_strided_slice %60 {offsets = [0, 256], sizes = [8, 256], strides = [1, 1]} : vector<8x768xf32> to vector<8x256xf32>
    %72 = arith.addf %70, %71 : vector<8x256xf32>
    %73 = arith.negf %72 : vector<8x256xf32>
    %74 = math.exp %73 : vector<8x256xf32>
    %cst_16 = arith.constant 1.000000e+00 : f32
    %75 = vector.broadcast %cst_16 : f32 to vector<8x256xf32>
    %76 = arith.addf %75, %74 : vector<8x256xf32>
    %77 = arith.divf %75, %76 : vector<8x256xf32>
    %78 = vector.extract_strided_slice %61 {offsets = [0, 512], sizes = [8, 256], strides = [1, 1]} : vector<8x768xf32> to vector<8x256xf32>
    %79 = vector.extract_strided_slice %60 {offsets = [0, 512], sizes = [8, 256], strides = [1, 1]} : vector<8x768xf32> to vector<8x256xf32>
    %80 = arith.addf %79, %3 : vector<8x256xf32>
    %81 = arith.mulf %69, %80 : vector<8x256xf32>
    %82 = arith.addf %78, %81 : vector<8x256xf32>
    %83 = math.tanh %82 : vector<8x256xf32>
    %84 = arith.subf %59, %83 : vector<8x256xf32>
    %85 = arith.mulf %77, %84 : vector<8x256xf32>
    %86 = arith.addf %83, %85 : vector<8x256xf32>
    %cst_17 = arith.constant dense<0.000000e+00> : vector<8x768xf32>
    %87 = tpu.matmul %86, %0, %cst_17 {dimension_numbers = #tpu.dot_dimension_numbers<[1], [0], [0], [1], [0, 0, 1, 1], [], []>} : vector<8x256xf32>, vector<256x768xf32>, vector<8x768xf32> -> vector<8x768xf32>
    %c24 = arith.constant 24 : index
    %c0_18 = arith.constant 0 : index
    %88 = vector.load %arg0[%c24, %c0_18] : memref<64x768xf32, #tpu.memory_space<vmem>>, vector<8x768xf32>
    %89 = vector.extract_strided_slice %88 {offsets = [0, 0], sizes = [8, 256], strides = [1, 1]} : vector<8x768xf32> to vector<8x256xf32>
    %90 = vector.extract_strided_slice %87 {offsets = [0, 0], sizes = [8, 256], strides = [1, 1]} : vector<8x768xf32> to vector<8x256xf32>
    %91 = arith.addf %89, %90 : vector<8x256xf32>
    %92 = arith.negf %91 : vector<8x256xf32>
    %93 = math.exp %92 : vector<8x256xf32>
    %cst_19 = arith.constant 1.000000e+00 : f32
    %94 = vector.broadcast %cst_19 : f32 to vector<8x256xf32>
    %95 = arith.addf %94, %93 : vector<8x256xf32>
    %96 = arith.divf %94, %95 : vector<8x256xf32>
    %97 = vector.extract_strided_slice %88 {offsets = [0, 256], sizes = [8, 256], strides = [1, 1]} : vector<8x768xf32> to vector<8x256xf32>
    %98 = vector.extract_strided_slice %87 {offsets = [0, 256], sizes = [8, 256], strides = [1, 1]} : vector<8x768xf32> to vector<8x256xf32>
    %99 = arith.addf %97, %98 : vector<8x256xf32>
    %100 = arith.negf %99 : vector<8x256xf32>
    %101 = math.exp %100 : vector<8x256xf32>
    %cst_20 = arith.constant 1.000000e+00 : f32
    %102 = vector.broadcast %cst_20 : f32 to vector<8x256xf32>
    %103 = arith.addf %102, %101 : vector<8x256xf32>
    %104 = arith.divf %102, %103 : vector<8x256xf32>
    %105 = vector.extract_strided_slice %88 {offsets = [0, 512], sizes = [8, 256], strides = [1, 1]} : vector<8x768xf32> to vector<8x256xf32>
    %106 = vector.extract_strided_slice %87 {offsets = [0, 512], sizes = [8, 256], strides = [1, 1]} : vector<8x768xf32> to vector<8x256xf32>
    %107 = arith.addf %106, %3 : vector<8x256xf32>
    %108 = arith.mulf %96, %107 : vector<8x256xf32>
    %109 = arith.addf %105, %108 : vector<8x256xf32>
    %110 = math.tanh %109 : vector<8x256xf32>
    %111 = arith.subf %86, %110 : vector<8x256xf32>
    %112 = arith.mulf %104, %111 : vector<8x256xf32>
    %113 = arith.addf %110, %112 : vector<8x256xf32>
    %cst_21 = arith.constant dense<0.000000e+00> : vector<8x768xf32>
    %114 = tpu.matmul %113, %0, %cst_21 {dimension_numbers = #tpu.dot_dimension_numbers<[1], [0], [0], [1], [0, 0, 1, 1], [], []>} : vector<8x256xf32>, vector<256x768xf32>, vector<8x768xf32> -> vector<8x768xf32>
    %c32 = arith.constant 32 : index
    %c0_22 = arith.constant 0 : index
    %115 = vector.load %arg0[%c32, %c0_22] : memref<64x768xf32, #tpu.memory_space<vmem>>, vector<8x768xf32>
    %116 = vector.extract_strided_slice %115 {offsets = [0, 0], sizes = [8, 256], strides = [1, 1]} : vector<8x768xf32> to vector<8x256xf32>
    %117 = vector.extract_strided_slice %114 {offsets = [0, 0], sizes = [8, 256], strides = [1, 1]} : vector<8x768xf32> to vector<8x256xf32>
    %118 = arith.addf %116, %117 : vector<8x256xf32>
    %119 = arith.negf %118 : vector<8x256xf32>
    %120 = math.exp %119 : vector<8x256xf32>
    %cst_23 = arith.constant 1.000000e+00 : f32
    %121 = vector.broadcast %cst_23 : f32 to vector<8x256xf32>
    %122 = arith.addf %121, %120 : vector<8x256xf32>
    %123 = arith.divf %121, %122 : vector<8x256xf32>
    %124 = vector.extract_strided_slice %115 {offsets = [0, 256], sizes = [8, 256], strides = [1, 1]} : vector<8x768xf32> to vector<8x256xf32>
    %125 = vector.extract_strided_slice %114 {offsets = [0, 256], sizes = [8, 256], strides = [1, 1]} : vector<8x768xf32> to vector<8x256xf32>
    %126 = arith.addf %124, %125 : vector<8x256xf32>
    %127 = arith.negf %126 : vector<8x256xf32>
    %128 = math.exp %127 : vector<8x256xf32>
    %cst_24 = arith.constant 1.000000e+00 : f32
    %129 = vector.broadcast %cst_24 : f32 to vector<8x256xf32>
    %130 = arith.addf %129, %128 : vector<8x256xf32>
    %131 = arith.divf %129, %130 : vector<8x256xf32>
    %132 = vector.extract_strided_slice %115 {offsets = [0, 512], sizes = [8, 256], strides = [1, 1]} : vector<8x768xf32> to vector<8x256xf32>
    %133 = vector.extract_strided_slice %114 {offsets = [0, 512], sizes = [8, 256], strides = [1, 1]} : vector<8x768xf32> to vector<8x256xf32>
    %134 = arith.addf %133, %3 : vector<8x256xf32>
    %135 = arith.mulf %123, %134 : vector<8x256xf32>
    %136 = arith.addf %132, %135 : vector<8x256xf32>
    %137 = math.tanh %136 : vector<8x256xf32>
    %138 = arith.subf %113, %137 : vector<8x256xf32>
    %139 = arith.mulf %131, %138 : vector<8x256xf32>
    %140 = arith.addf %137, %139 : vector<8x256xf32>
    %cst_25 = arith.constant dense<0.000000e+00> : vector<8x768xf32>
    %141 = tpu.matmul %140, %0, %cst_25 {dimension_numbers = #tpu.dot_dimension_numbers<[1], [0], [0], [1], [0, 0, 1, 1], [], []>} : vector<8x256xf32>, vector<256x768xf32>, vector<8x768xf32> -> vector<8x768xf32>
    %c40 = arith.constant 40 : index
    %c0_26 = arith.constant 0 : index
    %142 = vector.load %arg0[%c40, %c0_26] : memref<64x768xf32, #tpu.memory_space<vmem>>, vector<8x768xf32>
    %143 = vector.extract_strided_slice %142 {offsets = [0, 0], sizes = [8, 256], strides = [1, 1]} : vector<8x768xf32> to vector<8x256xf32>
    %144 = vector.extract_strided_slice %141 {offsets = [0, 0], sizes = [8, 256], strides = [1, 1]} : vector<8x768xf32> to vector<8x256xf32>
    %145 = arith.addf %143, %144 : vector<8x256xf32>
    %146 = arith.negf %145 : vector<8x256xf32>
    %147 = math.exp %146 : vector<8x256xf32>
    %cst_27 = arith.constant 1.000000e+00 : f32
    %148 = vector.broadcast %cst_27 : f32 to vector<8x256xf32>
    %149 = arith.addf %148, %147 : vector<8x256xf32>
    %150 = arith.divf %148, %149 : vector<8x256xf32>
    %151 = vector.extract_strided_slice %142 {offsets = [0, 256], sizes = [8, 256], strides = [1, 1]} : vector<8x768xf32> to vector<8x256xf32>
    %152 = vector.extract_strided_slice %141 {offsets = [0, 256], sizes = [8, 256], strides = [1, 1]} : vector<8x768xf32> to vector<8x256xf32>
    %153 = arith.addf %151, %152 : vector<8x256xf32>
    %154 = arith.negf %153 : vector<8x256xf32>
    %155 = math.exp %154 : vector<8x256xf32>
    %cst_28 = arith.constant 1.000000e+00 : f32
    %156 = vector.broadcast %cst_28 : f32 to vector<8x256xf32>
    %157 = arith.addf %156, %155 : vector<8x256xf32>
    %158 = arith.divf %156, %157 : vector<8x256xf32>
    %159 = vector.extract_strided_slice %142 {offsets = [0, 512], sizes = [8, 256], strides = [1, 1]} : vector<8x768xf32> to vector<8x256xf32>
    %160 = vector.extract_strided_slice %141 {offsets = [0, 512], sizes = [8, 256], strides = [1, 1]} : vector<8x768xf32> to vector<8x256xf32>
    %161 = arith.addf %160, %3 : vector<8x256xf32>
    %162 = arith.mulf %150, %161 : vector<8x256xf32>
    %163 = arith.addf %159, %162 : vector<8x256xf32>
    %164 = math.tanh %163 : vector<8x256xf32>
    %165 = arith.subf %140, %164 : vector<8x256xf32>
    %166 = arith.mulf %158, %165 : vector<8x256xf32>
    %167 = arith.addf %164, %166 : vector<8x256xf32>
    %cst_29 = arith.constant dense<0.000000e+00> : vector<8x768xf32>
    %168 = tpu.matmul %167, %0, %cst_29 {dimension_numbers = #tpu.dot_dimension_numbers<[1], [0], [0], [1], [0, 0, 1, 1], [], []>} : vector<8x256xf32>, vector<256x768xf32>, vector<8x768xf32> -> vector<8x768xf32>
    %c48 = arith.constant 48 : index
    %c0_30 = arith.constant 0 : index
    %169 = vector.load %arg0[%c48, %c0_30] : memref<64x768xf32, #tpu.memory_space<vmem>>, vector<8x768xf32>
    %170 = vector.extract_strided_slice %169 {offsets = [0, 0], sizes = [8, 256], strides = [1, 1]} : vector<8x768xf32> to vector<8x256xf32>
    %171 = vector.extract_strided_slice %168 {offsets = [0, 0], sizes = [8, 256], strides = [1, 1]} : vector<8x768xf32> to vector<8x256xf32>
    %172 = arith.addf %170, %171 : vector<8x256xf32>
    %173 = arith.negf %172 : vector<8x256xf32>
    %174 = math.exp %173 : vector<8x256xf32>
    %cst_31 = arith.constant 1.000000e+00 : f32
    %175 = vector.broadcast %cst_31 : f32 to vector<8x256xf32>
    %176 = arith.addf %175, %174 : vector<8x256xf32>
    %177 = arith.divf %175, %176 : vector<8x256xf32>
    %178 = vector.extract_strided_slice %169 {offsets = [0, 256], sizes = [8, 256], strides = [1, 1]} : vector<8x768xf32> to vector<8x256xf32>
    %179 = vector.extract_strided_slice %168 {offsets = [0, 256], sizes = [8, 256], strides = [1, 1]} : vector<8x768xf32> to vector<8x256xf32>
    %180 = arith.addf %178, %179 : vector<8x256xf32>
    %181 = arith.negf %180 : vector<8x256xf32>
    %182 = math.exp %181 : vector<8x256xf32>
    %cst_32 = arith.constant 1.000000e+00 : f32
    %183 = vector.broadcast %cst_32 : f32 to vector<8x256xf32>
    %184 = arith.addf %183, %182 : vector<8x256xf32>
    %185 = arith.divf %183, %184 : vector<8x256xf32>
    %186 = vector.extract_strided_slice %169 {offsets = [0, 512], sizes = [8, 256], strides = [1, 1]} : vector<8x768xf32> to vector<8x256xf32>
    %187 = vector.extract_strided_slice %168 {offsets = [0, 512], sizes = [8, 256], strides = [1, 1]} : vector<8x768xf32> to vector<8x256xf32>
    %188 = arith.addf %187, %3 : vector<8x256xf32>
    %189 = arith.mulf %177, %188 : vector<8x256xf32>
    %190 = arith.addf %186, %189 : vector<8x256xf32>
    %191 = math.tanh %190 : vector<8x256xf32>
    %192 = arith.subf %167, %191 : vector<8x256xf32>
    %193 = arith.mulf %185, %192 : vector<8x256xf32>
    %194 = arith.addf %191, %193 : vector<8x256xf32>
    %cst_33 = arith.constant dense<0.000000e+00> : vector<8x768xf32>
    %195 = tpu.matmul %194, %0, %cst_33 {dimension_numbers = #tpu.dot_dimension_numbers<[1], [0], [0], [1], [0, 0, 1, 1], [], []>} : vector<8x256xf32>, vector<256x768xf32>, vector<8x768xf32> -> vector<8x768xf32>
    %c56 = arith.constant 56 : index
    %c0_34 = arith.constant 0 : index
    %196 = vector.load %arg0[%c56, %c0_34] : memref<64x768xf32, #tpu.memory_space<vmem>>, vector<8x768xf32>
    %197 = vector.extract_strided_slice %196 {offsets = [0, 0], sizes = [8, 256], strides = [1, 1]} : vector<8x768xf32> to vector<8x256xf32>
    %198 = vector.extract_strided_slice %195 {offsets = [0, 0], sizes = [8, 256], strides = [1, 1]} : vector<8x768xf32> to vector<8x256xf32>
    %199 = arith.addf %197, %198 : vector<8x256xf32>
    %200 = arith.negf %199 : vector<8x256xf32>
    %201 = math.exp %200 : vector<8x256xf32>
    %cst_35 = arith.constant 1.000000e+00 : f32
    %202 = vector.broadcast %cst_35 : f32 to vector<8x256xf32>
    %203 = arith.addf %202, %201 : vector<8x256xf32>
    %204 = arith.divf %202, %203 : vector<8x256xf32>
    %205 = vector.extract_strided_slice %196 {offsets = [0, 256], sizes = [8, 256], strides = [1, 1]} : vector<8x768xf32> to vector<8x256xf32>
    %206 = vector.extract_strided_slice %195 {offsets = [0, 256], sizes = [8, 256], strides = [1, 1]} : vector<8x768xf32> to vector<8x256xf32>
    %207 = arith.addf %205, %206 : vector<8x256xf32>
    %208 = arith.negf %207 : vector<8x256xf32>
    %209 = math.exp %208 : vector<8x256xf32>
    %cst_36 = arith.constant 1.000000e+00 : f32
    %210 = vector.broadcast %cst_36 : f32 to vector<8x256xf32>
    %211 = arith.addf %210, %209 : vector<8x256xf32>
    %212 = arith.divf %210, %211 : vector<8x256xf32>
    %213 = vector.extract_strided_slice %196 {offsets = [0, 512], sizes = [8, 256], strides = [1, 1]} : vector<8x768xf32> to vector<8x256xf32>
    %214 = vector.extract_strided_slice %195 {offsets = [0, 512], sizes = [8, 256], strides = [1, 1]} : vector<8x768xf32> to vector<8x256xf32>
    %215 = arith.addf %214, %3 : vector<8x256xf32>
    %216 = arith.mulf %204, %215 : vector<8x256xf32>
    %217 = arith.addf %213, %216 : vector<8x256xf32>
    %218 = math.tanh %217 : vector<8x256xf32>
    %219 = arith.subf %194, %218 : vector<8x256xf32>
    %220 = arith.mulf %212, %219 : vector<8x256xf32>
    %221 = arith.addf %218, %220 : vector<8x256xf32>
    %222 = vector.extract_strided_slice %221 {offsets = [0, 0], sizes = [8, 128], strides = [1, 1]} : vector<8x256xf32> to vector<8x128xf32>
    %223 = tpu.concatenate %222, %32 in 1 : vector<8x128xf32>, vector<8x128xf32> -> vector<8x256xf32>
    %c0_37 = arith.constant 0 : index
    %c0_38 = arith.constant 0 : index
    %224 = vector.load %arg4[%c0_37, %c0_38] : memref<256x128xf32, #tpu.memory_space<vmem>>, vector<256x128xf32>
    %cst_39 = arith.constant dense<0.000000e+00> : vector<8x128xf32>
    %225 = tpu.matmul %223, %224, %cst_39 {dimension_numbers = #tpu.dot_dimension_numbers<[1], [0], [0], [1], [0, 0, 1, 1], [], []>} : vector<8x256xf32>, vector<256x128xf32>, vector<8x128xf32> -> vector<8x128xf32>
    %c0_40 = arith.constant 0 : index
    %c0_41 = arith.constant 0 : index
    %226 = vector.load %arg5[%c0_40, %c0_41] : memref<1x128xf32, #tpu.memory_space<vmem>>, vector<1x128xf32>
    %227 = vector.broadcast %226 : vector<1x128xf32> to vector<8x128xf32>
    %228 = arith.addf %225, %227 : vector<8x128xf32>
    %c0_42 = arith.constant 0 : index
    %c0_43 = arith.constant 0 : index
    %229 = vector.load %arg6[%c0_42, %c0_43] : memref<8x128xf32, #tpu.memory_space<vmem>>, vector<8x128xf32>
    tpu.vector_store %arg6[%c0_42, %c0_43], %228 {strides = array<i32>} : memref<8x128xf32, #tpu.memory_space<vmem>>, vector<8x128xf32>,
    %c0_44 = arith.constant 0 : index
    %c0_45 = arith.constant 0 : index
    %230 = vector.load %arg7[%c0_44, %c0_45] : memref<8x256xf32, #tpu.memory_space<vmem>>, vector<8x256xf32>
    tpu.vector_store %arg7[%c0_44, %c0_45], %221 {strides = array<i32>} : memref<8x256xf32, #tpu.memory_space<vmem>>, vector<8x256xf32>,
    return
  }
}

</mosaic_0001>

<bundles_post_ra>
// kernel: bigru_forward.1
= control target key start
LH: loop header
LB: loop body
LE: loop exit
PB: predicated region body
PF: predicated region fallthrough
CT: control target
= control target key end

     0   :  { %s6189_s2 = inlined_call_operand.vmem [shape: f32[256,768], index: 2, kind: input, shape index: {}]   ;;  %s6190_s1 = inlined_call_operand.vmem [shape: f32[8,256], index: 1, kind: input, shape index: {}]   ;;  %s6191_s0 = inlined_call_operand.vmem [shape: f32[64,768], index: 0, kind: input, shape index: {}]   ;;  %s6192_s3 = inlined_call_operand.vmem [shape: f32[1,256], index: 3, kind: input, shape index: {}]   ;;  %s6193_s4 = inlined_call_operand.vmem [shape: f32[256,128], index: 4, kind: input, shape index: {}]   ;;  %s6194_s7 = inlined_call_operand.vmem [shape: f32[8,256], index: 7, kind: output, shape index: {1}]   ;;  %s6195_s5 = inlined_call_operand.vmem [shape: f32[1,128], index: 5, kind: input, shape index: {}]   ;;  %s6196_s6 = inlined_call_operand.vmem [shape: f32[8,128], index: 6, kind: output, shape index: {0}]  }
   0x1   :  { %v26_v0 = vld [vmem:[%s6189_s2 + $0x8] sm:$0xff]  ;;  %v32_v1 = vld [vmem:[%s6189_s2 + $0x38] sm:$0xff]  ;;  %v25_v2 = vld [vmem:[%s6189_s2] sm:$0xff] }
   0x2   :  { %v4284_v3 = vpack.c.bf16 %v32_v1, %v26_v0  ;;  %v31_v4 = vld [vmem:[%s6189_s2 + $0x30] sm:$0xff]  ;;  %v38_v5 = vld [vmem:[%s6189_s2 + $0x68] sm:$0xff]  ;;  %v44_v6 = vld [vmem:[%s6189_s2 + $0x98] sm:$0xff] }
   0x3   :  { %v4295_v7 = vpack.c.bf16 %v31_v4, %v25_v2  ;;  %v4297_v8 = vpack.c.bf16 %v44_v6, %v38_v5  ;;  %v37_v9 = vld [vmem:[%s6189_s2 + $0x60] sm:$0xff]  ;;  %v43_v10 = vld [vmem:[%s6189_s2 + $0x90] sm:$0xff]  ;;  %v50_v11 = vld [vmem:[%s6189_s2 + $0xc8] sm:$0xff] }
   0x4   :  { %6357 = vst [vmem:[#allocation2_spill] sm:$0xff] %v4284_v3  ;;  %2508 = vmatprep.subr.bf16.mxu0 %v4284_v3  ;;  %v56_v12 = vld [vmem:[%s6189_s2 + $0xf8] sm:$0xff]  ;;  %v4313_v13 = vpack.c.bf16 %v43_v10, %v37_v9  ;;  %v49_v15 = vld [vmem:[%s6189_s2 + $0xc0] sm:$0xff]  ;;  %v55_v16 = vld [vmem:[%s6189_s2 + $0xf0] sm:$0xff] }
   0x5   :  { %2510 = vmatpush1.bf16.msra.mxu0 %v4295_v7  ;;  %v4316_v14 = vpack.c.bf16 %v56_v12, %v50_v11  ;;  %v62_v17 = vld [vmem:[%s6189_s2 + $0x128] sm:$0xff]  ;;  %v68_v18 = vld [vmem:[%s6189_s2 + $0x158] sm:$0xff]  ;;  %v4331_v19 = vpack.c.bf16 %v55_v16, %v49_v15  ;;  %v61_v21 = vld [vmem:[%s6189_s2 + $0x120] sm:$0xff] }
   0x6   :  { %2512 = vmatprep.subr.bf16.mxu0 %v4297_v8  ;;  %v4334_v20 = vpack.c.bf16 %v68_v18, %v62_v17  ;;  %v67_v22 = vld [vmem:[%s6189_s2 + $0x150] sm:$0xff]  ;;  %v74_v23 = vld [vmem:[%s6189_s2 + $0x188] sm:$0xff]  ;;  %v80_v24 = vld [vmem:[%s6189_s2 + $0x1b8] sm:$0xff] }
   0x7   :  { %v4349_v25 = vpack.c.bf16 %v67_v22, %v61_v21  ;;  %v4352_v26 = vpack.c.bf16 %v80_v24, %v74_v23  ;;  %v73_v27 = vld [vmem:[%s6189_s2 + $0x180] sm:$0xff]  ;;  %v79_v28 = vld [vmem:[%s6189_s2 + $0x1b0] sm:$0xff]  ;;  %v86_v29 = vld [vmem:[%s6189_s2 + $0x1e8] sm:$0xff] }
   0x8   :  { %v92_v30 = vld [vmem:[%s6189_s2 + $0x218] sm:$0xff]  ;;  %v4367_v31 = vpack.c.bf16 %v79_v28, %v73_v27  ;;  %v85_v33 = vld [vmem:[%s6189_s2 + $0x1e0] sm:$0xff]  ;;  %v91_v34 = vld [vmem:[%s6189_s2 + $0x210] sm:$0xff] }
   0x9   :  { %2514 = vmatpush1.bf16.msra.mxu0 %v4313_v13  ;;  %v4370_v32 = vpack.c.bf16 %v92_v30, %v86_v29  ;;  %v98_v35 = vld [vmem:[%s6189_s2 + $0x248] sm:$0xff]  ;;  %v104_v36 = vld [vmem:[%s6189_s2 + $0x278] sm:$0xff]  ;;  %v27_v39 = vld [vmem:[%s6189_s2 + $0x10] sm:$0xff]  ;;  %v4397_v41 = vpack.c.bf16 %v91_v34, %v85_v33 }
   0xa   :  { %2516 = vmatprep.subr.bf16.mxu0 %v4316_v14  ;;  %v28_v37 = vld [vmem:[%s6189_s2 + $0x18] sm:$0xff]  ;;  %v34_v38 = vld [vmem:[%s6189_s2 + $0x48] sm:$0xff]  ;;  %v33_v40 = vld [vmem:[%s6189_s2 + $0x40] sm:$0xff]  ;;  %v4410_v46 = vpack.c.bf16 %v104_v36, %v98_v35 }
   0xb   :  { %v97_v42 = vld [vmem:[%s6189_s2 + $0x240] sm:$0xff]  ;;  %v103_v43 = vld [vmem:[%s6189_s2 + $0x270] sm:$0xff]  ;;  %v4405_v44 = vpack.c.bf16 %v34_v38, %v28_v37  ;;  %v4407_v45 = vpack.c.bf16 %v33_v40, %v27_v39  ;;  %v110_v47 = vld [vmem:[%s6189_s2 + $0x2a8] sm:$0xff] }
   0xc   :  { %v40_v48 = vld [vmem:[%s6189_s2 + $0x78] sm:$0xff]  ;;  %v46_v49 = vld [vmem:[%s6189_s2 + $0xa8] sm:$0xff]  ;;  %v39_v52 = vld [vmem:[%s6189_s2 + $0x70] sm:$0xff]  ;;  %v4440_v56 = vpack.c.bf16 %v103_v43, %v97_v42 }
   0xd   :  { %2518 = vmatpush1.bf16.msra.mxu0 %v4331_v19  ;;  %6358 = vst [vmem:[#allocation3_spill] sm:$0xff] %v4405_v44  ;;  %6359 = vst [vmem:[#allocation4_spill] sm:$0xff] %v4407_v45  ;;  %v116_v50 = vld [vmem:[%s6189_s2 + $0x2d8] sm:$0xff]  ;;  %2572 = vmatprep.subr.bf16.mxu1 %v4405_v44  ;;  %v4425_v51 = vpack.c.bf16 %v46_v49, %v40_v48  ;;  %v45_v53 = vld [vmem:[%s6189_s2 + $0xa0] sm:$0xff] }
   0xe   :  { %2520 = vmatprep.subr.bf16.mxu0 %v4334_v20  ;;  %v109_v54 = vld [vmem:[%s6189_s2 + $0x2a0] sm:$0xff]  ;;  %2574 = vmatpush1.bf16.msra.mxu1 %v4407_v45  ;;  %v4437_v55 = vpack.c.bf16 %v45_v53, %v39_v52  ;;  %v52_v57 = vld [vmem:[%s6189_s2 + $0xd8] sm:$0xff]  ;;  %v58_v58 = vld [vmem:[%s6189_s2 + $0x108] sm:$0xff]  ;;  %v4455_v60 = vpack.c.bf16 %v116_v50, %v110_v47 }
   0xf   :  { %6360 = vst [vmem:[#allocation5_spill] sm:$0xff] %v4425_v51  ;;  %2576 = vmatprep.subr.bf16.mxu1 %v4425_v51  ;;  %v4452_v59 = vld [vmem:[%s6190_s1 + $0x8] sm:$0xff]  ;;  %v115_v61 = vld [vmem:[%s6189_s2 + $0x2d0] sm:$0xff]  ;;  %v4460_v62 = vpack.c.bf16 %v58_v58, %v52_v57  ;;  %v57_v0 = vld [vmem:[%s6189_s2 + $0x100] sm:$0xff] }
  0x10   :  { %6361 = vst [vmem:[#allocation6_spill] sm:$0xff] %v4437_v55  ;;  %6362 = vst [vmem:[#allocation7_spill] sm:$0xff] %v4452_v59  ;;  %295 = vmatprep.mubr.f32.mxu0 %v4452_v59  ;;  %v51_v63 = vld [vmem:[%s6189_s2 + $0xd0] sm:$0xff]  ;;  %v122_v1 = vld [vmem:[%s6189_s2 + $0x308] sm:$0xff]  ;;  %366 = vmatprep.mubr.f32.mxu1 %v4452_v59  ;;  %v4486_v9 = vpack.c.bf16 %v115_v61, %v109_v54 }
  0x11   :  { %2522 = vmatpush1.bf16.msra.mxu0 %v4349_v25  ;;  %6363 = vst [vmem:[#allocation8_spill] sm:$0xff] %v4460_v62  ;;  %v128_v2 = vld [vmem:[%s6189_s2 + $0x338] sm:$0xff]  ;;  %v4477_v4 = vpack.c.bf16 %v57_v0, %v51_v63  ;;  %v70_v6 = vld [vmem:[%s6189_s2 + $0x168] sm:$0xff]  ;;  %v63_v11 = vld [vmem:[%s6189_s2 + $0x130] sm:$0xff] }
  0x12   :  { %2524 = vmatprep.subr.bf16.mxu0 %v4352_v26  ;;  %2578 = vmatpush1.bf16.msra.mxu1 %v4437_v55  ;;  %v64_v5 = vld [vmem:[%s6189_s2 + $0x138] sm:$0xff]  ;;  %v69_v12 = vld [vmem:[%s6189_s2 + $0x160] sm:$0xff]  ;;  %v4498_v15 = vpack.c.bf16 %v128_v2, %v122_v1  ;;  %v127_v17 = vld [vmem:[%s6189_s2 + $0x330] sm:$0xff] }
  0x13   :  { %6364 = vst [vmem:[#allocation9_spill] sm:$0xff] %v4477_v4  ;;  %2580 = vmatprep.subr.bf16.mxu1 %v4460_v62  ;;  %v4489_v10 = vpack.c.bf16 %v70_v6, %v64_v5  ;;  %v121_v16 = vld [vmem:[%s6189_s2 + $0x300] sm:$0xff]  ;;  %v134_v18 = vld [vmem:[%s6189_s2 + $0x368] sm:$0xff]  ;;  %v140_v21 = vld [vmem:[%s6189_s2 + $0x398] sm:$0xff]  ;;  %v4519_v24 = vpack.c.bf16 %v69_v12, %v63_v11 }
  0x14   :  { %v76_v22 = vld [vmem:[%s6189_s2 + $0x198] sm:$0xff]  ;;  %v82_v23 = vld [vmem:[%s6189_s2 + $0x1c8] sm:$0xff]  ;;  %v4522_v27 = vpack.c.bf16 %v127_v17, %v121_v16  ;;  %v133_v28 = vld [vmem:[%s6189_s2 + $0x360] sm:$0xff]  ;;  %v4537_v34 = vpack.c.bf16 %v140_v21, %v134_v18 }
  0x15   :  { %2526 = vmatpush1.bf16.msra.mxu0 %v4367_v31  ;;  %6365 = vst [vmem:[#allocation10_spill] sm:$0xff] %v4489_v10  ;;  %6366 = vst [vmem:[#allocation11_spill] sm:$0xff] %v4519_v24  ;;  %v4528_v29 = vpack.c.bf16 %v82_v23, %v76_v22  ;;  %v75_v30 = vld [vmem:[%s6189_s2 + $0x190] sm:$0xff]  ;;  %v81_v33 = vld [vmem:[%s6189_s2 + $0x1c0] sm:$0xff] }
  0x16   :  { %2528 = vmatprep.subr.bf16.mxu0 %v4370_v32  ;;  %2582 = vmatpush1.bf16.msra.mxu1 %v4477_v4  ;;  %6367 = vst [vmem:[#allocation12_spill] sm:$0xff] %v4522_v27  ;;  %v139_v35 = vld [vmem:[%s6189_s2 + $0x390] sm:$0xff]  ;;  %v88_v36 = vld [vmem:[%s6189_s2 + $0x1f8] sm:$0xff]  ;;  %v94_v37 = vld [vmem:[%s6189_s2 + $0x228] sm:$0xff]  ;;  %v4555_v40 = vpack.c.bf16 %v81_v33, %v75_v30 }
  0x17   :  { %2584 = vmatprep.subr.bf16.mxu1 %v4489_v10  ;;  %6368 = vst [vmem:[#allocation13_spill] sm:$0xff] %v4528_v29  ;;  %v146_v38 = vld [vmem:[%s6189_s2 + $0x3c8] sm:$0xff]  ;;  %v152_v39 = vld [vmem:[%s6189_s2 + $0x3f8] sm:$0xff]  ;;  %v4558_v42 = vpack.c.bf16 %v139_v35, %v133_v28  ;;  %v145_v43 = vld [vmem:[%s6189_s2 + $0x3c0] sm:$0xff]  ;;  %v4564_v47 = vpack.c.bf16 %v94_v37, %v88_v36 }
  0x18   :  { %6369 = vst [vmem:[#allocation14_spill] sm:$0xff] %v4555_v40  ;;  %v87_v48 = vld [vmem:[%s6189_s2 + $0x1f0] sm:$0xff]  ;;  %v93_v49 = vld [vmem:[%s6189_s2 + $0x220] sm:$0xff]  ;;  %v4573_v50 = vpack.c.bf16 %v152_v39, %v146_v38  ;;  %v100_v53 = vld [vmem:[%s6189_s2 + $0x258] sm:$0xff] }
  0x19   :  { %2530 = vmatpush1.bf16.msra.mxu0 %v4397_v41  ;;  %6370 = vst [vmem:[#allocation15_spill] sm:$0xff] %v4558_v42  ;;  %6371 = vst [vmem:[#allocation16_spill] sm:$0xff] %v4564_v47  ;;  %v151_v52 = vld [vmem:[%s6189_s2 + $0x3f0] sm:$0xff]  ;;  %v106_v54 = vld [vmem:[%s6189_s2 + $0x288] sm:$0xff]  ;;  %v4591_v61 = vpack.c.bf16 %v93_v49, %v87_v48 }
  0x1a   :  { %2532 = vmatprep.subr.bf16.mxu0 %v4410_v46  ;;  %2586 = vmatpush1.bf16.msra.mxu1 %v4519_v24  ;;  %v158_v57 = vld [vmem:[%s6189_s2 + $0x428] sm:$0xff]  ;;  %v164_v58 = vld [vmem:[%s6189_s2 + $0x458] sm:$0xff]  ;;  %v4594_v63 = vpack.c.bf16 %v151_v52, %v145_v43  ;;  %v157_v0 = vld [vmem:[%s6189_s2 + $0x420] sm:$0xff]  ;;  %v4600_v1 = vpack.c.bf16 %v106_v54, %v100_v53 }
  0x1b   :  { %2588 = vmatprep.subr.bf16.mxu1 %v4528_v29  ;;  %6372 = vst [vmem:[#allocation17_spill] sm:$0xff] %v4591_v61  ;;  %v99_v2 = vld [vmem:[%s6189_s2 + $0x250] sm:$0xff]  ;;  %v105_v5 = vld [vmem:[%s6189_s2 + $0x280] sm:$0xff]  ;;  %v4609_v6 = vpack.c.bf16 %v164_v58, %v158_v57  ;;  %v112_v12 = vld [vmem:[%s6189_s2 + $0x2b8] sm:$0xff] }
  0x1c   :  { %6373 = vst [vmem:[#allocation18_spill] sm:$0xff] %v4594_v63  ;;  %6374 = vst [vmem:[#allocation19_spill] sm:$0xff] %v4600_v1  ;;  %v163_v11 = vld [vmem:[%s6189_s2 + $0x450] sm:$0xff]  ;;  %v118_v16 = vld [vmem:[%s6189_s2 + $0x2e8] sm:$0xff]  ;;  %v4627_v21 = vpack.c.bf16 %v105_v5, %v99_v2 }
  0x1d   :  { %2534 = vmatpush1.bf16.msra.mxu0 %v4440_v56  ;;  %6375 = vst [vmem:[#allocation20_spill] sm:$0xff] %v4609_v6  ;;  %v170_v17 = vld [vmem:[%s6189_s2 + $0x488] sm:$0xff]  ;;  %v176_v18 = vld [vmem:[%s6189_s2 + $0x4b8] sm:$0xff]  ;;  %v4630_v22 = vpack.c.bf16 %v163_v11, %v157_v0  ;;  %v169_v23 = vld [vmem:[%s6189_s2 + $0x480] sm:$0xff]  ;;  %v4636_v28 = vpack.c.bf16 %v118_v16, %v112_v12 }
  0x1e   :  { %2536 = vmatprep.subr.bf16.mxu0 %v4455_v60  ;;  %2590 = vmatpush1.bf16.msra.mxu1 %v4555_v40  ;;  %6376 = vst [vmem:[#allocation21_spill] sm:$0xff] %v4627_v21  ;;  %v111_v30 = vld [vmem:[%s6189_s2 + $0x2b0] sm:$0xff]  ;;  %v117_v33 = vld [vmem:[%s6189_s2 + $0x2e0] sm:$0xff]  ;;  %v4645_v35 = vpack.c.bf16 %v176_v18, %v170_v17  ;;  %v124_v37 = vld [vmem:[%s6189_s2 + $0x318] sm:$0xff] }
  0x1f   :  { %2592 = vmatprep.subr.bf16.mxu1 %v4564_v47  ;;  %6377 = vst [vmem:[#allocation22_spill] sm:$0xff] %v4630_v22  ;;  %6378 = vst [vmem:[#allocation23_spill] sm:$0xff] %v4636_v28  ;;  %v175_v36 = vld [vmem:[%s6189_s2 + $0x4b0] sm:$0xff]  ;;  %v130_v38 = vld [vmem:[%s6189_s2 + $0x348] sm:$0xff]  ;;  %v4663_v48 = vpack.c.bf16 %v117_v33, %v111_v30 }
  0x20   :  { %6379 = vst [vmem:[#allocation24_spill] sm:$0xff] %v4645_v35  ;;  %v182_v39 = vld [vmem:[%s6189_s2 + $0x4e8] sm:$0xff]  ;;  %v188_v43 = vld [vmem:[%s6189_s2 + $0x518] sm:$0xff]  ;;  %v4666_v49 = vpack.c.bf16 %v175_v36, %v169_v23  ;;  %v181_v52 = vld [vmem:[%s6189_s2 + $0x4e0] sm:$0xff]  ;;  %v4672_v53 = vpack.c.bf16 %v130_v38, %v124_v37 }
  0x21   :  { %2538 = vmatpush1.bf16.msra.mxu0 %v4486_v9  ;;  %6380 = vst [vmem:[#allocation25_spill] sm:$0xff] %v4663_v48  ;;  %v123_v54 = vld [vmem:[%s6189_s2 + $0x310] sm:$0xff]  ;;  %v129_v57 = vld [vmem:[%s6189_s2 + $0x340] sm:$0xff]  ;;  %v4681_v58 = vpack.c.bf16 %v188_v43, %v182_v39  ;;  %v136_v2 = vld [vmem:[%s6189_s2 + $0x378] sm:$0xff] }
  0x22   :  { %2540 = vmatprep.subr.bf16.mxu0 %v4498_v15  ;;  %2594 = vmatpush1.bf16.msra.mxu1 %v4591_v61  ;;  %6381 = vst [vmem:[#allocation26_spill] sm:$0xff] %v4666_v49  ;;  %6382 = vst [vmem:[#allocation27_spill] sm:$0xff] %v4672_v53  ;;  %v187_v0 = vld [vmem:[%s6189_s2 + $0x510] sm:$0xff]  ;;  %v142_v5 = vld [vmem:[%s6189_s2 + $0x3a8] sm:$0xff]  ;;  %v4699_v16 = vpack.c.bf16 %v129_v57, %v123_v54 }
  0x23   :  { %2596 = vmatprep.subr.bf16.mxu1 %v4600_v1  ;;  %6383 = vst [vmem:[#allocation28_spill] sm:$0xff] %v4681_v58  ;;  %v194_v11 = vld [vmem:[%s6189_s2 + $0x548] sm:$0xff]  ;;  %v200_v12 = vld [vmem:[%s6189_s2 + $0x578] sm:$0xff]  ;;  %v4702_v17 = vpack.c.bf16 %v187_v0, %v181_v52  ;;  %v193_v18 = vld [vmem:[%s6189_s2 + $0x540] sm:$0xff]  ;;  %v4708_v23 = vpack.c.bf16 %v142_v5, %v136_v2 }
  0x24   :  { %6384 = vst [vmem:[#allocation29_spill] sm:$0xff] %v4699_v16  ;;  %v135_v30 = vld [vmem:[%s6189_s2 + $0x370] sm:$0xff]  ;;  %v141_v33 = vld [vmem:[%s6189_s2 + $0x3a0] sm:$0xff]  ;;  %v4717_v36 = vpack.c.bf16 %v200_v12, %v194_v11  ;;  %v148_v38 = vld [vmem:[%s6189_s2 + $0x3d8] sm:$0xff] }
  0x25   :  { %2542 = vmatpush1.bf16.msra.mxu0 %v4522_v27  ;;  %6385 = vst [vmem:[#allocation30_spill] sm:$0xff] %v4702_v17  ;;  %6386 = vst [vmem:[#allocation31_spill] sm:$0xff] %v4708_v23  ;;  %v199_v37 = vld [vmem:[%s6189_s2 + $0x570] sm:$0xff]  ;;  %v154_v39 = vld [vmem:[%s6189_s2 + $0x408] sm:$0xff]  ;;  %v4735_v54 = vpack.c.bf16 %v141_v33, %v135_v30 }
  0x26   :  { %2544 = vmatprep.subr.bf16.mxu0 %v4537_v34  ;;  %2598 = vmatpush1.bf16.msra.mxu1 %v4627_v21  ;;  %6387 = vst [vmem:[#allocation32_spill] sm:$0xff] %v4717_v36  ;;  %v206_v43 = vld [vmem:[%s6189_s2 + $0x5a8] sm:$0xff]  ;;  %v212_v52 = vld [vmem:[%s6189_s2 + $0x5d8] sm:$0xff]  ;;  %v4738_v57 = vpack.c.bf16 %v199_v37, %v193_v18  ;;  %v205_v0 = vld [vmem:[%s6189_s2 + $0x5a0] sm:$0xff]  ;;  %v4744_v2 = vpack.c.bf16 %v154_v39, %v148_v38 }
  0x27   :  { %2600 = vmatprep.subr.bf16.mxu1 %v4636_v28  ;;  %6388 = vst [vmem:[#allocation33_spill] sm:$0xff] %v4735_v54  ;;  %v147_v5 = vld [vmem:[%s6189_s2 + $0x3d0] sm:$0xff]  ;;  %v153_v11 = vld [vmem:[%s6189_s2 + $0x400] sm:$0xff]  ;;  %v4753_v12 = vpack.c.bf16 %v212_v52, %v206_v43  ;;  %v160_v30 = vld [vmem:[%s6189_s2 + $0x438] sm:$0xff] }
  0x28   :  { %6389 = vst [vmem:[#allocation34_spill] sm:$0xff] %v4738_v57  ;;  %6390 = vst [vmem:[#allocation35_spill] sm:$0xff] %v4744_v2  ;;  %v211_v18 = vld [vmem:[%s6189_s2 + $0x5d0] sm:$0xff]  ;;  %v166_v33 = vld [vmem:[%s6189_s2 + $0x468] sm:$0xff]  ;;  %v4771_v39 = vpack.c.bf16 %v153_v11, %v147_v5 }
  0x29   :  { %2546 = vmatpush1.bf16.msra.mxu0 %v4558_v42  ;;  %6391 = vst [vmem:[#allocation36_spill] sm:$0xff] %v4753_v12  ;;  %v30_v37 = vld [vmem:[%s6189_s2 + $0x28] sm:$0xff]  ;;  %v36_v38 = vld [vmem:[%s6189_s2 + $0x58] sm:$0xff]  ;;  %v4774_v43 = vpack.c.bf16 %v211_v18, %v205_v0  ;;  %v29_v52 = vld [vmem:[%s6189_s2 + $0x20] sm:$0xff] }
  0x2a   :  { %2548 = vmatprep.subr.bf16.mxu0 %v4573_v50  ;;  %2602 = vmatpush1.bf16.msra.mxu1 %v4663_v48  ;;  %6392 = vst [vmem:[#allocation37_spill] sm:$0xff] %v4771_v39  ;;  %v165_v5 = vld [vmem:[%s6189_s2 + $0x460] sm:$0xff]  ;;  %v4789_v0 = vpack.c.bf16 %v36_v38, %v30_v37  ;;  %v35_v11 = vld [vmem:[%s6189_s2 + $0x50] sm:$0xff]  ;;  %v172_v18 = vld [vmem:[%s6189_s2 + $0x498] sm:$0xff] }
  0x2b   :  { %2604 = vmatprep.subr.bf16.mxu1 %v4672_v53  ;;  %6393 = vst [vmem:[#allocation38_spill] sm:$0xff] %v4774_v43  ;;  %v48_v37 = vld [vmem:[%s6189_s2 + $0xb8] sm:$0xff]  ;;  %v4809_v38 = vld [vmem:[%s6190_s1] sm:$0xff]  ;;  %v171_v28 = vld [vmem:[%s6189_s2 + $0x490] sm:$0xff] }
  0x2c   :  { %6395 = vst [vmem:[#allocation40_spill] sm:$0xff] %v4789_v0  ;;  %v41_v53 = vld [vmem:[%s6189_s2 + $0x80] sm:$0xff]  ;;  %v183_v1 = vld [vmem:[%s6189_s2 + $0x4f0] sm:$0xff] }
  0x2d   :  { %2550 = vmatpush1.bf16.msra.mxu0 %v4594_v63 }
  0x2e   :  { %2552 = vmatprep.subr.bf16.mxu0 %v4609_v6  ;;  %2606 = vmatpush1.bf16.msra.mxu1 %v4699_v16  ;;  %v159_v16 = vld [vmem:[%s6189_s2 + $0x430] sm:$0xff] }
  0x2f   :  { %2608 = vmatprep.subr.bf16.mxu1 %v4708_v23  ;;  %v4780_v23 = vpack.c.bf16 %v166_v33, %v160_v30  ;;  %v178_v30 = vld [vmem:[%s6189_s2 + $0x4c8] sm:$0xff] }
  0x30   :  { %v42_v33 = vld [vmem:[%s6189_s2 + $0x88] sm:$0xff]  ;;  %v4821_v48 = vpack.c.bf16 %v178_v30, %v172_v18 }
  0x31   :  { %2554 = vmatpush1.bf16.msra.mxu0 %v4630_v22  ;;  %6394 = vst [vmem:[#allocation39_spill] sm:$0xff] %v4780_v23  ;;  %v190_v18 = vld [vmem:[%s6189_s2 + $0x528] sm:$0xff] }
  0x32   :  { %2556 = vmatprep.subr.bf16.mxu0 %v4645_v35  ;;  %2610 = vmatpush1.bf16.msra.mxu1 %v4735_v54  ;;  %v4815_v54 = vpack.c.bf16 %v35_v11, %v29_v52  ;;  %6398 = vst [vmem:[#allocation43_spill] sm:$0xff] %v4821_v48  ;;  %v4830_v52 = vpack.c.bf16 %v48_v37, %v42_v33  ;;  %v184_v11 = vld [vmem:[%s6189_s2 + $0x4f8] sm:$0xff]  ;;  %v54_v30 = vld [vmem:[%s6189_s2 + $0xe8] sm:$0xff] }
  0x33   :  { %2612 = vmatprep.subr.bf16.mxu1 %v4744_v2  ;;  %v4812_v2 = vpack.c.bf16 %v165_v5, %v159_v16  ;;  %v177_v16 = vld [vmem:[%s6189_s2 + $0x4c0] sm:$0xff]  ;;  %v47_v5 = vld [vmem:[%s6189_s2 + $0xb0] sm:$0xff]  ;;  %v60_v33 = vld [vmem:[%s6189_s2 + $0x118] sm:$0xff]  ;;  %v4858_v21 = vpack.c.bf16 %v190_v18, %v184_v11 }
  0x34   :  { %6397 = vst [vmem:[#allocation42_spill] sm:$0xff] %v4815_v54  ;;  %6399 = vst [vmem:[#allocation44_spill] sm:$0xff] %v4830_v52  ;;  %v4849_v37 = vpack.c.bf16 %v177_v16, %v171_v28  ;;  %v189_v28 = vld [vmem:[%s6189_s2 + $0x520] sm:$0xff]  ;;  %v59_v16 = vld [vmem:[%s6189_s2 + $0x110] sm:$0xff] }
  0x35   :  { %2558 = vmatpush1.bf16.msra.mxu0 %v4666_v49  ;;  %6396 = vst [vmem:[#allocation41_spill] sm:$0xff] %v4812_v2  ;;  %6402 = vst [vmem:[#allocation47_spill] sm:$0xff] %v4858_v21  ;;  %v202_v11 = vld [vmem:[%s6189_s2 + $0x588] sm:$0xff] }
  0x36   :  { %2560 = vmatprep.subr.bf16.mxu0 %v4681_v58  ;;  %2614 = vmatpush1.bf16.msra.mxu1 %v4771_v39  ;;  %6400 = vst [vmem:[#allocation45_spill] sm:$0xff] %v4849_v37  ;;  %v53_v39 = vld [vmem:[%s6189_s2 + $0xe0] sm:$0xff]  ;;  %v66_v18 = vld [vmem:[%s6189_s2 + $0x148] sm:$0xff] }
  0x37   :  { %2616 = vmatprep.subr.bf16.mxu1 %v4780_v23  ;;  %v4852_v23 = vpack.c.bf16 %v47_v5, %v41_v53  ;;  %v4867_v53 = vpack.c.bf16 %v60_v33, %v54_v30  ;;  %v196_v5 = vld [vmem:[%s6189_s2 + $0x558] sm:$0xff]  ;;  %v4886_v33 = vpack.c.bf16 %v189_v28, %v183_v1  ;;  %v201_v1 = vld [vmem:[%s6189_s2 + $0x580] sm:$0xff]  ;;  %v71_v28 = vld [vmem:[%s6189_s2 + $0x170] sm:$0xff] }
  0x38   :  { %v72_v30 = vld [vmem:[%s6189_s2 + $0x178] sm:$0xff] }
  0x39   :  { %2562 = vmatpush1.bf16.msra.mxu0 %v4702_v17  ;;  %6401 = vst [vmem:[#allocation46_spill] sm:$0xff] %v4852_v23  ;;  %6403 = vst [vmem:[#allocation48_spill] sm:$0xff] %v4867_v53 }
  0x3a   :  { %2564 = vmatprep.subr.bf16.mxu0 %v4717_v36  ;;  %2618 = vmatpush1.bf16.msra.mxu1 %v4812_v2  ;;  %6404 = vst [vmem:[#allocation49_spill] sm:$0xff] %v4886_v33 }
  0x3b   :  { %2620 = vmatprep.subr.bf16.mxu1 %v4821_v48  ;;  %v195_v48 = vld [vmem:[%s6189_s2 + $0x550] sm:$0xff] }
  0x3d   :  { %2566 = vmatpush1.bf16.msra.mxu0 %v4738_v57 }
  0x3e   :  { %2568 = vmatprep.subr.bf16.mxu0 %v4753_v12  ;;  %2622 = vmatpush1.bf16.msra.mxu1 %v4849_v37  ;;  %v213_v37 = vld [vmem:[%s6189_s2 + $0x5e0] sm:$0xff] }
  0x3f   :  { %2624 = vmatprep.subr.bf16.mxu1 %v4858_v21  ;;  %v207_v21 = vld [vmem:[%s6189_s2 + $0x5b0] sm:$0xff] }
  0x41   :  { %2570 = vmatpush1.bf16.msra.mxu0 %v4774_v43 }
  0x42   :  { %2636 = vmatprep.subr.bf16.mxu0 %v4789_v0  ;;  %2626 = vmatpush1.bf16.msra.mxu1 %v4886_v33 }
  0x44   :  { %296 = vmatmul.mubr.f32.vlgmr.msra.gmra.mrb[0].mxu0 %v4809_v38 }
  0x45   :  { %2638 = vmatpush1.bf16.msra.mxu0 %v4815_v54  ;;  %437 = vmatprep.mubr.f32.mxu0 %v4452_v59  ;;  %v65_v54 = vld [vmem:[%s6189_s2 + $0x140] sm:$0xff]  ;;  %v4895_v59 = vpack.c.bf16 %v202_v11, %v196_v5  ;;  %v214_v5 = vld [vmem:[%s6189_s2 + $0x5e8] sm:$0xff] }
  0x46   :  { %2640 = vmatprep.subr.bf16.mxu0 %v4830_v52  ;;  %v4889_v52 = vpack.c.bf16 %v59_v16, %v53_v39  ;;  %v4904_v39 = vpack.c.bf16 %v72_v30, %v66_v18  ;;  %v208_v16 = vld [vmem:[%s6189_s2 + $0x5b8] sm:$0xff]  ;;  %v78_v11 = vld [vmem:[%s6189_s2 + $0x1a8] sm:$0xff]  ;;  %v4922_v30 = vpack.c.bf16 %v201_v1, %v195_v48  ;;  %v83_v1 = vld [vmem:[%s6189_s2 + $0x1d0] sm:$0xff] }
  0x47   :  { %6406 = vst [vmem:[#allocation51_spill] sm:$0xff] %v4895_v59  ;;  %v84_v18 = vld [vmem:[%s6189_s2 + $0x1d8] sm:$0xff]  ;;  %2628 = vmatprep.subr.bf16.mxu1 %v4895_v59 }
  0x48   :  { %6405 = vst [vmem:[#allocation50_spill] sm:$0xff] %v4889_v52  ;;  %6407 = vst [vmem:[#allocation52_spill] sm:$0xff] %v4904_v39  ;;  %v4937_v48 = vpack.c.bf16 %v84_v18, %v78_v11  ;;  %2630 = vmatpush1.bf16.msra.mxu1 %v4922_v30 }
  0x49   :  { %2642 = vmatpush1.bf16.msra.mxu0 %v4852_v23  ;;  %6408 = vst [vmem:[#allocation53_spill] sm:$0xff] %v4922_v30  ;;  %v4928_v23 = vpack.c.bf16 %v214_v5, %v208_v16  ;;  %v96_v16 = vld [vmem:[%s6189_s2 + $0x238] sm:$0xff]  ;;  %v4952_v5 = vpack.c.bf16 %v213_v37, %v207_v21  ;;  %v102_v21 = vld [vmem:[%s6189_s2 + $0x268] sm:$0xff] }
  0x4a   :  { %2644 = vmatprep.subr.bf16.mxu0 %v4867_v53  ;;  %v4925_v53 = vpack.c.bf16 %v71_v28, %v65_v54  ;;  %v77_v54 = vld [vmem:[%s6189_s2 + $0x1a0] sm:$0xff]  ;;  %v90_v28 = vld [vmem:[%s6189_s2 + $0x208] sm:$0xff]  ;;  %v108_v37 = vld [vmem:[%s6189_s2 + $0x298] sm:$0xff] }
  0x4b   :  { %6409 = vst [vmem:[#allocation54_spill] sm:$0xff] %v4928_v23  ;;  %6410 = vst [vmem:[#allocation55_spill] sm:$0xff] %v4952_v5  ;;  %v4955_v11 = vpack.c.bf16 %v83_v1, %v77_v54  ;;  %2632 = vmatprep.subr.bf16.mxu1 %v4928_v23  ;;  %v4959_v18 = vpack.c.bf16 %v96_v16, %v90_v28  ;;  %v4979_v1 = vpack.c.bf16 %v108_v37, %v102_v21  ;;  %v101_v28 = vld [vmem:[%s6189_s2 + $0x260] sm:$0xff]  ;;  %v107_v16 = vld [vmem:[%s6189_s2 + $0x290] sm:$0xff] }
  0x4c   :  { %2634 = vmatpush1.bf16.msra.mxu1 %v4952_v5  ;;  %v113_v37 = vld [vmem:[%s6189_s2 + $0x2c0] sm:$0xff] }
  0x4d   :  { %2646 = vmatpush1.bf16.msra.mxu0 %v4889_v52  ;;  %6411 = vst [vmem:[#allocation56_spill] sm:$0xff] %v4955_v11  ;;  %6412 = vst [vmem:[#allocation57_spill] sm:$0xff] %v4959_v18  ;;  %v95_v52 = vld [vmem:[%s6189_s2 + $0x230] sm:$0xff]  ;;  %2700 = vmatprep.subr.bf16.mxu1 %v4284_v3 }
  0x4e   :  { %2648 = vmatprep.subr.bf16.mxu0 %v4904_v39  ;;  %v89_v39 = vld [vmem:[%s6189_s2 + $0x200] sm:$0xff]  ;;  %6414 = vst [vmem:[#allocation59_spill] sm:$0xff] %v4979_v1 }
  0x4f   :  { %v4975_v54 = vpack.c.bf16 %v95_v52, %v89_v39  ;;  %v120_v52 = vld [vmem:[%s6189_s2 + $0x2f8] sm:$0xff]  ;;  %367 = vmatmul.mubr.f32.vlgmr.msra.gmra.mrb[0].mxu1 %v4809_v38  ;;  %v4996_v39 = vpack.c.bf16 %v107_v16, %v101_v28 }
  0x50   :  { %2702 = vmatpush1.bf16.msra.mxu1 %v4295_v7  ;;  %v132_v28 = vld [vmem:[%s6189_s2 + $0x358] sm:$0xff] }
  0x51   :  { %2650 = vmatpush1.bf16.msra.mxu0 %v4925_v53  ;;  %6413 = vst [vmem:[#allocation58_spill] sm:$0xff] %v4975_v54  ;;  %6415 = vst [vmem:[#allocation60_spill] sm:$0xff] %v4996_v39  ;;  %2704 = vmatprep.subr.bf16.mxu1 %v4297_v8 }
  0x52   :  { %2652 = vmatprep.subr.bf16.mxu0 %v4937_v48 }
  0x54   :  { %2706 = vmatpush1.bf16.msra.mxu1 %v4313_v13 }
  0x55   :  { %2654 = vmatpush1.bf16.msra.mxu0 %v4955_v11  ;;  %v114_v11 = vld [vmem:[%s6189_s2 + $0x2c8] sm:$0xff]  ;;  %2708 = vmatprep.subr.bf16.mxu1 %v4316_v14 }
  0x56   :  { %2656 = vmatprep.subr.bf16.mxu0 %v4959_v18  ;;  %v5000_v21 = vpack.c.bf16 %v120_v52, %v114_v11  ;;  %v119_v18 = vld [vmem:[%s6189_s2 + $0x2f0] sm:$0xff]  ;;  %v125_v52 = vld [vmem:[%s6189_s2 + $0x320] sm:$0xff] }
  0x57   :  { %v5016_v11 = vpack.c.bf16 %v119_v18, %v113_v37  ;;  %v144_v18 = vld [vmem:[%s6189_s2 + $0x3b8] sm:$0xff] }
  0x58   :  { %6416 = vst [vmem:[#allocation61_spill] sm:$0xff] %v5000_v21  ;;  %2710 = vmatpush1.bf16.msra.mxu1 %v4331_v19 }
  0x59   :  { %2658 = vmatpush1.bf16.msra.mxu0 %v4975_v54  ;;  %v126_v54 = vld [vmem:[%s6189_s2 + $0x328] sm:$0xff]  ;;  %6417 = vst [vmem:[#allocation62_spill] sm:$0xff] %v5016_v11  ;;  %2712 = vmatprep.subr.bf16.mxu1 %v4334_v20 }
  0x5a   :  { %2660 = vmatprep.subr.bf16.mxu0 %v4979_v1  ;;  %v5020_v16 = vpack.c.bf16 %v132_v28, %v126_v54  ;;  %v131_v1 = vld [vmem:[%s6189_s2 + $0x350] sm:$0xff]  ;;  %v137_v28 = vld [vmem:[%s6189_s2 + $0x380] sm:$0xff] }
  0x5b   :  { %v5036_v54 = vpack.c.bf16 %v131_v1, %v125_v52  ;;  %v156_v1 = vld [vmem:[%s6189_s2 + $0x418] sm:$0xff] }
  0x5c   :  { %6418 = vst [vmem:[#allocation63_spill] sm:$0xff] %v5020_v16  ;;  %2714 = vmatpush1.bf16.msra.mxu1 %v4349_v25 }
  0x5d   :  { %2662 = vmatpush1.bf16.msra.mxu0 %v4996_v39  ;;  %v138_v39 = vld [vmem:[%s6189_s2 + $0x388] sm:$0xff]  ;;  %6419 = vst [vmem:[#allocation64_spill] sm:$0xff] %v5036_v54  ;;  %2716 = vmatprep.subr.bf16.mxu1 %v4352_v26 }
  0x5e   :  { %2664 = vmatprep.subr.bf16.mxu0 %v5000_v21  ;;  %v5040_v37 = vpack.c.bf16 %v144_v18, %v138_v39  ;;  %v143_v21 = vld [vmem:[%s6189_s2 + $0x3b0] sm:$0xff]  ;;  %v149_v18 = vld [vmem:[%s6189_s2 + $0x3e0] sm:$0xff] }
  0x5f   :  { %v5056_v39 = vpack.c.bf16 %v143_v21, %v137_v28  ;;  %v168_v21 = vld [vmem:[%s6189_s2 + $0x478] sm:$0xff] }
  0x60   :  { %6420 = vst [vmem:[#allocation65_spill] sm:$0xff] %v5040_v37  ;;  %2718 = vmatpush1.bf16.msra.mxu1 %v4367_v31 }
  0x61   :  { %2666 = vmatpush1.bf16.msra.mxu0 %v5016_v11  ;;  %v150_v11 = vld [vmem:[%s6189_s2 + $0x3e8] sm:$0xff]  ;;  %6421 = vst [vmem:[#allocation66_spill] sm:$0xff] %v5056_v39  ;;  %2720 = vmatprep.subr.bf16.mxu1 %v4370_v32 }
  0x62   :  { %2668 = vmatprep.subr.bf16.mxu0 %v5020_v16  ;;  %v5060_v52 = vpack.c.bf16 %v156_v1, %v150_v11  ;;  %v155_v16 = vld [vmem:[%s6189_s2 + $0x410] sm:$0xff]  ;;  %v161_v1 = vld [vmem:[%s6189_s2 + $0x440] sm:$0xff] }
  0x63   :  { %v5076_v11 = vpack.c.bf16 %v155_v16, %v149_v18  ;;  %v180_v16 = vld [vmem:[%s6189_s2 + $0x4d8] sm:$0xff] }
  0x64   :  { %6422 = vst [vmem:[#allocation67_spill] sm:$0xff] %v5060_v52  ;;  %2722 = vmatpush1.bf16.msra.mxu1 %v4397_v41 }
  0x65   :  { %2670 = vmatpush1.bf16.msra.mxu0 %v5036_v54  ;;  %v162_v54 = vld [vmem:[%s6189_s2 + $0x448] sm:$0xff]  ;;  %6423 = vst [vmem:[#allocation68_spill] sm:$0xff] %v5076_v11  ;;  %2724 = vmatprep.subr.bf16.mxu1 %v4410_v46 }
  0x66   :  { %2672 = vmatprep.subr.bf16.mxu0 %v5040_v37  ;;  %v5080_v28 = vpack.c.bf16 %v168_v21, %v162_v54  ;;  %v167_v37 = vld [vmem:[%s6189_s2 + $0x470] sm:$0xff]  ;;  %v173_v21 = vld [vmem:[%s6189_s2 + $0x4a0] sm:$0xff] }
  0x67   :  { %v5096_v54 = vpack.c.bf16 %v167_v37, %v161_v1  ;;  %v192_v37 = vld [vmem:[%s6189_s2 + $0x538] sm:$0xff] }
  0x68   :  { %6424 = vst [vmem:[#allocation69_spill] sm:$0xff] %v5080_v28  ;;  %2726 = vmatpush1.bf16.msra.mxu1 %v4440_v56 }
  0x69   :  { %2674 = vmatpush1.bf16.msra.mxu0 %v5056_v39  ;;  %v174_v39 = vld [vmem:[%s6189_s2 + $0x4a8] sm:$0xff]  ;;  %6425 = vst [vmem:[#allocation70_spill] sm:$0xff] %v5096_v54  ;;  %2728 = vmatprep.subr.bf16.mxu1 %v4455_v60 }
  0x6a   :  { %2676 = vmatprep.subr.bf16.mxu0 %v5060_v52  ;;  %v5100_v18 = vpack.c.bf16 %v180_v16, %v174_v39  ;;  %v179_v52 = vld [vmem:[%s6189_s2 + $0x4d0] sm:$0xff]  ;;  %v185_v16 = vld [vmem:[%s6189_s2 + $0x500] sm:$0xff] }
  0x6b   :  { %v5116_v39 = vpack.c.bf16 %v179_v52, %v173_v21  ;;  %v204_v52 = vld [vmem:[%s6189_s2 + $0x598] sm:$0xff] }
  0x6c   :  { %6426 = vst [vmem:[#allocation71_spill] sm:$0xff] %v5100_v18  ;;  %2730 = vmatpush1.bf16.msra.mxu1 %v4486_v9 }
  0x6d   :  { %2678 = vmatpush1.bf16.msra.mxu0 %v5076_v11  ;;  %v186_v11 = vld [vmem:[%s6189_s2 + $0x508] sm:$0xff]  ;;  %6427 = vst [vmem:[#allocation72_spill] sm:$0xff] %v5116_v39  ;;  %2732 = vmatprep.subr.bf16.mxu1 %v4498_v15 }
  0x6e   :  { %2680 = vmatprep.subr.bf16.mxu0 %v5080_v28  ;;  %v5120_v1 = vpack.c.bf16 %v192_v37, %v186_v11  ;;  %v191_v28 = vld [vmem:[%s6189_s2 + $0x530] sm:$0xff]  ;;  %v197_v37 = vld [vmem:[%s6189_s2 + $0x560] sm:$0xff] }
  0x6f   :  { %v5136_v11 = vpack.c.bf16 %v191_v28, %v185_v16  ;;  %v216_v28 = vld [vmem:[%s6189_s2 + $0x5f8] sm:$0xff] }
  0x70   :  { %6428 = vst [vmem:[#allocation73_spill] sm:$0xff] %v5120_v1  ;;  %2734 = vmatpush1.bf16.msra.mxu1 %v4522_v27 }
  0x71   :  { %2682 = vmatpush1.bf16.msra.mxu0 %v5096_v54  ;;  %v198_v54 = vld [vmem:[%s6189_s2 + $0x568] sm:$0xff]  ;;  %6429 = vst [vmem:[#allocation74_spill] sm:$0xff] %v5136_v11  ;;  %2736 = vmatprep.subr.bf16.mxu1 %v4537_v34 }
  0x72   :  { %2684 = vmatprep.subr.bf16.mxu0 %v5100_v18  ;;  %v5140_v21 = vpack.c.bf16 %v204_v52, %v198_v54  ;;  %v203_v18 = vld [vmem:[%s6189_s2 + $0x590] sm:$0xff]  ;;  %v209_v52 = vld [vmem:[%s6189_s2 + $0x5c0] sm:$0xff] }
  0x73   :  { %v5156_v54 = vpack.c.bf16 %v203_v18, %v197_v37  ;;  %v6436_v37 = vld [vmem:[#allocation23_spill] sm:$0xff] }
  0x74   :  { %6430 = vst [vmem:[#allocation75_spill] sm:$0xff] %v5140_v21  ;;  %2738 = vmatpush1.bf16.msra.mxu1 %v4558_v42 }
  0x75   :  { %2686 = vmatpush1.bf16.msra.mxu0 %v5116_v39  ;;  %v210_v39 = vld [vmem:[%s6189_s2 + $0x5c8] sm:$0xff]  ;;  %6431 = vst [vmem:[#allocation76_spill] sm:$0xff] %v5156_v54  ;;  %2740 = vmatprep.subr.bf16.mxu1 %v4573_v50 }
  0x76   :  { %2688 = vmatprep.subr.bf16.mxu0 %v5120_v1  ;;  %v5160_v16 = vpack.c.bf16 %v216_v28, %v210_v39  ;;  %v215_v1 = vld [vmem:[%s6189_s2 + $0x5f0] sm:$0xff]  ;;  %v6434_v39 = vld [vmem:[#allocation19_spill] sm:$0xff]  ;;  %v6437_v28 = vld [vmem:[#allocation25_spill] sm:$0xff] }
  0x77   :  { %v5170_v18 = vpack.c.bf16 %v215_v1, %v209_v52  ;;  %v6435_v1 = vld [vmem:[#allocation21_spill] sm:$0xff]  ;;  %v6438_v52 = vld [vmem:[#allocation27_spill] sm:$0xff] }
  0x78   :  { %6432 = vst [vmem:[#allocation77_spill] sm:$0xff] %v5160_v16  ;;  %2742 = vmatpush1.bf16.msra.mxu1 %v4594_v63 }
  0x79   :  { %2690 = vmatpush1.bf16.msra.mxu0 %v5136_v11  ;;  %6433 = vst [vmem:[#allocation78_spill] sm:$0xff] %v5170_v18  ;;  %2744 = vmatprep.subr.bf16.mxu1 %v4609_v6 }
  0x7a   :  { %2692 = vmatprep.subr.bf16.mxu0 %v5140_v21 }
  0x7c   :  { %2746 = vmatpush1.bf16.msra.mxu1 %v4630_v22 }
  0x7d   :  { %2694 = vmatpush1.bf16.msra.mxu0 %v5156_v54  ;;  %2748 = vmatprep.subr.bf16.mxu1 %v4645_v35 }
  0x7e   :  { %2696 = vmatprep.subr.bf16.mxu0 %v5160_v16 }
  0x80   :  { %2750 = vmatpush1.bf16.msra.mxu1 %v4666_v49 }
  0x81   :  { %2698 = vmatpush1.bf16.msra.mxu0 %v5170_v18  ;;  %2752 = vmatprep.subr.bf16.mxu1 %v4681_v58 }
  0x82   :  { %2764 = vmatprep.subr.bf16.mxu0 %v4405_v44 }
  0x84   :  { %438 = vmatmul.mubr.f32.vlgmr.msra.gmra.mrb[2].mxu0 %v4809_v38  ;;  %2754 = vmatpush1.bf16.msra.mxu1 %v4702_v17 }
  0x85   :  { %2766 = vmatpush1.bf16.msra.mxu0 %v4407_v45  ;;  %2756 = vmatprep.subr.bf16.mxu1 %v4717_v36 }
  0x86   :  { %2768 = vmatprep.subr.bf16.mxu0 %v4425_v51 }
  0x88   :  { %2758 = vmatpush1.bf16.msra.mxu1 %v4738_v57 }
  0x89   :  { %2770 = vmatpush1.bf16.msra.mxu0 %v4437_v55  ;;  %2760 = vmatprep.subr.bf16.mxu1 %v4753_v12 }
  0x8a   :  { %2772 = vmatprep.subr.bf16.mxu0 %v4460_v62 }
  0x8c   :  { %2762 = vmatpush1.bf16.msra.mxu1 %v4774_v43 }
  0x8d   :  { %2774 = vmatpush1.bf16.msra.mxu0 %v4477_v4  ;;  %2828 = vmatprep.subr.bf16.mxu1 %v4789_v0 }
  0x8e   :  { %2776 = vmatprep.subr.bf16.mxu0 %v4489_v10  ;;  %v6442_v10 = vld [vmem:[#allocation35_spill] sm:$0xff] }
  0x91   :  { %2778 = vmatpush1.bf16.msra.mxu0 %v4519_v24  ;;  %v6440_v24 = vld [vmem:[#allocation31_spill] sm:$0xff] }
  0x92   :  { %2780 = vmatprep.subr.bf16.mxu0 %v4528_v29  ;;  %v6439_v29 = vld [vmem:[#allocation29_spill] sm:$0xff] }
  0x95   :  { %2782 = vmatpush1.bf16.msra.mxu0 %v4555_v40  ;;  %v6441_v40 = vld [vmem:[#allocation33_spill] sm:$0xff] }
  0x96   :  { %2784 = vmatprep.subr.bf16.mxu0 %v4564_v47  ;;  %v6443_v47 = vld [vmem:[#allocation37_spill] sm:$0xff] }
  0x99   :  { %2786 = vmatpush1.bf16.msra.mxu0 %v4591_v61  ;;  %v6444_v61 = vld [vmem:[#allocation39_spill] sm:$0xff] }
  0x9a   :  { %2788 = vmatprep.subr.bf16.mxu0 %v6434_v39  ;;  %v219_v39 = vlaneseq }
  0x9d   :  { %2790 = vmatpush1.bf16.msra.mxu0 %v6435_v1  ;;  %v6445_v1 = vld [vmem:[#allocation43_spill] sm:$0xff] }
  0x9e   :  { %2792 = vmatprep.subr.bf16.mxu0 %v6436_v37  ;;  %v6446_v37 = vld [vmem:[#allocation45_spill] sm:$0xff] }
  0xa1   :  { %2794 = vmatpush1.bf16.msra.mxu0 %v6437_v28  ;;  %v6447_v28 = vld [vmem:[#allocation47_spill] sm:$0xff] }
  0xa2   :  { %2796 = vmatprep.subr.bf16.mxu0 %v6438_v52 }
  0xa5   :  { %2798 = vmatpush1.bf16.msra.mxu0 %v6439_v29 }
  0xa6   :  { %2800 = vmatprep.subr.bf16.mxu0 %v6440_v24 }
  0xa9   :  { %2802 = vmatpush1.bf16.msra.mxu0 %v6441_v40 }
  0xaa   :  { %2804 = vmatprep.subr.bf16.mxu0 %v6442_v10 }
  0xad   :  { %2806 = vmatpush1.bf16.msra.mxu0 %v6443_v47 }
  0xae   :  { %2808 = vmatprep.subr.bf16.mxu0 %v6444_v61 }
  0xb1   :  { %2810 = vmatpush1.bf16.msra.mxu0 %v4812_v2 }
  0xb2   :  { %2812 = vmatprep.subr.bf16.mxu0 %v6445_v1 }
  0xb5   :  { %2814 = vmatpush1.bf16.msra.mxu0 %v6446_v37 }
  0xb6   :  { %2816 = vmatprep.subr.bf16.mxu0 %v6447_v28  ;;  %v444_v28 = vld [vmem:[%s6191_s0] sm:$0xff] }
  0xb9   :  { %2818 = vmatpush1.bf16.msra.mxu0 %v4886_v33 }
  0xba   :  { %2820 = vmatprep.subr.bf16.mxu0 %v4895_v59  ;;  %v445_v59 = vld [vmem:[%s6191_s0 + $0x8] sm:$0xff] }
  0xbd   :  { %2822 = vmatpush1.bf16.msra.mxu0 %v4922_v30 }
  0xbe   :  { %2824 = vmatprep.subr.bf16.mxu0 %v4928_v23 }
  0xc1   :  { %2826 = vmatpush1.bf16.msra.mxu0 %v4952_v5  ;;  %v447_v5 = vld [vmem:[%s6191_s0 + $0x18] sm:$0xff] }
  0xc2   :  { %2892 = vmatprep.subr.bf16.mxu0 %v4284_v3  ;;  %v446_v3 = vld [vmem:[%s6191_s0 + $0x10] sm:$0xff] }
 0x117   :  { %v297_v61 = vpop.f32.mrb[0].mxu0 }
 0x118   :  { %v299_v2 = vpop.f32.mrb[1].mxu0  ;;  %v450_v33 = vadd.f32 %v444_v28, %v297_v61 }
 0x119   :  { %v451_v30 = vadd.f32 %v445_v59, %v299_v2 }
 0x11a   :  { %v2439_v37 = vmul.f32 -1.442695, %v450_v33 }
 0x11b   :  { %v2440_v23 = vmul.f32 -1.442695, %v451_v30  ;;  %v217_v30 = vld [vmem:[%s6192_s3] sm:$0x3] }
 0x11c   :  { %4075 = vpow2.f32 %v2439_v37 }
 0x11d   :  { %4077 = vpow2.f32 %v2440_v23  ;;  %v220_v23 = vshrl.u32 %v219_v39, 7 }
 0x11f   :  { %v221_v33 = vsub.s32 0, %v220_v23  ;;  %v225_v37 = vsub.s32 1, %v220_v23  ;;  %v449_v23 = vld [vmem:[%s6191_s0 + $0x28] sm:$0xff] }
 0x122   :  { %v368_v47 = vpop.f32.mrb[0].mxu1 }
 0x123   :  { %v370_v1 = vpop.f32.mrb[1].mxu1  ;;  %v464_v10 = vadd.f32 %v446_v3, %v368_v47  ;;  %v5236_v3 = vrot.slane %v217_v30, %v221_v33  ;;  %v5238_v47 = vrot.slane %v217_v30, %v225_v37 }
 0x124   :  { %v465_v40 = vadd.f32 %v447_v5, %v370_v1 }
 0x125   :  { %v2441_v24 = vmul.f32 -1.442695, %v464_v10  ;;  %6448 = vst [vmem:[#allocation79_spill] sm:$0xff] %v5236_v3  ;;  %6449 = vst [vmem:[#allocation80_spill] sm:$0xff] %v5238_v47 }
 0x126   :  { %v4076_v29 = vpop.eup %4075  ;;  %v2442_v52 = vmul.f32 -1.442695, %v465_v40 }
 0x127   :  { %v4078_v61 = vpop.eup %4077  ;;  %v458_v59 = vadd.f32 1.0, %v4076_v29  ;;  %4079 = vpow2.f32 %v2441_v24 }
 0x128   :  { %v459_v2 = vadd.f32 1.0, %v4078_v61  ;;  %4081 = vpow2.f32 %v2442_v52  ;;  %v448_v52 = vld [vmem:[%s6191_s0 + $0x20] sm:$0xff] }
 0x129   :  { %4083 = vrcp.f32 %v458_v59 }
 0x12a   :  { %4085 = vrcp.f32 %v459_v2 }
 0x131   :  { %v4080_v10 = vpop.eup %4079 }
 0x132   :  { %v4082_v40 = vpop.eup %4081  ;;  %v472_v29 = vadd.f32 1.0, %v4080_v10 }
 0x133   :  { %v4084_v39 = vpop.eup %4083  ;;  %v473_v28 = vadd.f32 1.0, %v4082_v40 }
 0x134   :  { %v4086_v59 = vpop.eup %4085  ;;  %4087 = vrcp.f32 %v472_v29  ;;  %v6452_v29 = vld [vmem:[#allocation42_spill] sm:$0xff] }
 0x135   :  { %4089 = vrcp.f32 %v473_v28  ;;  %v6457_v28 = vld [vmem:[#allocation52_spill] sm:$0xff] }
 0x13e   :  { %v4088_v10 = vpop.eup %4087 }
 0x13f   :  { %v4090_v40 = vpop.eup %4089 }
 0x157   :  { %v439_v5 = vpop.f32.mrb[2].mxu0 }
 0x158   :  { %v478_v24 = vadd.f32 %v439_v5, %v5236_v3  ;;  %v441_v1 = vpop.f32.mrb[3].mxu0 }
 0x159   :  { %v479_v61 = vadd.f32 %v441_v1, %v5238_v47  ;;  %v6450_v1 = vld [vmem:[#allocation7_spill] sm:$0xff] }
 0x15a   :  { %v480_v2 = vmul.f32 %v4084_v39, %v478_v24 }
 0x15b   :  { %v481_v33 = vmul.f32 %v4086_v59, %v479_v61  ;;  %v6459_v61 = vld [vmem:[#allocation57_spill] sm:$0xff]  ;;  %v6460_v59 = vld [vmem:[#allocation58_spill] sm:$0xff] }
 0x15c   :  { %v482_v30 = vadd.f32 %v480_v2, %v448_v52  ;;  %v6458_v52 = vld [vmem:[#allocation56_spill] sm:$0xff]  ;;  %v6461_v2 = vld [vmem:[#allocation59_spill] sm:$0xff] }
 0x15d   :  { %v483_v37 = vadd.f32 %v481_v33, %v449_v23  ;;  %v6462_v23 = vld [vmem:[#allocation60_spill] sm:$0xff]  ;;  %v6463_v33 = vld [vmem:[#allocation61_spill] sm:$0xff] }
 0x15e   :  { %4091 = vtanh.f32 %v482_v30  ;;  %v6464_v30 = vld [vmem:[#allocation62_spill] sm:$0xff] }
 0x15f   :  { %4093 = vtanh.f32 %v483_v37  ;;  %v6465_v37 = vld [vmem:[#allocation63_spill] sm:$0xff] }
 0x168   :  { %v4092_v5 = vpop.eup %4091 }
 0x169   :  { %v4094_v3 = vpop.eup %4093  ;;  %v486_v4 = vsub.f32 %v4809_v38, %v4092_v5  ;;  %v6453_v38 = vld [vmem:[#allocation44_spill] sm:$0xff] }
 0x16a   :  { %v487_v47 = vsub.f32 %v6450_v1, %v4094_v3  ;;  %v6469_v1 = vld [vmem:[#allocation67_spill] sm:$0xff] }
 0x16b   :  { %v488_v24 = vmul.f32 %v4088_v10, %v486_v4  ;;  %v6454_v4 = vld [vmem:[#allocation46_spill] sm:$0xff]  ;;  %v6466_v10 = vld [vmem:[#allocation64_spill] sm:$0xff] }
 0x16c   :  { %v489_v39 = vmul.f32 %v4090_v40, %v487_v47  ;;  %v6456_v47 = vld [vmem:[#allocation50_spill] sm:$0xff]  ;;  %v6467_v40 = vld [vmem:[#allocation65_spill] sm:$0xff] }
 0x16d   :  { %v5250_v62 = vadd.f32 %v4092_v5, %v488_v24  ;;  %v6468_v5 = vld [vmem:[#allocation66_spill] sm:$0xff]  ;;  %v6470_v24 = vld [vmem:[#allocation68_spill] sm:$0xff] }
 0x16e   :  { %v5252_v55 = vadd.f32 %v4094_v3, %v489_v39  ;;  %v6455_v3 = vld [vmem:[#allocation48_spill] sm:$0xff]  ;;  %v6471_v39 = vld [vmem:[#allocation69_spill] sm:$0xff] }
 0x170   :  { %6451 = vst [vmem:[#allocation7_spill] sm:$0xff] %v5252_v55  ;;  %556 = vmatprep.mubr.f32.mxu1 %v5252_v55  ;;  %627 = vmatprep.mubr.f32.mxu0 %v5252_v55 }
 0x171   :  { %557 = vmatmul.mubr.f32.vlgmr.msra.gmra.mrb[2].mxu1 %v5250_v62  ;;  %628 = vmatmul.mubr.f32.vlgmr.msra.gmra.mrb[4].mxu0 %v5250_v62 }
 0x172   :  { %2830 = vmatpush1.bf16.msra.mxu1 %v6452_v29  ;;  %698 = vmatprep.mubr.f32.mxu1 %v5252_v55 }
 0x173   :  { %2832 = vmatprep.subr.bf16.mxu1 %v6453_v38  ;;  %2894 = vmatpush1.bf16.msra.mxu0 %v4295_v7 }
 0x174   :  { %2896 = vmatprep.subr.bf16.mxu0 %v4297_v8 }
 0x176   :  { %2834 = vmatpush1.bf16.msra.mxu1 %v6454_v4 }
 0x177   :  { %2836 = vmatprep.subr.bf16.mxu1 %v6455_v3  ;;  %2898 = vmatpush1.bf16.msra.mxu0 %v4313_v13 }
 0x178   :  { %2900 = vmatprep.subr.bf16.mxu0 %v4316_v14 }
 0x17a   :  { %2838 = vmatpush1.bf16.msra.mxu1 %v6456_v47 }
 0x17b   :  { %2840 = vmatprep.subr.bf16.mxu1 %v6457_v28  ;;  %2902 = vmatpush1.bf16.msra.mxu0 %v4331_v19 }
 0x17c   :  { %2904 = vmatprep.subr.bf16.mxu0 %v4334_v20 }
 0x17e   :  { %2842 = vmatpush1.bf16.msra.mxu1 %v4925_v53 }
 0x17f   :  { %2844 = vmatprep.subr.bf16.mxu1 %v4937_v48  ;;  %2906 = vmatpush1.bf16.msra.mxu0 %v4349_v25 }
 0x180   :  { %2908 = vmatprep.subr.bf16.mxu0 %v4352_v26 }
 0x182   :  { %2846 = vmatpush1.bf16.msra.mxu1 %v6458_v52 }
 0x183   :  { %2848 = vmatprep.subr.bf16.mxu1 %v6459_v61  ;;  %2910 = vmatpush1.bf16.msra.mxu0 %v4367_v31 }
 0x184   :  { %2912 = vmatprep.subr.bf16.mxu0 %v4370_v32 }
 0x186   :  { %2850 = vmatpush1.bf16.msra.mxu1 %v6460_v59 }
 0x187   :  { %2852 = vmatprep.subr.bf16.mxu1 %v6461_v2  ;;  %2914 = vmatpush1.bf16.msra.mxu0 %v4397_v41 }
 0x188   :  { %2916 = vmatprep.subr.bf16.mxu0 %v4410_v46 }
 0x18a   :  { %2854 = vmatpush1.bf16.msra.mxu1 %v6462_v23 }
 0x18b   :  { %2856 = vmatprep.subr.bf16.mxu1 %v6463_v33  ;;  %2918 = vmatpush1.bf16.msra.mxu0 %v4440_v56 }
 0x18c   :  { %2920 = vmatprep.subr.bf16.mxu0 %v4455_v60 }
 0x18e   :  { %2858 = vmatpush1.bf16.msra.mxu1 %v6464_v30 }
 0x18f   :  { %2860 = vmatprep.subr.bf16.mxu1 %v6465_v37  ;;  %2922 = vmatpush1.bf16.msra.mxu0 %v4486_v9 }
 0x190   :  { %2924 = vmatprep.subr.bf16.mxu0 %v4498_v15 }
 0x192   :  { %2862 = vmatpush1.bf16.msra.mxu1 %v6466_v10 }
 0x193   :  { %2864 = vmatprep.subr.bf16.mxu1 %v6467_v40  ;;  %2926 = vmatpush1.bf16.msra.mxu0 %v4522_v27  ;;  %v6472_v40 = vld [vmem:[#allocation70_spill] sm:$0xff]  ;;  %v6473_v27 = vld [vmem:[#allocation71_spill] sm:$0xff] }
 0x194   :  { %2928 = vmatprep.subr.bf16.mxu0 %v4537_v34 }
 0x196   :  { %2866 = vmatpush1.bf16.msra.mxu1 %v6468_v5 }
 0x197   :  { %2868 = vmatprep.subr.bf16.mxu1 %v6469_v1  ;;  %2930 = vmatpush1.bf16.msra.mxu0 %v4558_v42  ;;  %v6474_v1 = vld [vmem:[#allocation72_spill] sm:$0xff]  ;;  %v6475_v42 = vld [vmem:[#allocation73_spill] sm:$0xff] }
 0x198   :  { %2932 = vmatprep.subr.bf16.mxu0 %v4573_v50 }
 0x19a   :  { %2870 = vmatpush1.bf16.msra.mxu1 %v6470_v24 }
 0x19b   :  { %2872 = vmatprep.subr.bf16.mxu1 %v6471_v39  ;;  %2934 = vmatpush1.bf16.msra.mxu0 %v4594_v63 }
 0x19c   :  { %2936 = vmatprep.subr.bf16.mxu0 %v4609_v6 }
 0x19e   :  { %2874 = vmatpush1.bf16.msra.mxu1 %v6472_v40 }
 0x19f   :  { %2876 = vmatprep.subr.bf16.mxu1 %v6473_v27  ;;  %2938 = vmatpush1.bf16.msra.mxu0 %v4630_v22 }
 0x1a0   :  { %2940 = vmatprep.subr.bf16.mxu0 %v4645_v35 }
 0x1a2   :  { %2878 = vmatpush1.bf16.msra.mxu1 %v6474_v1 }
 0x1a3   :  { %2880 = vmatprep.subr.bf16.mxu1 %v6475_v42  ;;  %2942 = vmatpush1.bf16.msra.mxu0 %v4666_v49 }
 0x1a4   :  { %2944 = vmatprep.subr.bf16.mxu0 %v4681_v58 }
 0x1a6   :  { %2882 = vmatpush1.bf16.msra.mxu1 %v5136_v11 }
 0x1a7   :  { %2884 = vmatprep.subr.bf16.mxu1 %v5140_v21  ;;  %2946 = vmatpush1.bf16.msra.mxu0 %v4702_v17 }
 0x1a8   :  { %2948 = vmatprep.subr.bf16.mxu0 %v4717_v36  ;;  %v6484_v36 = vld [vmem:[#allocation17_spill] sm:$0xff] }
 0x1aa   :  { %2886 = vmatpush1.bf16.msra.mxu1 %v5156_v54  ;;  %v6476_v54 = vld [vmem:[#allocation6_spill] sm:$0xff] }
 0x1ab   :  { %2888 = vmatprep.subr.bf16.mxu1 %v5160_v16  ;;  %2950 = vmatpush1.bf16.msra.mxu0 %v4738_v57  ;;  %v6477_v16 = vld [vmem:[#allocation8_spill] sm:$0xff]  ;;  %v6478_v57 = vld [vmem:[#allocation9_spill] sm:$0xff] }
 0x1ac   :  { %2952 = vmatprep.subr.bf16.mxu0 %v4753_v12  ;;  %v6479_v12 = vld [vmem:[#allocation10_spill] sm:$0xff] }
 0x1ae   :  { %2890 = vmatpush1.bf16.msra.mxu1 %v5170_v18  ;;  %v6480_v18 = vld [vmem:[#allocation11_spill] sm:$0xff] }
 0x1af   :  { %2956 = vmatprep.subr.bf16.mxu1 %v4405_v44  ;;  %2954 = vmatpush1.bf16.msra.mxu0 %v4774_v43  ;;  %v6481_v44 = vld [vmem:[#allocation13_spill] sm:$0xff]  ;;  %v6482_v43 = vld [vmem:[#allocation14_spill] sm:$0xff] }
 0x1b0   :  { %3020 = vmatprep.subr.bf16.mxu0 %v4789_v0  ;;  %v6483_v0 = vld [vmem:[#allocation16_spill] sm:$0xff] }
 0x1b1   :  { %699 = vmatmul.mubr.f32.vlgmr.msra.gmra.mrb[4].mxu1 %v5250_v62 }
 0x1b2   :  { %2958 = vmatpush1.bf16.msra.mxu1 %v4407_v45  ;;  %v6485_v45 = vld [vmem:[#allocation19_spill] sm:$0xff] }
 0x1b3   :  { %2960 = vmatprep.subr.bf16.mxu1 %v4425_v51  ;;  %v6486_v51 = vld [vmem:[#allocation21_spill] sm:$0xff] }
 0x1b6   :  { %2962 = vmatpush1.bf16.msra.mxu1 %v6476_v54  ;;  %v6487_v54 = vld [vmem:[#allocation23_spill] sm:$0xff] }
 0x1b7   :  { %2964 = vmatprep.subr.bf16.mxu1 %v6477_v16  ;;  %v6488_v16 = vld [vmem:[#allocation25_spill] sm:$0xff] }
 0x1ba   :  { %2966 = vmatpush1.bf16.msra.mxu1 %v6478_v57  ;;  %v6489_v57 = vld [vmem:[#allocation27_spill] sm:$0xff] }
 0x1bb   :  { %2968 = vmatprep.subr.bf16.mxu1 %v6479_v12  ;;  %v6490_v12 = vld [vmem:[#allocation29_spill] sm:$0xff] }
 0x1be   :  { %2970 = vmatpush1.bf16.msra.mxu1 %v6480_v18  ;;  %v6491_v18 = vld [vmem:[#allocation31_spill] sm:$0xff] }
 0x1bf   :  { %2972 = vmatprep.subr.bf16.mxu1 %v6481_v44  ;;  %v6492_v44 = vld [vmem:[#allocation33_spill] sm:$0xff] }
 0x1c2   :  { %2974 = vmatpush1.bf16.msra.mxu1 %v6482_v43  ;;  %v6493_v43 = vld [vmem:[#allocation35_spill] sm:$0xff] }
 0x1c3   :  { %2976 = vmatprep.subr.bf16.mxu1 %v6483_v0  ;;  %v6494_v0 = vld [vmem:[#allocation37_spill] sm:$0xff] }
 0x1c6   :  { %2978 = vmatpush1.bf16.msra.mxu1 %v6484_v36  ;;  %v6495_v36 = vld [vmem:[#allocation39_spill] sm:$0xff] }
 0x1c7   :  { %2980 = vmatprep.subr.bf16.mxu1 %v6485_v45  ;;  %v6496_v45 = vld [vmem:[#allocation41_spill] sm:$0xff] }
 0x1ca   :  { %2982 = vmatpush1.bf16.msra.mxu1 %v6486_v51  ;;  %v6497_v51 = vld [vmem:[#allocation43_spill] sm:$0xff] }
 0x1cb   :  { %2984 = vmatprep.subr.bf16.mxu1 %v6487_v54  ;;  %v6498_v54 = vld [vmem:[#allocation45_spill] sm:$0xff] }
 0x1ce   :  { %2986 = vmatpush1.bf16.msra.mxu1 %v6488_v16  ;;  %v6499_v16 = vld [vmem:[#allocation47_spill] sm:$0xff] }
 0x1cf   :  { %2988 = vmatprep.subr.bf16.mxu1 %v6489_v57  ;;  %v6500_v57 = vld [vmem:[#allocation49_spill] sm:$0xff] }
 0x1d2   :  { %2990 = vmatpush1.bf16.msra.mxu1 %v6490_v12  ;;  %v6501_v12 = vld [vmem:[#allocation51_spill] sm:$0xff] }
 0x1d3   :  { %2992 = vmatprep.subr.bf16.mxu1 %v6491_v18  ;;  %v6502_v18 = vld [vmem:[#allocation53_spill] sm:$0xff] }
 0x1d6   :  { %2994 = vmatpush1.bf16.msra.mxu1 %v6492_v44  ;;  %v6503_v44 = vld [vmem:[#allocation54_spill] sm:$0xff] }
 0x1d7   :  { %2996 = vmatprep.subr.bf16.mxu1 %v6493_v43  ;;  %v6504_v43 = vld [vmem:[#allocation55_spill] sm:$0xff] }
 0x1da   :  { %2998 = vmatpush1.bf16.msra.mxu1 %v6494_v0  ;;  %v6505_v0 = vld [vmem:[#allocation2_spill] sm:$0xff] }
 0x1db   :  { %3000 = vmatprep.subr.bf16.mxu1 %v6495_v36 }
 0x1de   :  { %3002 = vmatpush1.bf16.msra.mxu1 %v6496_v45 }
 0x1df   :  { %3004 = vmatprep.subr.bf16.mxu1 %v6497_v51 }
 0x1e2   :  { %3006 = vmatpush1.bf16.msra.mxu1 %v6498_v54 }
 0x1e3   :  { %3008 = vmatprep.subr.bf16.mxu1 %v6499_v16  ;;  %v705_v16 = vld [vmem:[%s6191_s0 + $0x30] sm:$0xff] }
 0x1e6   :  { %3010 = vmatpush1.bf16.msra.mxu1 %v6500_v57 }
 0x1e7   :  { %3012 = vmatprep.subr.bf16.mxu1 %v6501_v12  ;;  %v706_v12 = vld [vmem:[%s6191_s0 + $0x38] sm:$0xff] }
 0x1ea   :  { %3014 = vmatpush1.bf16.msra.mxu1 %v6502_v18 }
 0x1eb   :  { %3016 = vmatprep.subr.bf16.mxu1 %v6503_v44 }
 0x1ee   :  { %3018 = vmatpush1.bf16.msra.mxu1 %v6504_v43  ;;  %v708_v43 = vld [vmem:[%s6191_s0 + $0x48] sm:$0xff] }
 0x1ef   :  { %3084 = vmatprep.subr.bf16.mxu1 %v6505_v0  ;;  %v707_v0 = vld [vmem:[%s6191_s0 + $0x40] sm:$0xff] }
 0x244   :  { %v558_v36 = vpop.f32.mrb[2].mxu1  ;;  %v629_v45 = vpop.f32.mrb[4].mxu0 }
 0x245   :  { %v560_v17 = vpop.f32.mrb[3].mxu1  ;;  %v631_v51 = vpop.f32.mrb[5].mxu0  ;;  %v711_v57 = vadd.f32 %v705_v16, %v558_v36  ;;  %v725_v21 = vadd.f32 %v707_v0, %v629_v45  ;;  %v709_v45 = vld [vmem:[%s6191_s0 + $0x50] sm:$0xff] }
 0x246   :  { %v712_v18 = vadd.f32 %v706_v12, %v560_v17  ;;  %v726_v11 = vadd.f32 %v708_v43, %v631_v51  ;;  %v6507_v51 = vld [vmem:[#allocation80_spill] sm:$0xff] }
 0x247   :  { %v2443_v54 = vmul.f32 -1.442695, %v711_v57  ;;  %v2445_v42 = vmul.f32 -1.442695, %v725_v21 }
 0x248   :  { %v2444_v44 = vmul.f32 -1.442695, %v712_v18  ;;  %v2446_v1 = vmul.f32 -1.442695, %v726_v11 }
 0x249   :  { %4095 = vpow2.f32 %v2443_v54  ;;  %v6506_v54 = vld [vmem:[#allocation79_spill] sm:$0xff] }
 0x24a   :  { %4097 = vpow2.f32 %v2444_v44 }
 0x24b   :  { %4099 = vpow2.f32 %v2445_v42  ;;  %v710_v42 = vld [vmem:[%s6191_s0 + $0x58] sm:$0xff] }
 0x24c   :  { %4101 = vpow2.f32 %v2446_v1 }
 0x253   :  { %v4096_v58 = vpop.eup %4095 }
 0x254   :  { %v4098_v49 = vpop.eup %4097  ;;  %v719_v36 = vadd.f32 1.0, %v4096_v58 }
 0x255   :  { %v720_v17 = vadd.f32 1.0, %v4098_v49  ;;  %v4100_v44 = vpop.eup %4099 }
 0x256   :  { %4103 = vrcp.f32 %v719_v36  ;;  %v4102_v12 = vpop.eup %4101  ;;  %v733_v11 = vadd.f32 1.0, %v4100_v44 }
 0x257   :  { %4105 = vrcp.f32 %v720_v17  ;;  %v734_v1 = vadd.f32 1.0, %v4102_v12  ;;  %v6510_v12 = vld [vmem:[#allocation67_spill] sm:$0xff] }
 0x260   :  { %v4104_v35 = vpop.eup %4103 }
 0x261   :  { %v4106_v0 = vpop.eup %4105 }
 0x284   :  { %v700_v57 = vpop.f32.mrb[4].mxu1 }
 0x285   :  { %v739_v16 = vadd.f32 %v700_v57, %v6506_v54  ;;  %v702_v18 = vpop.f32.mrb[5].mxu1 }
 0x286   :  { %v740_v43 = vadd.f32 %v702_v18, %v6507_v51 }
 0x287   :  { %v741_v58 = vmul.f32 %v4104_v35, %v739_v16 }
 0x288   :  { %v742_v49 = vmul.f32 %v4106_v0, %v740_v43  ;;  %v6514_v43 = vld [vmem:[#allocation24_spill] sm:$0xff] }
 0x289   :  { %v743_v21 = vadd.f32 %v741_v58, %v709_v45  ;;  %v6512_v45 = vld [vmem:[#allocation71_spill] sm:$0xff]  ;;  %v6515_v0 = vld [vmem:[#allocation72_spill] sm:$0xff]  ;;  %v6516_v58 = vld [vmem:[#allocation73_spill] sm:$0xff] }
 0x28a   :  { %v744_v36 = vadd.f32 %v742_v49, %v710_v42  ;;  %v6517_v42 = vld [vmem:[#allocation26_spill] sm:$0xff]  ;;  %v6518_v49 = vld [vmem:[#allocation28_spill] sm:$0xff] }
 0x28b   :  { %4107 = vtanh.f32 %v743_v21  ;;  %v6520_v21 = vld [vmem:[#allocation75_spill] sm:$0xff] }
 0x28c   :  { %4109 = vtanh.f32 %v744_v36  ;;  %v6522_v36 = vld [vmem:[#allocation32_spill] sm:$0xff] }
 0x28d   :  { %4111 = vrcp.f32 %v733_v11  ;;  %v6519_v11 = vld [vmem:[#allocation74_spill] sm:$0xff] }
 0x28e   :  { %4113 = vrcp.f32 %v734_v1  ;;  %v6521_v1 = vld [vmem:[#allocation30_spill] sm:$0xff] }
 0x295   :  { %v4108_v17 = vpop.eup %4107 }
 0x296   :  { %v4110_v57 = vpop.eup %4109  ;;  %v747_v54 = vsub.f32 %v5250_v62, %v4108_v17  ;;  %v6508_v62 = vld [vmem:[#allocation65_spill] sm:$0xff] }
 0x297   :  { %v4112_v18 = vpop.eup %4111  ;;  %v748_v35 = vsub.f32 %v5252_v55, %v4110_v57  ;;  %v6528_v55 = vld [vmem:[#allocation3_spill] sm:$0xff] }
 0x298   :  { %v4114_v16 = vpop.eup %4113  ;;  %v749_v51 = vmul.f32 %v4112_v18, %v747_v54  ;;  %v6511_v54 = vld [vmem:[#allocation15_spill] sm:$0xff]  ;;  %v6525_v18 = vld [vmem:[#allocation34_spill] sm:$0xff] }
 0x299   :  { %v750_v22 = vmul.f32 %v4114_v16, %v748_v35  ;;  %v6526_v35 = vld [vmem:[#allocation36_spill] sm:$0xff]  ;;  %v6527_v16 = vld [vmem:[#allocation78_spill] sm:$0xff] }
 0x29a   :  { %v5378_v27 = vadd.f32 %v4108_v17, %v749_v51  ;;  %v6513_v51 = vld [vmem:[#allocation22_spill] sm:$0xff]  ;;  %v6523_v17 = vld [vmem:[#allocation76_spill] sm:$0xff] }
 0x29b   :  { %v5380_v44 = vadd.f32 %v4110_v57, %v750_v22  ;;  %v6509_v22 = vld [vmem:[#allocation12_spill] sm:$0xff]  ;;  %v6524_v57 = vld [vmem:[#allocation77_spill] sm:$0xff] }
 0x29d   :  { %817 = vmatprep.mubr.f32.mxu0 %v5380_v44  ;;  %888 = vmatprep.mubr.f32.mxu1 %v5380_v44 }
 0x29e   :  { %818 = vmatmul.mubr.f32.vlgmr.msra.gmra.mrb[6].mxu0 %v5378_v27  ;;  %889 = vmatmul.mubr.f32.vlgmr.msra.gmra.mrb[6].mxu1 %v5378_v27 }
 0x29f   :  { %3022 = vmatpush1.bf16.msra.mxu0 %v6452_v29  ;;  %959 = vmatprep.mubr.f32.mxu0 %v5380_v44 }
 0x2a0   :  { %3024 = vmatprep.subr.bf16.mxu0 %v6453_v38  ;;  %3086 = vmatpush1.bf16.msra.mxu1 %v4295_v7 }
 0x2a1   :  { %3088 = vmatprep.subr.bf16.mxu1 %v4297_v8 }
 0x2a3   :  { %3026 = vmatpush1.bf16.msra.mxu0 %v6454_v4 }
 0x2a4   :  { %3028 = vmatprep.subr.bf16.mxu0 %v6455_v3  ;;  %3090 = vmatpush1.bf16.msra.mxu1 %v4313_v13 }
 0x2a5   :  { %3092 = vmatprep.subr.bf16.mxu1 %v4316_v14 }
 0x2a7   :  { %3030 = vmatpush1.bf16.msra.mxu0 %v6456_v47 }
 0x2a8   :  { %3032 = vmatprep.subr.bf16.mxu0 %v6457_v28  ;;  %3094 = vmatpush1.bf16.msra.mxu1 %v4331_v19 }
 0x2a9   :  { %3096 = vmatprep.subr.bf16.mxu1 %v4334_v20 }
 0x2ab   :  { %3034 = vmatpush1.bf16.msra.mxu0 %v4925_v53 }
 0x2ac   :  { %3036 = vmatprep.subr.bf16.mxu0 %v4937_v48  ;;  %3098 = vmatpush1.bf16.msra.mxu1 %v4349_v25 }
 0x2ad   :  { %3100 = vmatprep.subr.bf16.mxu1 %v4352_v26 }
 0x2af   :  { %3038 = vmatpush1.bf16.msra.mxu0 %v6458_v52 }
 0x2b0   :  { %3040 = vmatprep.subr.bf16.mxu0 %v6459_v61  ;;  %3102 = vmatpush1.bf16.msra.mxu1 %v4367_v31 }
 0x2b1   :  { %3104 = vmatprep.subr.bf16.mxu1 %v4370_v32 }
 0x2b3   :  { %3042 = vmatpush1.bf16.msra.mxu0 %v6460_v59 }
 0x2b4   :  { %3044 = vmatprep.subr.bf16.mxu0 %v6461_v2  ;;  %3106 = vmatpush1.bf16.msra.mxu1 %v4397_v41 }
 0x2b5   :  { %3108 = vmatprep.subr.bf16.mxu1 %v4410_v46 }
 0x2b7   :  { %3046 = vmatpush1.bf16.msra.mxu0 %v6462_v23 }
 0x2b8   :  { %3048 = vmatprep.subr.bf16.mxu0 %v6463_v33  ;;  %3110 = vmatpush1.bf16.msra.mxu1 %v4440_v56 }
 0x2b9   :  { %3112 = vmatprep.subr.bf16.mxu1 %v4455_v60 }
 0x2bb   :  { %3050 = vmatpush1.bf16.msra.mxu0 %v6464_v30 }
 0x2bc   :  { %3052 = vmatprep.subr.bf16.mxu0 %v6465_v37  ;;  %3114 = vmatpush1.bf16.msra.mxu1 %v4486_v9 }
 0x2bd   :  { %3116 = vmatprep.subr.bf16.mxu1 %v4498_v15 }
 0x2bf   :  { %3054 = vmatpush1.bf16.msra.mxu0 %v6466_v10 }
 0x2c0   :  { %3056 = vmatprep.subr.bf16.mxu0 %v6508_v62  ;;  %3118 = vmatpush1.bf16.msra.mxu1 %v6509_v22 }
 0x2c1   :  { %3120 = vmatprep.subr.bf16.mxu1 %v4537_v34 }
 0x2c3   :  { %3058 = vmatpush1.bf16.msra.mxu0 %v6468_v5 }
 0x2c4   :  { %3060 = vmatprep.subr.bf16.mxu0 %v6510_v12  ;;  %3122 = vmatpush1.bf16.msra.mxu1 %v6511_v54 }
 0x2c5   :  { %3124 = vmatprep.subr.bf16.mxu1 %v4573_v50 }
 0x2c7   :  { %3062 = vmatpush1.bf16.msra.mxu0 %v6470_v24 }
 0x2c8   :  { %3064 = vmatprep.subr.bf16.mxu0 %v6471_v39  ;;  %3126 = vmatpush1.bf16.msra.mxu1 %v4594_v63 }
 0x2c9   :  { %3128 = vmatprep.subr.bf16.mxu1 %v4609_v6 }
 0x2cb   :  { %3066 = vmatpush1.bf16.msra.mxu0 %v6472_v40 }
 0x2cc   :  { %3068 = vmatprep.subr.bf16.mxu0 %v6512_v45  ;;  %3130 = vmatpush1.bf16.msra.mxu1 %v6513_v51 }
 0x2cd   :  { %3132 = vmatprep.subr.bf16.mxu1 %v6514_v43 }
 0x2cf   :  { %3070 = vmatpush1.bf16.msra.mxu0 %v6515_v0 }
 0x2d0   :  { %3072 = vmatprep.subr.bf16.mxu0 %v6516_v58  ;;  %3134 = vmatpush1.bf16.msra.mxu1 %v6517_v42 }
 0x2d1   :  { %3136 = vmatprep.subr.bf16.mxu1 %v6518_v49  ;;  %v6529_v49 = vld [vmem:[#allocation38_spill] sm:$0xff] }
 0x2d3   :  { %3074 = vmatpush1.bf16.msra.mxu0 %v6519_v11  ;;  %v6530_v11 = vld [vmem:[#allocation40_spill] sm:$0xff] }
 0x2d4   :  { %3076 = vmatprep.subr.bf16.mxu0 %v6520_v21  ;;  %3138 = vmatpush1.bf16.msra.mxu1 %v6521_v1  ;;  %v6531_v1 = vld [vmem:[#allocation4_spill] sm:$0xff]  ;;  %v6541_v21 = vld [vmem:[#allocation17_spill] sm:$0xff] }
 0x2d5   :  { %3140 = vmatprep.subr.bf16.mxu1 %v6522_v36  ;;  %v6532_v36 = vld [vmem:[#allocation5_spill] sm:$0xff] }
 0x2d7   :  { %3078 = vmatpush1.bf16.msra.mxu0 %v6523_v17  ;;  %v6533_v17 = vld [vmem:[#allocation6_spill] sm:$0xff] }
 0x2d8   :  { %3080 = vmatprep.subr.bf16.mxu0 %v6524_v57  ;;  %3142 = vmatpush1.bf16.msra.mxu1 %v6525_v18  ;;  %v6534_v57 = vld [vmem:[#allocation8_spill] sm:$0xff]  ;;  %v6535_v18 = vld [vmem:[#allocation9_spill] sm:$0xff] }
 0x2d9   :  { %3144 = vmatprep.subr.bf16.mxu1 %v6526_v35  ;;  %v6536_v35 = vld [vmem:[#allocation10_spill] sm:$0xff] }
 0x2db   :  { %3082 = vmatpush1.bf16.msra.mxu0 %v6527_v16  ;;  %v6537_v16 = vld [vmem:[#allocation11_spill] sm:$0xff] }
 0x2dc   :  { %3148 = vmatprep.subr.bf16.mxu0 %v6528_v55  ;;  %3146 = vmatpush1.bf16.msra.mxu1 %v6529_v49  ;;  %v6538_v55 = vld [vmem:[#allocation13_spill] sm:$0xff]  ;;  %v6539_v49 = vld [vmem:[#allocation14_spill] sm:$0xff] }
 0x2dd   :  { %3212 = vmatprep.subr.bf16.mxu1 %v6530_v11  ;;  %v6540_v11 = vld [vmem:[#allocation16_spill] sm:$0xff] }
 0x2de   :  { %960 = vmatmul.mubr.f32.vlgmr.msra.gmra.mrb[8].mxu0 %v5378_v27 }
 0x2df   :  { %3150 = vmatpush1.bf16.msra.mxu0 %v6531_v1  ;;  %v6542_v1 = vld [vmem:[#allocation19_spill] sm:$0xff] }
 0x2e0   :  { %3152 = vmatprep.subr.bf16.mxu0 %v6532_v36  ;;  %v6543_v36 = vld [vmem:[#allocation21_spill] sm:$0xff] }
 0x2e3   :  { %3154 = vmatpush1.bf16.msra.mxu0 %v6533_v17  ;;  %v6544_v17 = vld [vmem:[#allocation23_spill] sm:$0xff] }
 0x2e4   :  { %3156 = vmatprep.subr.bf16.mxu0 %v6534_v57  ;;  %v6545_v57 = vld [vmem:[#allocation25_spill] sm:$0xff] }
 0x2e7   :  { %3158 = vmatpush1.bf16.msra.mxu0 %v6535_v18  ;;  %v6546_v18 = vld [vmem:[#allocation27_spill] sm:$0xff] }
 0x2e8   :  { %3160 = vmatprep.subr.bf16.mxu0 %v6536_v35  ;;  %v6547_v35 = vld [vmem:[#allocation29_spill] sm:$0xff] }
 0x2eb   :  { %3162 = vmatpush1.bf16.msra.mxu0 %v6537_v16  ;;  %v6548_v16 = vld [vmem:[#allocation31_spill] sm:$0xff] }
 0x2ec   :  { %3164 = vmatprep.subr.bf16.mxu0 %v6538_v55  ;;  %v6549_v55 = vld [vmem:[#allocation33_spill] sm:$0xff] }
 0x2ef   :  { %3166 = vmatpush1.bf16.msra.mxu0 %v6539_v49  ;;  %v6550_v49 = vld [vmem:[#allocation35_spill] sm:$0xff] }
 0x2f0   :  { %3168 = vmatprep.subr.bf16.mxu0 %v6540_v11  ;;  %v6551_v11 = vld [vmem:[#allocation37_spill] sm:$0xff] }
 0x2f3   :  { %3170 = vmatpush1.bf16.msra.mxu0 %v6541_v21  ;;  %v6552_v21 = vld [vmem:[#allocation39_spill] sm:$0xff] }
 0x2f4   :  { %3172 = vmatprep.subr.bf16.mxu0 %v6542_v1  ;;  %v6553_v1 = vld [vmem:[#allocation41_spill] sm:$0xff] }
 0x2f7   :  { %3174 = vmatpush1.bf16.msra.mxu0 %v6543_v36  ;;  %v6554_v36 = vld [vmem:[#allocation43_spill] sm:$0xff] }
 0x2f8   :  { %3176 = vmatprep.subr.bf16.mxu0 %v6544_v17  ;;  %v6555_v17 = vld [vmem:[#allocation45_spill] sm:$0xff] }
 0x2fb   :  { %3178 = vmatpush1.bf16.msra.mxu0 %v6545_v57  ;;  %v6556_v57 = vld [vmem:[#allocation47_spill] sm:$0xff] }
 0x2fc   :  { %3180 = vmatprep.subr.bf16.mxu0 %v6546_v18  ;;  %v6557_v18 = vld [vmem:[#allocation49_spill] sm:$0xff] }
 0x2ff   :  { %3182 = vmatpush1.bf16.msra.mxu0 %v6547_v35  ;;  %v6558_v35 = vld [vmem:[#allocation51_spill] sm:$0xff] }
 0x300   :  { %3184 = vmatprep.subr.bf16.mxu0 %v6548_v16  ;;  %v6559_v16 = vld [vmem:[#allocation53_spill] sm:$0xff] }
 0x303   :  { %3186 = vmatpush1.bf16.msra.mxu0 %v6549_v55  ;;  %v6560_v55 = vld [vmem:[#allocation54_spill] sm:$0xff] }
 0x304   :  { %3188 = vmatprep.subr.bf16.mxu0 %v6550_v49  ;;  %v6561_v49 = vld [vmem:[#allocation55_spill] sm:$0xff] }
 0x307   :  { %3190 = vmatpush1.bf16.msra.mxu0 %v6551_v11  ;;  %v6562_v11 = vld [vmem:[#allocation2_spill] sm:$0xff] }
 0x308   :  { %3192 = vmatprep.subr.bf16.mxu0 %v6552_v21 }
 0x30b   :  { %3194 = vmatpush1.bf16.msra.mxu0 %v6553_v1 }
 0x30c   :  { %3196 = vmatprep.subr.bf16.mxu0 %v6554_v36 }
 0x30f   :  { %3198 = vmatpush1.bf16.msra.mxu0 %v6555_v17 }
 0x310   :  { %3200 = vmatprep.subr.bf16.mxu0 %v6556_v57  ;;  %v966_v57 = vld [vmem:[%s6191_s0 + $0x60] sm:$0xff] }
 0x313   :  { %3202 = vmatpush1.bf16.msra.mxu0 %v6557_v18 }
 0x314   :  { %3204 = vmatprep.subr.bf16.mxu0 %v6558_v35  ;;  %v967_v35 = vld [vmem:[%s6191_s0 + $0x68] sm:$0xff] }
 0x317   :  { %3206 = vmatpush1.bf16.msra.mxu0 %v6559_v16 }
 0x318   :  { %3208 = vmatprep.subr.bf16.mxu0 %v6560_v55 }
 0x31b   :  { %3210 = vmatpush1.bf16.msra.mxu0 %v6561_v49  ;;  %v969_v49 = vld [vmem:[%s6191_s0 + $0x78] sm:$0xff] }
 0x31c   :  { %3276 = vmatprep.subr.bf16.mxu0 %v6562_v11  ;;  %v968_v11 = vld [vmem:[%s6191_s0 + $0x70] sm:$0xff] }
 0x371   :  { %v819_v21 = vpop.f32.mrb[6].mxu0  ;;  %v890_v1 = vpop.f32.mrb[6].mxu1 }
 0x372   :  { %v821_v42 = vpop.f32.mrb[7].mxu0  ;;  %v892_v36 = vpop.f32.mrb[7].mxu1  ;;  %v972_v18 = vadd.f32 %v966_v57, %v819_v21  ;;  %v986_v58 = vadd.f32 %v968_v11, %v890_v1  ;;  %v6564_v11 = vld [vmem:[#allocation80_spill] sm:$0xff] }
 0x373   :  { %v973_v16 = vadd.f32 %v967_v35, %v821_v42  ;;  %v987_v0 = vadd.f32 %v969_v49, %v892_v36  ;;  %v970_v49 = vld [vmem:[%s6191_s0 + $0x80] sm:$0xff] }
 0x374   :  { %v2447_v17 = vmul.f32 -1.442695, %v972_v18  ;;  %v2449_v45 = vmul.f32 -1.442695, %v986_v58  ;;  %v6563_v18 = vld [vmem:[#allocation79_spill] sm:$0xff] }
 0x375   :  { %v2448_v55 = vmul.f32 -1.442695, %v973_v16  ;;  %v2450_v40 = vmul.f32 -1.442695, %v987_v0 }
 0x376   :  { %4115 = vpow2.f32 %v2447_v17 }
 0x377   :  { %4117 = vpow2.f32 %v2448_v55 }
 0x378   :  { %4119 = vpow2.f32 %v2449_v45 }
 0x379   :  { %4121 = vpow2.f32 %v2450_v40  ;;  %v971_v40 = vld [vmem:[%s6191_s0 + $0x88] sm:$0xff] }
 0x380   :  { %v4116_v43 = vpop.eup %4115 }
 0x381   :  { %v4118_v51 = vpop.eup %4117  ;;  %v980_v21 = vadd.f32 1.0, %v4116_v43 }
 0x382   :  { %v981_v42 = vadd.f32 1.0, %v4118_v51  ;;  %v4120_v55 = vpop.eup %4119 }
 0x383   :  { %4123 = vrcp.f32 %v980_v21  ;;  %v4122_v57 = vpop.eup %4121  ;;  %v994_v51 = vadd.f32 1.0, %v4120_v55 }
 0x384   :  { %4125 = vrcp.f32 %v981_v42  ;;  %v995_v36 = vadd.f32 1.0, %v4122_v57  ;;  %v6568_v57 = vld [vmem:[#allocation70_spill] sm:$0xff] }
 0x38d   :  { %v4124_v6 = vpop.eup %4123 }
 0x38e   :  { %v4126_v0 = vpop.eup %4125 }
 0x3b1   :  { %v961_v17 = vpop.f32.mrb[8].mxu0 }
 0x3b2   :  { %v1000_v35 = vadd.f32 %v961_v17, %v6563_v18  ;;  %v963_v16 = vpop.f32.mrb[9].mxu0 }
 0x3b3   :  { %v1001_v58 = vadd.f32 %v963_v16, %v6564_v11 }
 0x3b4   :  { %v1002_v43 = vmul.f32 %v4124_v6, %v1000_v35 }
 0x3b5   :  { %v1003_v45 = vmul.f32 %v4126_v0, %v1001_v58  ;;  %v6572_v58 = vld [vmem:[#allocation72_spill] sm:$0xff]  ;;  %v6573_v0 = vld [vmem:[#allocation73_spill] sm:$0xff] }
 0x3b6   :  { %v1004_v1 = vadd.f32 %v1002_v43, %v970_v49  ;;  %v6570_v49 = vld [vmem:[#allocation22_spill] sm:$0xff] }
 0x3b7   :  { %v1005_v21 = vadd.f32 %v1003_v45, %v971_v40  ;;  %v6574_v43 = vld [vmem:[#allocation26_spill] sm:$0xff]  ;;  %v6575_v40 = vld [vmem:[#allocation28_spill] sm:$0xff] }
 0x3b8   :  { %4127 = vtanh.f32 %v1004_v1  ;;  %v6576_v45 = vld [vmem:[#allocation74_spill] sm:$0xff] }
 0x3b9   :  { %4129 = vtanh.f32 %v1005_v21  ;;  %v6578_v1 = vld [vmem:[#allocation30_spill] sm:$0xff]  ;;  %v6580_v21 = vld [vmem:[#allocation76_spill] sm:$0xff] }
 0x3ba   :  { %4131 = vrcp.f32 %v994_v51  ;;  %v6577_v51 = vld [vmem:[#allocation75_spill] sm:$0xff] }
 0x3bb   :  { %4133 = vrcp.f32 %v995_v36  ;;  %v6579_v36 = vld [vmem:[#allocation32_spill] sm:$0xff] }
 0x3c2   :  { %v4128_v42 = vpop.eup %4127 }
 0x3c3   :  { %v4130_v17 = vpop.eup %4129  ;;  %v1008_v18 = vsub.f32 %v5378_v27, %v4128_v42  ;;  %v6565_v27 = vld [vmem:[#allocation69_spill] sm:$0xff] }
 0x3c4   :  { %v4132_v16 = vpop.eup %4131  ;;  %v1009_v6 = vsub.f32 %v5380_v44, %v4130_v17  ;;  %v6567_v44 = vld [vmem:[#allocation20_spill] sm:$0xff] }
 0x3c5   :  { %v4134_v35 = vpop.eup %4133  ;;  %v1010_v11 = vmul.f32 %v4132_v16, %v1008_v18  ;;  %v6569_v18 = vld [vmem:[#allocation71_spill] sm:$0xff]  ;;  %v6583_v16 = vld [vmem:[#allocation36_spill] sm:$0xff] }
 0x3c6   :  { %v1011_v63 = vmul.f32 %v4134_v35, %v1009_v6  ;;  %v6584_v6 = vld [vmem:[#allocation78_spill] sm:$0xff]  ;;  %v6585_v35 = vld [vmem:[#allocation3_spill] sm:$0xff] }
 0x3c7   :  { %v5506_v39 = vadd.f32 %v4128_v42, %v1010_v11  ;;  %v6571_v11 = vld [vmem:[#allocation24_spill] sm:$0xff]  ;;  %v6581_v42 = vld [vmem:[#allocation77_spill] sm:$0xff] }
 0x3c8   :  { %v5508_v55 = vadd.f32 %v4130_v17, %v1011_v63  ;;  %v6566_v63 = vld [vmem:[#allocation18_spill] sm:$0xff] }
 0x3c9   :  { %v6582_v17 = vld [vmem:[#allocation34_spill] sm:$0xff] }
 0x3ca   :  { %1078 = vmatprep.mubr.f32.mxu1 %v5508_v55  ;;  %1149 = vmatprep.mubr.f32.mxu0 %v5508_v55 }
 0x3cb   :  { %1079 = vmatmul.mubr.f32.vlgmr.msra.gmra.mrb[8].mxu1 %v5506_v39  ;;  %1150 = vmatmul.mubr.f32.vlgmr.msra.gmra.mrb[10].mxu0 %v5506_v39 }
 0x3cc   :  { %3214 = vmatpush1.bf16.msra.mxu1 %v6452_v29  ;;  %1220 = vmatprep.mubr.f32.mxu1 %v5508_v55 }
 0x3cd   :  { %3216 = vmatprep.subr.bf16.mxu1 %v6453_v38  ;;  %3278 = vmatpush1.bf16.msra.mxu0 %v4295_v7 }
 0x3ce   :  { %3280 = vmatprep.subr.bf16.mxu0 %v4297_v8 }
 0x3d0   :  { %3218 = vmatpush1.bf16.msra.mxu1 %v6454_v4 }
 0x3d1   :  { %3220 = vmatprep.subr.bf16.mxu1 %v6455_v3  ;;  %3282 = vmatpush1.bf16.msra.mxu0 %v4313_v13 }
 0x3d2   :  { %3284 = vmatprep.subr.bf16.mxu0 %v4316_v14 }
 0x3d4   :  { %3222 = vmatpush1.bf16.msra.mxu1 %v6456_v47 }
 0x3d5   :  { %3224 = vmatprep.subr.bf16.mxu1 %v6457_v28  ;;  %3286 = vmatpush1.bf16.msra.mxu0 %v4331_v19 }
 0x3d6   :  { %3288 = vmatprep.subr.bf16.mxu0 %v4334_v20 }
 0x3d8   :  { %3226 = vmatpush1.bf16.msra.mxu1 %v4925_v53 }
 0x3d9   :  { %3228 = vmatprep.subr.bf16.mxu1 %v4937_v48  ;;  %3290 = vmatpush1.bf16.msra.mxu0 %v4349_v25 }
 0x3da   :  { %3292 = vmatprep.subr.bf16.mxu0 %v4352_v26 }
 0x3dc   :  { %3230 = vmatpush1.bf16.msra.mxu1 %v6458_v52 }
 0x3dd   :  { %3232 = vmatprep.subr.bf16.mxu1 %v6459_v61  ;;  %3294 = vmatpush1.bf16.msra.mxu0 %v4367_v31 }
 0x3de   :  { %3296 = vmatprep.subr.bf16.mxu0 %v4370_v32 }
 0x3e0   :  { %3234 = vmatpush1.bf16.msra.mxu1 %v6460_v59 }
 0x3e1   :  { %3236 = vmatprep.subr.bf16.mxu1 %v6461_v2  ;;  %3298 = vmatpush1.bf16.msra.mxu0 %v4397_v41 }
 0x3e2   :  { %3300 = vmatprep.subr.bf16.mxu0 %v4410_v46 }
 0x3e4   :  { %3238 = vmatpush1.bf16.msra.mxu1 %v6462_v23 }
 0x3e5   :  { %3240 = vmatprep.subr.bf16.mxu1 %v6463_v33  ;;  %3302 = vmatpush1.bf16.msra.mxu0 %v4440_v56 }
 0x3e6   :  { %3304 = vmatprep.subr.bf16.mxu0 %v4455_v60 }
 0x3e8   :  { %3242 = vmatpush1.bf16.msra.mxu1 %v6464_v30 }
 0x3e9   :  { %3244 = vmatprep.subr.bf16.mxu1 %v6465_v37  ;;  %3306 = vmatpush1.bf16.msra.mxu0 %v4486_v9 }
 0x3ea   :  { %3308 = vmatprep.subr.bf16.mxu0 %v4498_v15 }
 0x3ec   :  { %3246 = vmatpush1.bf16.msra.mxu1 %v6466_v10 }
 0x3ed   :  { %3248 = vmatprep.subr.bf16.mxu1 %v6508_v62  ;;  %3310 = vmatpush1.bf16.msra.mxu0 %v6509_v22 }
 0x3ee   :  { %3312 = vmatprep.subr.bf16.mxu0 %v4537_v34 }
 0x3f0   :  { %3250 = vmatpush1.bf16.msra.mxu1 %v6468_v5 }
 0x3f1   :  { %3252 = vmatprep.subr.bf16.mxu1 %v6510_v12  ;;  %3314 = vmatpush1.bf16.msra.mxu0 %v6511_v54 }
 0x3f2   :  { %3316 = vmatprep.subr.bf16.mxu0 %v4573_v50 }
 0x3f4   :  { %3254 = vmatpush1.bf16.msra.mxu1 %v6470_v24 }
 0x3f5   :  { %3256 = vmatprep.subr.bf16.mxu1 %v6565_v27  ;;  %3318 = vmatpush1.bf16.msra.mxu0 %v6566_v63 }
 0x3f6   :  { %3320 = vmatprep.subr.bf16.mxu0 %v6567_v44 }
 0x3f8   :  { %3258 = vmatpush1.bf16.msra.mxu1 %v6568_v57 }
 0x3f9   :  { %3260 = vmatprep.subr.bf16.mxu1 %v6569_v18  ;;  %3322 = vmatpush1.bf16.msra.mxu0 %v6570_v49 }
 0x3fa   :  { %3324 = vmatprep.subr.bf16.mxu0 %v6571_v11 }
 0x3fc   :  { %3262 = vmatpush1.bf16.msra.mxu1 %v6572_v58 }
 0x3fd   :  { %3264 = vmatprep.subr.bf16.mxu1 %v6573_v0  ;;  %3326 = vmatpush1.bf16.msra.mxu0 %v6574_v43 }
 0x3fe   :  { %3328 = vmatprep.subr.bf16.mxu0 %v6575_v40  ;;  %v6586_v40 = vld [vmem:[#allocation38_spill] sm:$0xff] }
 0x400   :  { %3266 = vmatpush1.bf16.msra.mxu1 %v6576_v45  ;;  %v6587_v45 = vld [vmem:[#allocation40_spill] sm:$0xff] }
 0x401   :  { %3268 = vmatprep.subr.bf16.mxu1 %v6577_v51  ;;  %3330 = vmatpush1.bf16.msra.mxu0 %v6578_v1  ;;  %v6588_v1 = vld [vmem:[#allocation4_spill] sm:$0xff]  ;;  %v6598_v51 = vld [vmem:[#allocation17_spill] sm:$0xff] }
 0x402   :  { %3332 = vmatprep.subr.bf16.mxu0 %v6579_v36  ;;  %v6589_v36 = vld [vmem:[#allocation5_spill] sm:$0xff] }
 0x404   :  { %3270 = vmatpush1.bf16.msra.mxu1 %v6580_v21  ;;  %v6590_v21 = vld [vmem:[#allocation6_spill] sm:$0xff] }
 0x405   :  { %3272 = vmatprep.subr.bf16.mxu1 %v6581_v42  ;;  %3334 = vmatpush1.bf16.msra.mxu0 %v6582_v17  ;;  %v6591_v42 = vld [vmem:[#allocation8_spill] sm:$0xff]  ;;  %v6592_v17 = vld [vmem:[#allocation9_spill] sm:$0xff] }
 0x406   :  { %3336 = vmatprep.subr.bf16.mxu0 %v6583_v16  ;;  %v6593_v16 = vld [vmem:[#allocation10_spill] sm:$0xff] }
 0x408   :  { %3274 = vmatpush1.bf16.msra.mxu1 %v6584_v6  ;;  %v6594_v6 = vld [vmem:[#allocation11_spill] sm:$0xff] }
 0x409   :  { %3340 = vmatprep.subr.bf16.mxu1 %v6585_v35  ;;  %3338 = vmatpush1.bf16.msra.mxu0 %v6586_v40  ;;  %v6595_v35 = vld [vmem:[#allocation13_spill] sm:$0xff]  ;;  %v6596_v40 = vld [vmem:[#allocation14_spill] sm:$0xff] }
 0x40a   :  { %3404 = vmatprep.subr.bf16.mxu0 %v6587_v45  ;;  %v6597_v45 = vld [vmem:[#allocation16_spill] sm:$0xff] }
 0x40b   :  { %1221 = vmatmul.mubr.f32.vlgmr.msra.gmra.mrb[10].mxu1 %v5506_v39 }
 0x40c   :  { %3342 = vmatpush1.bf16.msra.mxu1 %v6588_v1  ;;  %v6599_v1 = vld [vmem:[#allocation19_spill] sm:$0xff] }
 0x40d   :  { %3344 = vmatprep.subr.bf16.mxu1 %v6589_v36  ;;  %v6600_v36 = vld [vmem:[#allocation21_spill] sm:$0xff] }
 0x410   :  { %3346 = vmatpush1.bf16.msra.mxu1 %v6590_v21  ;;  %v6601_v21 = vld [vmem:[#allocation23_spill] sm:$0xff] }
 0x411   :  { %3348 = vmatprep.subr.bf16.mxu1 %v6591_v42  ;;  %v6602_v42 = vld [vmem:[#allocation25_spill] sm:$0xff] }
 0x414   :  { %3350 = vmatpush1.bf16.msra.mxu1 %v6592_v17  ;;  %v6603_v17 = vld [vmem:[#allocation27_spill] sm:$0xff] }
 0x415   :  { %3352 = vmatprep.subr.bf16.mxu1 %v6593_v16  ;;  %v6604_v16 = vld [vmem:[#allocation29_spill] sm:$0xff] }
 0x418   :  { %3354 = vmatpush1.bf16.msra.mxu1 %v6594_v6  ;;  %v6605_v6 = vld [vmem:[#allocation31_spill] sm:$0xff] }
 0x419   :  { %3356 = vmatprep.subr.bf16.mxu1 %v6595_v35  ;;  %v6606_v35 = vld [vmem:[#allocation33_spill] sm:$0xff] }
 0x41c   :  { %3358 = vmatpush1.bf16.msra.mxu1 %v6596_v40  ;;  %v6607_v40 = vld [vmem:[#allocation35_spill] sm:$0xff] }
 0x41d   :  { %3360 = vmatprep.subr.bf16.mxu1 %v6597_v45  ;;  %v6608_v45 = vld [vmem:[#allocation37_spill] sm:$0xff] }
 0x420   :  { %3362 = vmatpush1.bf16.msra.mxu1 %v6598_v51  ;;  %v6609_v51 = vld [vmem:[#allocation39_spill] sm:$0xff] }
 0x421   :  { %3364 = vmatprep.subr.bf16.mxu1 %v6599_v1  ;;  %v6610_v1 = vld [vmem:[#allocation41_spill] sm:$0xff] }
 0x424   :  { %3366 = vmatpush1.bf16.msra.mxu1 %v6600_v36  ;;  %v6611_v36 = vld [vmem:[#allocation43_spill] sm:$0xff] }
 0x425   :  { %3368 = vmatprep.subr.bf16.mxu1 %v6601_v21  ;;  %v6612_v21 = vld [vmem:[#allocation45_spill] sm:$0xff] }
 0x428   :  { %3370 = vmatpush1.bf16.msra.mxu1 %v6602_v42  ;;  %v6613_v42 = vld [vmem:[#allocation47_spill] sm:$0xff] }
 0x429   :  { %3372 = vmatprep.subr.bf16.mxu1 %v6603_v17  ;;  %v6614_v17 = vld [vmem:[#allocation49_spill] sm:$0xff] }
 0x42c   :  { %3374 = vmatpush1.bf16.msra.mxu1 %v6604_v16  ;;  %v6615_v16 = vld [vmem:[#allocation51_spill] sm:$0xff] }
 0x42d   :  { %3376 = vmatprep.subr.bf16.mxu1 %v6605_v6  ;;  %v6616_v6 = vld [vmem:[#allocation53_spill] sm:$0xff] }
 0x430   :  { %3378 = vmatpush1.bf16.msra.mxu1 %v6606_v35  ;;  %v6617_v35 = vld [vmem:[#allocation54_spill] sm:$0xff] }
 0x431   :  { %3380 = vmatprep.subr.bf16.mxu1 %v6607_v40  ;;  %v6618_v40 = vld [vmem:[#allocation55_spill] sm:$0xff] }
 0x434   :  { %3382 = vmatpush1.bf16.msra.mxu1 %v6608_v45  ;;  %v6619_v45 = vld [vmem:[#allocation2_spill] sm:$0xff] }
 0x435   :  { %3384 = vmatprep.subr.bf16.mxu1 %v6609_v51 }
 0x438   :  { %3386 = vmatpush1.bf16.msra.mxu1 %v6610_v1 }
 0x439   :  { %3388 = vmatprep.subr.bf16.mxu1 %v6611_v36 }
 0x43c   :  { %3390 = vmatpush1.bf16.msra.mxu1 %v6612_v21 }
 0x43d   :  { %3392 = vmatprep.subr.bf16.mxu1 %v6613_v42  ;;  %v1227_v42 = vld [vmem:[%s6191_s0 + $0x90] sm:$0xff] }
 0x440   :  { %3394 = vmatpush1.bf16.msra.mxu1 %v6614_v17 }
 0x441   :  { %3396 = vmatprep.subr.bf16.mxu1 %v6615_v16  ;;  %v1228_v16 = vld [vmem:[%s6191_s0 + $0x98] sm:$0xff] }
 0x444   :  { %3398 = vmatpush1.bf16.msra.mxu1 %v6616_v6 }
 0x445   :  { %3400 = vmatprep.subr.bf16.mxu1 %v6617_v35 }
 0x448   :  { %3402 = vmatpush1.bf16.msra.mxu1 %v6618_v40  ;;  %v1230_v40 = vld [vmem:[%s6191_s0 + $0xa8] sm:$0xff] }
 0x449   :  { %3468 = vmatprep.subr.bf16.mxu1 %v6619_v45  ;;  %v1229_v45 = vld [vmem:[%s6191_s0 + $0xa0] sm:$0xff] }
 0x49e   :  { %v1080_v51 = vpop.f32.mrb[8].mxu1  ;;  %v1151_v1 = vpop.f32.mrb[10].mxu0 }
 0x49f   :  { %v1082_v43 = vpop.f32.mrb[9].mxu1  ;;  %v1153_v36 = vpop.f32.mrb[11].mxu0  ;;  %v1233_v17 = vadd.f32 %v1227_v42, %v1080_v51  ;;  %v1247_v0 = vadd.f32 %v1229_v45, %v1151_v1  ;;  %v6621_v45 = vld [vmem:[#allocation80_spill] sm:$0xff] }
 0x4a0   :  { %v1234_v6 = vadd.f32 %v1228_v16, %v1082_v43  ;;  %v1248_v58 = vadd.f32 %v1230_v40, %v1153_v36  ;;  %v6620_v16 = vld [vmem:[#allocation79_spill] sm:$0xff]  ;;  %v1231_v40 = vld [vmem:[%s6191_s0 + $0xb0] sm:$0xff] }
 0x4a1   :  { %v2451_v21 = vmul.f32 -1.442695, %v1233_v17  ;;  %v2453_v18 = vmul.f32 -1.442695, %v1247_v0 }
 0x4a2   :  { %v2452_v35 = vmul.f32 -1.442695, %v1234_v6  ;;  %v2454_v57 = vmul.f32 -1.442695, %v1248_v58 }
 0x4a3   :  { %4135 = vpow2.f32 %v2451_v21 }
 0x4a4   :  { %4137 = vpow2.f32 %v2452_v35 }
 0x4a5   :  { %4139 = vpow2.f32 %v2453_v18 }
 0x4a6   :  { %4141 = vpow2.f32 %v2454_v57  ;;  %v1232_v57 = vld [vmem:[%s6191_s0 + $0xb8] sm:$0xff] }
 0x4ad   :  { %v4136_v11 = vpop.eup %4135 }
 0x4ae   :  { %v4138_v49 = vpop.eup %4137  ;;  %v1241_v51 = vadd.f32 1.0, %v4136_v11 }
 0x4af   :  { %v1242_v43 = vadd.f32 1.0, %v4138_v49  ;;  %v4140_v21 = vpop.eup %4139 }
 0x4b0   :  { %4143 = vrcp.f32 %v1241_v51  ;;  %v4142_v17 = vpop.eup %4141  ;;  %v1255_v49 = vadd.f32 1.0, %v4140_v21 }
 0x4b1   :  { %4145 = vrcp.f32 %v1242_v43  ;;  %v1256_v36 = vadd.f32 1.0, %v4142_v17  ;;  %v6625_v17 = vld [vmem:[#allocation70_spill] sm:$0xff] }
 0x4ba   :  { %v4144_v44 = vpop.eup %4143 }
 0x4bb   :  { %v4146_v58 = vpop.eup %4145 }
 0x4de   :  { %v1222_v42 = vpop.f32.mrb[10].mxu1 }
 0x4df   :  { %v1261_v6 = vadd.f32 %v1222_v42, %v6620_v16  ;;  %v1224_v35 = vpop.f32.mrb[11].mxu1 }
 0x4e0   :  { %v1262_v0 = vadd.f32 %v1224_v35, %v6621_v45 }
 0x4e1   :  { %v1263_v11 = vmul.f32 %v4144_v44, %v1261_v6 }
 0x4e2   :  { %v1264_v18 = vmul.f32 %v4146_v58, %v1262_v0  ;;  %v6629_v0 = vld [vmem:[#allocation72_spill] sm:$0xff]  ;;  %v6630_v58 = vld [vmem:[#allocation73_spill] sm:$0xff] }
 0x4e3   :  { %v1265_v1 = vadd.f32 %v1263_v11, %v1231_v40  ;;  %v6627_v40 = vld [vmem:[#allocation22_spill] sm:$0xff] }
 0x4e4   :  { %v1266_v51 = vadd.f32 %v1264_v18, %v1232_v57  ;;  %v6631_v11 = vld [vmem:[#allocation26_spill] sm:$0xff]  ;;  %v6632_v57 = vld [vmem:[#allocation28_spill] sm:$0xff] }
 0x4e5   :  { %4147 = vtanh.f32 %v1265_v1  ;;  %v6633_v18 = vld [vmem:[#allocation74_spill] sm:$0xff] }
 0x4e6   :  { %4149 = vtanh.f32 %v1266_v51  ;;  %v6635_v1 = vld [vmem:[#allocation30_spill] sm:$0xff]  ;;  %v6637_v51 = vld [vmem:[#allocation76_spill] sm:$0xff] }
 0x4e7   :  { %4151 = vrcp.f32 %v1255_v49  ;;  %v6634_v49 = vld [vmem:[#allocation75_spill] sm:$0xff] }
 0x4e8   :  { %4153 = vrcp.f32 %v1256_v36  ;;  %v6636_v36 = vld [vmem:[#allocation32_spill] sm:$0xff] }
 0x4ef   :  { %v4148_v43 = vpop.eup %4147 }
 0x4f0   :  { %v4150_v42 = vpop.eup %4149  ;;  %v1269_v16 = vsub.f32 %v5506_v39, %v4148_v43  ;;  %v6622_v39 = vld [vmem:[#allocation69_spill] sm:$0xff] }
 0x4f1   :  { %v4152_v35 = vpop.eup %4151  ;;  %v1270_v44 = vsub.f32 %v5508_v55, %v4150_v42  ;;  %v6623_v55 = vld [vmem:[#allocation18_spill] sm:$0xff] }
 0x4f2   :  { %v4154_v6 = vpop.eup %4153  ;;  %v1271_v45 = vmul.f32 %v4152_v35, %v1269_v16  ;;  %v6626_v16 = vld [vmem:[#allocation71_spill] sm:$0xff]  ;;  %v6640_v35 = vld [vmem:[#allocation36_spill] sm:$0xff] }
 0x4f3   :  { %v1272_v63 = vmul.f32 %v4154_v6, %v1270_v44  ;;  %v6641_v44 = vld [vmem:[#allocation78_spill] sm:$0xff]  ;;  %v6642_v6 = vld [vmem:[#allocation3_spill] sm:$0xff] }
 0x4f4   :  { %v5634_v27 = vadd.f32 %v4148_v43, %v1271_v45  ;;  %v6628_v45 = vld [vmem:[#allocation24_spill] sm:$0xff]  ;;  %v6638_v43 = vld [vmem:[#allocation77_spill] sm:$0xff] }
 0x4f5   :  { %v5636_v21 = vadd.f32 %v4150_v42, %v1272_v63  ;;  %v6624_v63 = vld [vmem:[#allocation20_spill] sm:$0xff]  ;;  %v6639_v42 = vld [vmem:[#allocation34_spill] sm:$0xff] }
 0x4f7   :  { %1339 = vmatprep.mubr.f32.mxu0 %v5636_v21  ;;  %1410 = vmatprep.mubr.f32.mxu1 %v5636_v21 }
 0x4f8   :  { %1340 = vmatmul.mubr.f32.vlgmr.msra.gmra.mrb[12].mxu0 %v5634_v27  ;;  %1411 = vmatmul.mubr.f32.vlgmr.msra.gmra.mrb[12].mxu1 %v5634_v27 }
 0x4f9   :  { %3406 = vmatpush1.bf16.msra.mxu0 %v6452_v29  ;;  %1481 = vmatprep.mubr.f32.mxu0 %v5636_v21 }
 0x4fa   :  { %3408 = vmatprep.subr.bf16.mxu0 %v6453_v38  ;;  %3470 = vmatpush1.bf16.msra.mxu1 %v4295_v7 }
 0x4fb   :  { %3472 = vmatprep.subr.bf16.mxu1 %v4297_v8 }
 0x4fd   :  { %3410 = vmatpush1.bf16.msra.mxu0 %v6454_v4 }
 0x4fe   :  { %3412 = vmatprep.subr.bf16.mxu0 %v6455_v3  ;;  %3474 = vmatpush1.bf16.msra.mxu1 %v4313_v13 }
 0x4ff   :  { %3476 = vmatprep.subr.bf16.mxu1 %v4316_v14 }
 0x501   :  { %3414 = vmatpush1.bf16.msra.mxu0 %v6456_v47 }
 0x502   :  { %3416 = vmatprep.subr.bf16.mxu0 %v6457_v28  ;;  %3478 = vmatpush1.bf16.msra.mxu1 %v4331_v19 }
 0x503   :  { %3480 = vmatprep.subr.bf16.mxu1 %v4334_v20 }
 0x505   :  { %3418 = vmatpush1.bf16.msra.mxu0 %v4925_v53 }
 0x506   :  { %3420 = vmatprep.subr.bf16.mxu0 %v4937_v48  ;;  %3482 = vmatpush1.bf16.msra.mxu1 %v4349_v25 }
 0x507   :  { %3484 = vmatprep.subr.bf16.mxu1 %v4352_v26 }
 0x509   :  { %3422 = vmatpush1.bf16.msra.mxu0 %v6458_v52 }
 0x50a   :  { %3424 = vmatprep.subr.bf16.mxu0 %v6459_v61  ;;  %3486 = vmatpush1.bf16.msra.mxu1 %v4367_v31 }
 0x50b   :  { %3488 = vmatprep.subr.bf16.mxu1 %v4370_v32 }
 0x50d   :  { %3426 = vmatpush1.bf16.msra.mxu0 %v6460_v59 }
 0x50e   :  { %3428 = vmatprep.subr.bf16.mxu0 %v6461_v2  ;;  %3490 = vmatpush1.bf16.msra.mxu1 %v4397_v41 }
 0x50f   :  { %3492 = vmatprep.subr.bf16.mxu1 %v4410_v46 }
 0x511   :  { %3430 = vmatpush1.bf16.msra.mxu0 %v6462_v23 }
 0x512   :  { %3432 = vmatprep.subr.bf16.mxu0 %v6463_v33  ;;  %3494 = vmatpush1.bf16.msra.mxu1 %v4440_v56 }
 0x513   :  { %3496 = vmatprep.subr.bf16.mxu1 %v4455_v60 }
 0x515   :  { %3434 = vmatpush1.bf16.msra.mxu0 %v6464_v30 }
 0x516   :  { %3436 = vmatprep.subr.bf16.mxu0 %v6465_v37  ;;  %3498 = vmatpush1.bf16.msra.mxu1 %v4486_v9 }
 0x517   :  { %3500 = vmatprep.subr.bf16.mxu1 %v4498_v15 }
 0x519   :  { %3438 = vmatpush1.bf16.msra.mxu0 %v6466_v10 }
 0x51a   :  { %3440 = vmatprep.subr.bf16.mxu0 %v6508_v62  ;;  %3502 = vmatpush1.bf16.msra.mxu1 %v6509_v22 }
 0x51b   :  { %3504 = vmatprep.subr.bf16.mxu1 %v4537_v34 }
 0x51d   :  { %3442 = vmatpush1.bf16.msra.mxu0 %v6468_v5 }
 0x51e   :  { %3444 = vmatprep.subr.bf16.mxu0 %v6510_v12  ;;  %3506 = vmatpush1.bf16.msra.mxu1 %v6511_v54 }
 0x51f   :  { %3508 = vmatprep.subr.bf16.mxu1 %v4573_v50 }
 0x521   :  { %3446 = vmatpush1.bf16.msra.mxu0 %v6470_v24 }
 0x522   :  { %3448 = vmatprep.subr.bf16.mxu0 %v6622_v39  ;;  %3510 = vmatpush1.bf16.msra.mxu1 %v6623_v55 }
 0x523   :  { %3512 = vmatprep.subr.bf16.mxu1 %v6624_v63 }
 0x525   :  { %3450 = vmatpush1.bf16.msra.mxu0 %v6625_v17 }
 0x526   :  { %3452 = vmatprep.subr.bf16.mxu0 %v6626_v16  ;;  %3514 = vmatpush1.bf16.msra.mxu1 %v6627_v40 }
 0x527   :  { %3516 = vmatprep.subr.bf16.mxu1 %v6628_v45 }
 0x529   :  { %3454 = vmatpush1.bf16.msra.mxu0 %v6629_v0 }
 0x52a   :  { %3456 = vmatprep.subr.bf16.mxu0 %v6630_v58  ;;  %3518 = vmatpush1.bf16.msra.mxu1 %v6631_v11 }
 0x52b   :  { %3520 = vmatprep.subr.bf16.mxu1 %v6632_v57  ;;  %v6643_v57 = vld [vmem:[#allocation38_spill] sm:$0xff] }
 0x52d   :  { %3458 = vmatpush1.bf16.msra.mxu0 %v6633_v18  ;;  %v6644_v18 = vld [vmem:[#allocation40_spill] sm:$0xff] }
 0x52e   :  { %3460 = vmatprep.subr.bf16.mxu0 %v6634_v49  ;;  %3522 = vmatpush1.bf16.msra.mxu1 %v6635_v1  ;;  %v6645_v1 = vld [vmem:[#allocation4_spill] sm:$0xff]  ;;  %v6655_v49 = vld [vmem:[#allocation17_spill] sm:$0xff] }
 0x52f   :  { %3524 = vmatprep.subr.bf16.mxu1 %v6636_v36  ;;  %v6646_v36 = vld [vmem:[#allocation5_spill] sm:$0xff] }
 0x531   :  { %3462 = vmatpush1.bf16.msra.mxu0 %v6637_v51  ;;  %v6647_v51 = vld [vmem:[#allocation6_spill] sm:$0xff] }
 0x532   :  { %3464 = vmatprep.subr.bf16.mxu0 %v6638_v43  ;;  %3526 = vmatpush1.bf16.msra.mxu1 %v6639_v42  ;;  %v6648_v43 = vld [vmem:[#allocation8_spill] sm:$0xff]  ;;  %v6649_v42 = vld [vmem:[#allocation9_spill] sm:$0xff] }
 0x533   :  { %3528 = vmatprep.subr.bf16.mxu1 %v6640_v35  ;;  %v6650_v35 = vld [vmem:[#allocation10_spill] sm:$0xff] }
 0x535   :  { %3466 = vmatpush1.bf16.msra.mxu0 %v6641_v44  ;;  %v6651_v44 = vld [vmem:[#allocation11_spill] sm:$0xff] }
 0x536   :  { %3532 = vmatprep.subr.bf16.mxu0 %v6642_v6  ;;  %3530 = vmatpush1.bf16.msra.mxu1 %v6643_v57  ;;  %v6652_v6 = vld [vmem:[#allocation13_spill] sm:$0xff]  ;;  %v6653_v57 = vld [vmem:[#allocation14_spill] sm:$0xff] }
 0x537   :  { %3596 = vmatprep.subr.bf16.mxu1 %v6644_v18  ;;  %v6654_v18 = vld [vmem:[#allocation16_spill] sm:$0xff] }
 0x538   :  { %1482 = vmatmul.mubr.f32.vlgmr.msra.gmra.mrb[14].mxu0 %v5634_v27 }
 0x539   :  { %3534 = vmatpush1.bf16.msra.mxu0 %v6645_v1  ;;  %v6656_v1 = vld [vmem:[#allocation19_spill] sm:$0xff] }
 0x53a   :  { %3536 = vmatprep.subr.bf16.mxu0 %v6646_v36  ;;  %v6657_v36 = vld [vmem:[#allocation21_spill] sm:$0xff] }
 0x53d   :  { %3538 = vmatpush1.bf16.msra.mxu0 %v6647_v51  ;;  %v6658_v51 = vld [vmem:[#allocation23_spill] sm:$0xff] }
 0x53e   :  { %3540 = vmatprep.subr.bf16.mxu0 %v6648_v43  ;;  %v6659_v43 = vld [vmem:[#allocation25_spill] sm:$0xff] }
 0x541   :  { %3542 = vmatpush1.bf16.msra.mxu0 %v6649_v42  ;;  %v6660_v42 = vld [vmem:[#allocation27_spill] sm:$0xff] }
 0x542   :  { %3544 = vmatprep.subr.bf16.mxu0 %v6650_v35  ;;  %v6661_v35 = vld [vmem:[#allocation29_spill] sm:$0xff] }
 0x545   :  { %3546 = vmatpush1.bf16.msra.mxu0 %v6651_v44  ;;  %v6662_v44 = vld [vmem:[#allocation31_spill] sm:$0xff] }
 0x546   :  { %3548 = vmatprep.subr.bf16.mxu0 %v6652_v6  ;;  %v6663_v6 = vld [vmem:[#allocation33_spill] sm:$0xff] }
 0x549   :  { %3550 = vmatpush1.bf16.msra.mxu0 %v6653_v57  ;;  %v6664_v57 = vld [vmem:[#allocation35_spill] sm:$0xff] }
 0x54a   :  { %3552 = vmatprep.subr.bf16.mxu0 %v6654_v18  ;;  %v6665_v18 = vld [vmem:[#allocation37_spill] sm:$0xff] }
 0x54d   :  { %3554 = vmatpush1.bf16.msra.mxu0 %v6655_v49  ;;  %v6666_v49 = vld [vmem:[#allocation39_spill] sm:$0xff] }
 0x54e   :  { %3556 = vmatprep.subr.bf16.mxu0 %v6656_v1  ;;  %v6667_v1 = vld [vmem:[#allocation41_spill] sm:$0xff] }
 0x551   :  { %3558 = vmatpush1.bf16.msra.mxu0 %v6657_v36  ;;  %v6668_v36 = vld [vmem:[#allocation43_spill] sm:$0xff] }
 0x552   :  { %3560 = vmatprep.subr.bf16.mxu0 %v6658_v51  ;;  %v6669_v51 = vld [vmem:[#allocation45_spill] sm:$0xff] }
 0x555   :  { %3562 = vmatpush1.bf16.msra.mxu0 %v6659_v43  ;;  %v6670_v43 = vld [vmem:[#allocation47_spill] sm:$0xff] }
 0x556   :  { %3564 = vmatprep.subr.bf16.mxu0 %v6660_v42  ;;  %v6671_v42 = vld [vmem:[#allocation49_spill] sm:$0xff] }
 0x559   :  { %3566 = vmatpush1.bf16.msra.mxu0 %v6661_v35  ;;  %v6672_v35 = vld [vmem:[#allocation51_spill] sm:$0xff] }
 0x55a   :  { %3568 = vmatprep.subr.bf16.mxu0 %v6662_v44  ;;  %v6673_v44 = vld [vmem:[#allocation53_spill] sm:$0xff] }
 0x55d   :  { %3570 = vmatpush1.bf16.msra.mxu0 %v6663_v6  ;;  %v6674_v6 = vld [vmem:[#allocation54_spill] sm:$0xff] }
 0x55e   :  { %3572 = vmatprep.subr.bf16.mxu0 %v6664_v57  ;;  %v6675_v57 = vld [vmem:[#allocation55_spill] sm:$0xff] }
 0x561   :  { %3574 = vmatpush1.bf16.msra.mxu0 %v6665_v18  ;;  %v6676_v18 = vld [vmem:[#allocation2_spill] sm:$0xff] }
 0x562   :  { %3576 = vmatprep.subr.bf16.mxu0 %v6666_v49 }
 0x565   :  { %3578 = vmatpush1.bf16.msra.mxu0 %v6667_v1 }
 0x566   :  { %3580 = vmatprep.subr.bf16.mxu0 %v6668_v36 }
 0x569   :  { %3582 = vmatpush1.bf16.msra.mxu0 %v6669_v51 }
 0x56a   :  { %3584 = vmatprep.subr.bf16.mxu0 %v6670_v43  ;;  %v1488_v43 = vld [vmem:[%s6191_s0 + $0xc0] sm:$0xff] }
 0x56d   :  { %3586 = vmatpush1.bf16.msra.mxu0 %v6671_v42 }
 0x56e   :  { %3588 = vmatprep.subr.bf16.mxu0 %v6672_v35  ;;  %v1489_v35 = vld [vmem:[%s6191_s0 + $0xc8] sm:$0xff] }
 0x571   :  { %3590 = vmatpush1.bf16.msra.mxu0 %v6673_v44 }
 0x572   :  { %3592 = vmatprep.subr.bf16.mxu0 %v6674_v6 }
 0x575   :  { %3594 = vmatpush1.bf16.msra.mxu0 %v6675_v57  ;;  %v1491_v57 = vld [vmem:[%s6191_s0 + $0xd8] sm:$0xff] }
 0x576   :  { %3660 = vmatprep.subr.bf16.mxu0 %v6676_v18  ;;  %v1490_v18 = vld [vmem:[%s6191_s0 + $0xd0] sm:$0xff] }
 0x5cb   :  { %v1341_v49 = vpop.f32.mrb[12].mxu0  ;;  %v1412_v1 = vpop.f32.mrb[12].mxu1 }
 0x5cc   :  { %v1343_v11 = vpop.f32.mrb[13].mxu0  ;;  %v1414_v36 = vpop.f32.mrb[13].mxu1  ;;  %v1494_v42 = vadd.f32 %v1488_v43, %v1341_v49  ;;  %v1508_v58 = vadd.f32 %v1490_v18, %v1412_v1  ;;  %v6678_v18 = vld [vmem:[#allocation80_spill] sm:$0xff] }
 0x5cd   :  { %v1495_v44 = vadd.f32 %v1489_v35, %v1343_v11  ;;  %v1509_v0 = vadd.f32 %v1491_v57, %v1414_v36  ;;  %v6677_v35 = vld [vmem:[#allocation79_spill] sm:$0xff]  ;;  %v1492_v57 = vld [vmem:[%s6191_s0 + $0xe0] sm:$0xff] }
 0x5ce   :  { %v2455_v51 = vmul.f32 -1.442695, %v1494_v42  ;;  %v2457_v16 = vmul.f32 -1.442695, %v1508_v58 }
 0x5cf   :  { %v2456_v6 = vmul.f32 -1.442695, %v1495_v44  ;;  %v2458_v17 = vmul.f32 -1.442695, %v1509_v0 }
 0x5d0   :  { %4155 = vpow2.f32 %v2455_v51 }
 0x5d1   :  { %4157 = vpow2.f32 %v2456_v6 }
 0x5d2   :  { %4159 = vpow2.f32 %v2457_v16 }
 0x5d3   :  { %4161 = vpow2.f32 %v2458_v17  ;;  %v1493_v17 = vld [vmem:[%s6191_s0 + $0xe8] sm:$0xff] }
 0x5da   :  { %v4156_v45 = vpop.eup %4155 }
 0x5db   :  { %v4158_v40 = vpop.eup %4157  ;;  %v1502_v49 = vadd.f32 1.0, %v4156_v45 }
 0x5dc   :  { %v1503_v11 = vadd.f32 1.0, %v4158_v40  ;;  %v4160_v51 = vpop.eup %4159 }
 0x5dd   :  { %4163 = vrcp.f32 %v1502_v49  ;;  %v4162_v42 = vpop.eup %4161  ;;  %v1516_v40 = vadd.f32 1.0, %v4160_v51 }
 0x5de   :  { %4165 = vrcp.f32 %v1503_v11  ;;  %v1517_v36 = vadd.f32 1.0, %v4162_v42  ;;  %v6682_v42 = vld [vmem:[#allocation70_spill] sm:$0xff] }
 0x5e7   :  { %v4164_v63 = vpop.eup %4163 }
 0x5e8   :  { %v4166_v0 = vpop.eup %4165 }
 0x60b   :  { %v1483_v43 = vpop.f32.mrb[14].mxu0 }
 0x60c   :  { %v1522_v44 = vadd.f32 %v1483_v43, %v6677_v35  ;;  %v1485_v6 = vpop.f32.mrb[15].mxu0 }
 0x60d   :  { %v1523_v58 = vadd.f32 %v1485_v6, %v6678_v18 }
 0x60e   :  { %v1524_v45 = vmul.f32 %v4164_v63, %v1522_v44 }
 0x60f   :  { %v1525_v16 = vmul.f32 %v4166_v0, %v1523_v58  ;;  %v6686_v58 = vld [vmem:[#allocation72_spill] sm:$0xff]  ;;  %v6687_v0 = vld [vmem:[#allocation73_spill] sm:$0xff] }
 0x610   :  { %v1526_v1 = vadd.f32 %v1524_v45, %v1492_v57  ;;  %v6684_v57 = vld [vmem:[#allocation22_spill] sm:$0xff] }
 0x611   :  { %v1527_v49 = vadd.f32 %v1525_v16, %v1493_v17  ;;  %v6688_v45 = vld [vmem:[#allocation26_spill] sm:$0xff]  ;;  %v6689_v17 = vld [vmem:[#allocation28_spill] sm:$0xff] }
 0x612   :  { %4167 = vtanh.f32 %v1526_v1  ;;  %v6690_v16 = vld [vmem:[#allocation74_spill] sm:$0xff] }
 0x613   :  { %4169 = vtanh.f32 %v1527_v49  ;;  %v6692_v1 = vld [vmem:[#allocation30_spill] sm:$0xff]  ;;  %v6694_v49 = vld [vmem:[#allocation76_spill] sm:$0xff] }
 0x614   :  { %4171 = vrcp.f32 %v1516_v40  ;;  %v6691_v40 = vld [vmem:[#allocation75_spill] sm:$0xff] }
 0x615   :  { %4173 = vrcp.f32 %v1517_v36  ;;  %v6693_v36 = vld [vmem:[#allocation32_spill] sm:$0xff] }
 0x61c   :  { %v4168_v11 = vpop.eup %4167 }
 0x61d   :  { %v4170_v43 = vpop.eup %4169  ;;  %v1530_v35 = vsub.f32 %v5634_v27, %v4168_v11  ;;  %v6679_v27 = vld [vmem:[#allocation69_spill] sm:$0xff] }
 0x61e   :  { %v4172_v6 = vpop.eup %4171  ;;  %v1531_v63 = vsub.f32 %v5636_v21, %v4170_v43  ;;  %v6680_v21 = vld [vmem:[#allocation18_spill] sm:$0xff] }
 0x61f   :  { %v4174_v44 = vpop.eup %4173  ;;  %v1532_v18 = vmul.f32 %v4172_v6, %v1530_v35  ;;  %v6683_v35 = vld [vmem:[#allocation71_spill] sm:$0xff]  ;;  %v6697_v6 = vld [vmem:[#allocation36_spill] sm:$0xff] }
 0x620   :  { %v1533_v55 = vmul.f32 %v4174_v44, %v1531_v63  ;;  %v6698_v63 = vld [vmem:[#allocation78_spill] sm:$0xff]  ;;  %v6699_v44 = vld [vmem:[#allocation3_spill] sm:$0xff] }
 0x621   :  { %v5762_v39 = vadd.f32 %v4168_v11, %v1532_v18  ;;  %v6685_v18 = vld [vmem:[#allocation24_spill] sm:$0xff]  ;;  %v6695_v11 = vld [vmem:[#allocation77_spill] sm:$0xff] }
 0x622   :  { %v5764_v51 = vadd.f32 %v4170_v43, %v1533_v55  ;;  %v6681_v55 = vld [vmem:[#allocation20_spill] sm:$0xff]  ;;  %v6696_v43 = vld [vmem:[#allocation34_spill] sm:$0xff] }
 0x624   :  { %1600 = vmatprep.mubr.f32.mxu1 %v5764_v51  ;;  %1671 = vmatprep.mubr.f32.mxu0 %v5764_v51 }
 0x625   :  { %1601 = vmatmul.mubr.f32.vlgmr.msra.gmra.mrb[14].mxu1 %v5762_v39  ;;  %1672 = vmatmul.mubr.f32.vlgmr.msra.gmra.mrb[16].mxu0 %v5762_v39 }
 0x626   :  { %3598 = vmatpush1.bf16.msra.mxu1 %v6452_v29  ;;  %1742 = vmatprep.mubr.f32.mxu1 %v5764_v51 }
 0x627   :  { %3600 = vmatprep.subr.bf16.mxu1 %v6453_v38  ;;  %3662 = vmatpush1.bf16.msra.mxu0 %v4295_v7 }
 0x628   :  { %3664 = vmatprep.subr.bf16.mxu0 %v4297_v8 }
 0x62a   :  { %3602 = vmatpush1.bf16.msra.mxu1 %v6454_v4 }
 0x62b   :  { %3604 = vmatprep.subr.bf16.mxu1 %v6455_v3  ;;  %3666 = vmatpush1.bf16.msra.mxu0 %v4313_v13 }
 0x62c   :  { %3668 = vmatprep.subr.bf16.mxu0 %v4316_v14 }
 0x62e   :  { %3606 = vmatpush1.bf16.msra.mxu1 %v6456_v47 }
 0x62f   :  { %3608 = vmatprep.subr.bf16.mxu1 %v6457_v28  ;;  %3670 = vmatpush1.bf16.msra.mxu0 %v4331_v19 }
 0x630   :  { %3672 = vmatprep.subr.bf16.mxu0 %v4334_v20 }
 0x632   :  { %3610 = vmatpush1.bf16.msra.mxu1 %v4925_v53 }
 0x633   :  { %3612 = vmatprep.subr.bf16.mxu1 %v4937_v48  ;;  %3674 = vmatpush1.bf16.msra.mxu0 %v4349_v25 }
 0x634   :  { %3676 = vmatprep.subr.bf16.mxu0 %v4352_v26 }
 0x636   :  { %3614 = vmatpush1.bf16.msra.mxu1 %v6458_v52 }
 0x637   :  { %3616 = vmatprep.subr.bf16.mxu1 %v6459_v61  ;;  %3678 = vmatpush1.bf16.msra.mxu0 %v4367_v31 }
 0x638   :  { %3680 = vmatprep.subr.bf16.mxu0 %v4370_v32 }
 0x63a   :  { %3618 = vmatpush1.bf16.msra.mxu1 %v6460_v59 }
 0x63b   :  { %3620 = vmatprep.subr.bf16.mxu1 %v6461_v2  ;;  %3682 = vmatpush1.bf16.msra.mxu0 %v4397_v41 }
 0x63c   :  { %3684 = vmatprep.subr.bf16.mxu0 %v4410_v46 }
 0x63e   :  { %3622 = vmatpush1.bf16.msra.mxu1 %v6462_v23 }
 0x63f   :  { %3624 = vmatprep.subr.bf16.mxu1 %v6463_v33  ;;  %3686 = vmatpush1.bf16.msra.mxu0 %v4440_v56 }
 0x640   :  { %3688 = vmatprep.subr.bf16.mxu0 %v4455_v60 }
 0x642   :  { %3626 = vmatpush1.bf16.msra.mxu1 %v6464_v30 }
 0x643   :  { %3628 = vmatprep.subr.bf16.mxu1 %v6465_v37  ;;  %3690 = vmatpush1.bf16.msra.mxu0 %v4486_v9 }
 0x644   :  { %3692 = vmatprep.subr.bf16.mxu0 %v4498_v15 }
 0x646   :  { %3630 = vmatpush1.bf16.msra.mxu1 %v6466_v10 }
 0x647   :  { %3632 = vmatprep.subr.bf16.mxu1 %v6508_v62  ;;  %3694 = vmatpush1.bf16.msra.mxu0 %v6509_v22 }
 0x648   :  { %3696 = vmatprep.subr.bf16.mxu0 %v4537_v34 }
 0x64a   :  { %3634 = vmatpush1.bf16.msra.mxu1 %v6468_v5 }
 0x64b   :  { %3636 = vmatprep.subr.bf16.mxu1 %v6510_v12  ;;  %3698 = vmatpush1.bf16.msra.mxu0 %v6511_v54 }
 0x64c   :  { %3700 = vmatprep.subr.bf16.mxu0 %v4573_v50 }
 0x64e   :  { %3638 = vmatpush1.bf16.msra.mxu1 %v6470_v24 }
 0x64f   :  { %3640 = vmatprep.subr.bf16.mxu1 %v6679_v27  ;;  %3702 = vmatpush1.bf16.msra.mxu0 %v6680_v21 }
 0x650   :  { %3704 = vmatprep.subr.bf16.mxu0 %v6681_v55 }
 0x652   :  { %3642 = vmatpush1.bf16.msra.mxu1 %v6682_v42 }
 0x653   :  { %3644 = vmatprep.subr.bf16.mxu1 %v6683_v35  ;;  %3706 = vmatpush1.bf16.msra.mxu0 %v6684_v57 }
 0x654   :  { %3708 = vmatprep.subr.bf16.mxu0 %v6685_v18 }
 0x656   :  { %3646 = vmatpush1.bf16.msra.mxu1 %v6686_v58 }
 0x657   :  { %3648 = vmatprep.subr.bf16.mxu1 %v6687_v0  ;;  %3710 = vmatpush1.bf16.msra.mxu0 %v6688_v45 }
 0x658   :  { %3712 = vmatprep.subr.bf16.mxu0 %v6689_v17  ;;  %v6700_v17 = vld [vmem:[#allocation38_spill] sm:$0xff] }
 0x65a   :  { %3650 = vmatpush1.bf16.msra.mxu1 %v6690_v16  ;;  %v6701_v16 = vld [vmem:[#allocation40_spill] sm:$0xff] }
 0x65b   :  { %3652 = vmatprep.subr.bf16.mxu1 %v6691_v40  ;;  %3714 = vmatpush1.bf16.msra.mxu0 %v6692_v1  ;;  %v6702_v1 = vld [vmem:[#allocation4_spill] sm:$0xff]  ;;  %v6712_v40 = vld [vmem:[#allocation17_spill] sm:$0xff] }
 0x65c   :  { %3716 = vmatprep.subr.bf16.mxu0 %v6693_v36  ;;  %v6703_v36 = vld [vmem:[#allocation5_spill] sm:$0xff] }
 0x65e   :  { %3654 = vmatpush1.bf16.msra.mxu1 %v6694_v49  ;;  %v6704_v49 = vld [vmem:[#allocation6_spill] sm:$0xff] }
 0x65f   :  { %3656 = vmatprep.subr.bf16.mxu1 %v6695_v11  ;;  %3718 = vmatpush1.bf16.msra.mxu0 %v6696_v43  ;;  %v6705_v11 = vld [vmem:[#allocation8_spill] sm:$0xff]  ;;  %v6706_v43 = vld [vmem:[#allocation9_spill] sm:$0xff] }
 0x660   :  { %3720 = vmatprep.subr.bf16.mxu0 %v6697_v6  ;;  %v6707_v6 = vld [vmem:[#allocation10_spill] sm:$0xff] }
 0x662   :  { %3658 = vmatpush1.bf16.msra.mxu1 %v6698_v63  ;;  %v6708_v63 = vld [vmem:[#allocation11_spill] sm:$0xff] }
 0x663   :  { %3724 = vmatprep.subr.bf16.mxu1 %v6699_v44  ;;  %3722 = vmatpush1.bf16.msra.mxu0 %v6700_v17  ;;  %v6709_v44 = vld [vmem:[#allocation13_spill] sm:$0xff]  ;;  %v6710_v17 = vld [vmem:[#allocation14_spill] sm:$0xff] }
 0x664   :  { %3788 = vmatprep.subr.bf16.mxu0 %v6701_v16  ;;  %v6711_v16 = vld [vmem:[#allocation16_spill] sm:$0xff] }
 0x665   :  { %1743 = vmatmul.mubr.f32.vlgmr.msra.gmra.mrb[16].mxu1 %v5762_v39 }
 0x666   :  { %3726 = vmatpush1.bf16.msra.mxu1 %v6702_v1  ;;  %v6713_v1 = vld [vmem:[#allocation19_spill] sm:$0xff] }
 0x667   :  { %3728 = vmatprep.subr.bf16.mxu1 %v6703_v36  ;;  %v6714_v36 = vld [vmem:[#allocation21_spill] sm:$0xff] }
 0x66a   :  { %3730 = vmatpush1.bf16.msra.mxu1 %v6704_v49  ;;  %v6715_v49 = vld [vmem:[#allocation23_spill] sm:$0xff] }
 0x66b   :  { %3732 = vmatprep.subr.bf16.mxu1 %v6705_v11  ;;  %v6716_v11 = vld [vmem:[#allocation25_spill] sm:$0xff] }
 0x66e   :  { %3734 = vmatpush1.bf16.msra.mxu1 %v6706_v43  ;;  %v6717_v43 = vld [vmem:[#allocation27_spill] sm:$0xff] }
 0x66f   :  { %3736 = vmatprep.subr.bf16.mxu1 %v6707_v6  ;;  %v6718_v6 = vld [vmem:[#allocation29_spill] sm:$0xff] }
 0x672   :  { %3738 = vmatpush1.bf16.msra.mxu1 %v6708_v63  ;;  %v6719_v63 = vld [vmem:[#allocation31_spill] sm:$0xff] }
 0x673   :  { %3740 = vmatprep.subr.bf16.mxu1 %v6709_v44  ;;  %v6720_v44 = vld [vmem:[#allocation33_spill] sm:$0xff] }
 0x676   :  { %3742 = vmatpush1.bf16.msra.mxu1 %v6710_v17  ;;  %v6721_v17 = vld [vmem:[#allocation35_spill] sm:$0xff] }
 0x677   :  { %3744 = vmatprep.subr.bf16.mxu1 %v6711_v16  ;;  %v6722_v16 = vld [vmem:[#allocation37_spill] sm:$0xff] }
 0x67a   :  { %3746 = vmatpush1.bf16.msra.mxu1 %v6712_v40  ;;  %v6723_v40 = vld [vmem:[#allocation39_spill] sm:$0xff] }
 0x67b   :  { %3748 = vmatprep.subr.bf16.mxu1 %v6713_v1  ;;  %v6724_v1 = vld [vmem:[#allocation41_spill] sm:$0xff] }
 0x67e   :  { %3750 = vmatpush1.bf16.msra.mxu1 %v6714_v36  ;;  %v6725_v36 = vld [vmem:[#allocation43_spill] sm:$0xff] }
 0x67f   :  { %3752 = vmatprep.subr.bf16.mxu1 %v6715_v49  ;;  %v6726_v49 = vld [vmem:[#allocation45_spill] sm:$0xff] }
 0x682   :  { %3754 = vmatpush1.bf16.msra.mxu1 %v6716_v11  ;;  %v6727_v11 = vld [vmem:[#allocation47_spill] sm:$0xff] }
 0x683   :  { %3756 = vmatprep.subr.bf16.mxu1 %v6717_v43  ;;  %v6728_v43 = vld [vmem:[#allocation49_spill] sm:$0xff] }
 0x686   :  { %3758 = vmatpush1.bf16.msra.mxu1 %v6718_v6  ;;  %v6729_v6 = vld [vmem:[#allocation51_spill] sm:$0xff] }
 0x687   :  { %3760 = vmatprep.subr.bf16.mxu1 %v6719_v63  ;;  %v6730_v63 = vld [vmem:[#allocation53_spill] sm:$0xff] }
 0x68a   :  { %3762 = vmatpush1.bf16.msra.mxu1 %v6720_v44  ;;  %v6731_v44 = vld [vmem:[#allocation54_spill] sm:$0xff] }
 0x68b   :  { %3764 = vmatprep.subr.bf16.mxu1 %v6721_v17  ;;  %v6732_v17 = vld [vmem:[#allocation55_spill] sm:$0xff] }
 0x68e   :  { %3766 = vmatpush1.bf16.msra.mxu1 %v6722_v16  ;;  %v6733_v16 = vld [vmem:[#allocation2_spill] sm:$0xff] }
 0x68f   :  { %3768 = vmatprep.subr.bf16.mxu1 %v6723_v40 }
 0x692   :  { %3770 = vmatpush1.bf16.msra.mxu1 %v6724_v1 }
 0x693   :  { %3772 = vmatprep.subr.bf16.mxu1 %v6725_v36 }
 0x696   :  { %3774 = vmatpush1.bf16.msra.mxu1 %v6726_v49 }
 0x697   :  { %3776 = vmatprep.subr.bf16.mxu1 %v6727_v11  ;;  %v1749_v11 = vld [vmem:[%s6191_s0 + $0xf0] sm:$0xff] }
 0x69a   :  { %3778 = vmatpush1.bf16.msra.mxu1 %v6728_v43 }
 0x69b   :  { %3780 = vmatprep.subr.bf16.mxu1 %v6729_v6  ;;  %v1750_v6 = vld [vmem:[%s6191_s0 + $0xf8] sm:$0xff] }
 0x69e   :  { %3782 = vmatpush1.bf16.msra.mxu1 %v6730_v63 }
 0x69f   :  { %3784 = vmatprep.subr.bf16.mxu1 %v6731_v44 }
 0x6a2   :  { %3786 = vmatpush1.bf16.msra.mxu1 %v6732_v17  ;;  %v1752_v17 = vld [vmem:[%s6191_s0 + $0x108] sm:$0xff] }
 0x6a3   :  { %3852 = vmatprep.subr.bf16.mxu1 %v6733_v16  ;;  %v1751_v16 = vld [vmem:[%s6191_s0 + $0x100] sm:$0xff] }
 0x6f8   :  { %v1602_v40 = vpop.f32.mrb[14].mxu1  ;;  %v1673_v1 = vpop.f32.mrb[16].mxu0 }
 0x6f9   :  { %v1604_v45 = vpop.f32.mrb[15].mxu1  ;;  %v1675_v36 = vpop.f32.mrb[17].mxu0  ;;  %v1755_v43 = vadd.f32 %v1749_v11, %v1602_v40  ;;  %v1769_v0 = vadd.f32 %v1751_v16, %v1673_v1  ;;  %v6735_v1 = vld [vmem:[#allocation80_spill] sm:$0xff] }
 0x6fa   :  { %v1756_v63 = vadd.f32 %v1750_v6, %v1604_v45  ;;  %v1770_v58 = vadd.f32 %v1752_v17, %v1675_v36  ;;  %v6734_v6 = vld [vmem:[#allocation79_spill] sm:$0xff]  ;;  %v1753_v17 = vld [vmem:[%s6191_s0 + $0x110] sm:$0xff] }
 0x6fb   :  { %v2459_v49 = vmul.f32 -1.442695, %v1755_v43  ;;  %v2461_v35 = vmul.f32 -1.442695, %v1769_v0 }
 0x6fc   :  { %v2460_v44 = vmul.f32 -1.442695, %v1756_v63  ;;  %v2462_v42 = vmul.f32 -1.442695, %v1770_v58 }
 0x6fd   :  { %4175 = vpow2.f32 %v2459_v49 }
 0x6fe   :  { %4177 = vpow2.f32 %v2460_v44 }
 0x6ff   :  { %4179 = vpow2.f32 %v2461_v35 }
 0x700   :  { %4181 = vpow2.f32 %v2462_v42  ;;  %v1754_v42 = vld [vmem:[%s6191_s0 + $0x118] sm:$0xff] }
 0x707   :  { %v4176_v18 = vpop.eup %4175 }
 0x708   :  { %v4178_v57 = vpop.eup %4177  ;;  %v1763_v40 = vadd.f32 1.0, %v4176_v18 }
 0x709   :  { %v1764_v45 = vadd.f32 1.0, %v4178_v57  ;;  %v4180_v49 = vpop.eup %4179 }
 0x70a   :  { %4183 = vrcp.f32 %v1763_v40  ;;  %v4182_v43 = vpop.eup %4181  ;;  %v1777_v57 = vadd.f32 1.0, %v4180_v49 }
 0x70b   :  { %4185 = vrcp.f32 %v1764_v45  ;;  %v1778_v16 = vadd.f32 1.0, %v4182_v43  ;;  %v6759_v43 = vld [vmem:[#allocation4_spill] sm:$0xff] }
 0x714   :  { %v4184_v55 = vpop.eup %4183 }
 0x715   :  { %v4186_v58 = vpop.eup %4185 }
 0x738   :  { %v1744_v11 = vpop.f32.mrb[16].mxu1 }
 0x739   :  { %v1783_v63 = vadd.f32 %v1744_v11, %v6734_v6  ;;  %v1746_v44 = vpop.f32.mrb[17].mxu1 }
 0x73a   :  { %v1784_v0 = vadd.f32 %v1746_v44, %v6735_v1 }
 0x73b   :  { %v1785_v18 = vmul.f32 %v4184_v55, %v1783_v63 }
 0x73c   :  { %v1786_v35 = vmul.f32 %v4186_v58, %v1784_v0  ;;  %v6763_v0 = vld [vmem:[#allocation9_spill] sm:$0xff]  ;;  %v6764_v58 = vld [vmem:[#allocation10_spill] sm:$0xff] }
 0x73d   :  { %v1787_v36 = vadd.f32 %v1785_v18, %v1753_v17  ;;  %v6761_v17 = vld [vmem:[#allocation6_spill] sm:$0xff]  ;;  %v6765_v18 = vld [vmem:[#allocation11_spill] sm:$0xff] }
 0x73e   :  { %v1788_v40 = vadd.f32 %v1786_v35, %v1754_v42  ;;  %v6766_v42 = vld [vmem:[#allocation13_spill] sm:$0xff]  ;;  %v6767_v35 = vld [vmem:[#allocation14_spill] sm:$0xff] }
 0x73f   :  { %4187 = vtanh.f32 %v1787_v36  ;;  %v6769_v36 = vld [vmem:[#allocation17_spill] sm:$0xff] }
 0x740   :  { %4189 = vtanh.f32 %v1788_v40  ;;  %v6771_v40 = vld [vmem:[#allocation21_spill] sm:$0xff] }
 0x741   :  { %4191 = vrcp.f32 %v1777_v57  ;;  %v6768_v57 = vld [vmem:[#allocation16_spill] sm:$0xff] }
 0x742   :  { %4193 = vrcp.f32 %v1778_v16  ;;  %v6770_v16 = vld [vmem:[#allocation19_spill] sm:$0xff] }
 0x749   :  { %v4188_v45 = vpop.eup %4187 }
 0x74a   :  { %v4190_v11 = vpop.eup %4189  ;;  %v1791_v6 = vsub.f32 %v5762_v39, %v4188_v45  ;;  %v6756_v39 = vld [vmem:[#allocation3_spill] sm:$0xff] }
 0x74b   :  { %v4192_v44 = vpop.eup %4191  ;;  %v1792_v55 = vsub.f32 %v5764_v51, %v4190_v11  ;;  %v6757_v51 = vld [vmem:[#allocation38_spill] sm:$0xff] }
 0x74c   :  { %v4194_v63 = vpop.eup %4193  ;;  %v1793_v1 = vmul.f32 %v4192_v44, %v1791_v6  ;;  %v6760_v6 = vld [vmem:[#allocation5_spill] sm:$0xff]  ;;  %v6774_v44 = vld [vmem:[#allocation27_spill] sm:$0xff] }
 0x74d   :  { %v1794_v21 = vmul.f32 %v4194_v63, %v1792_v55  ;;  %v6775_v55 = vld [vmem:[#allocation29_spill] sm:$0xff]  ;;  %v6776_v63 = vld [vmem:[#allocation31_spill] sm:$0xff] }
 0x74e   :  { %v5890_v27 = vadd.f32 %v4188_v45, %v1793_v1  ;;  %v6762_v1 = vld [vmem:[#allocation8_spill] sm:$0xff]  ;;  %v6772_v45 = vld [vmem:[#allocation23_spill] sm:$0xff] }
 0x74f   :  { %v5892_v49 = vadd.f32 %v4190_v11, %v1794_v21  ;;  %v6758_v21 = vld [vmem:[#allocation40_spill] sm:$0xff]  ;;  %v6773_v11 = vld [vmem:[#allocation25_spill] sm:$0xff] }
 0x751   :  { %1861 = vmatprep.mubr.f32.mxu0 %v5892_v49  ;;  %1932 = vmatprep.mubr.f32.mxu1 %v5892_v49 }
 0x752   :  { %1862 = vmatmul.mubr.f32.vlgmr.msra.gmra.mrb[18].mxu0 %v5890_v27  ;;  %1933 = vmatmul.mubr.f32.vlgmr.msra.gmra.mrb[18].mxu1 %v5890_v27 }
 0x753   :  { %3790 = vmatpush1.bf16.msra.mxu0 %v6452_v29  ;;  %2003 = vmatprep.mubr.f32.mxu0 %v5892_v49 }
 0x754   :  { %3792 = vmatprep.subr.bf16.mxu0 %v6453_v38  ;;  %3854 = vmatpush1.bf16.msra.mxu1 %v4295_v7  ;;  %v6736_v7 = vld [vmem:[#allocation69_spill] sm:$0xff] }
 0x755   :  { %3856 = vmatprep.subr.bf16.mxu1 %v4297_v8  ;;  %v6737_v8 = vld [vmem:[#allocation18_spill] sm:$0xff] }
 0x757   :  { %3794 = vmatpush1.bf16.msra.mxu0 %v6454_v4 }
 0x758   :  { %3796 = vmatprep.subr.bf16.mxu0 %v6455_v3  ;;  %3858 = vmatpush1.bf16.msra.mxu1 %v4313_v13  ;;  %v6738_v13 = vld [vmem:[#allocation20_spill] sm:$0xff] }
 0x759   :  { %3860 = vmatprep.subr.bf16.mxu1 %v4316_v14  ;;  %v6739_v14 = vld [vmem:[#allocation70_spill] sm:$0xff] }
 0x75b   :  { %3798 = vmatpush1.bf16.msra.mxu0 %v6456_v47 }
 0x75c   :  { %3800 = vmatprep.subr.bf16.mxu0 %v6457_v28  ;;  %3862 = vmatpush1.bf16.msra.mxu1 %v4331_v19  ;;  %v6740_v19 = vld [vmem:[#allocation71_spill] sm:$0xff] }
 0x75d   :  { %3864 = vmatprep.subr.bf16.mxu1 %v4334_v20  ;;  %v6741_v20 = vld [vmem:[#allocation22_spill] sm:$0xff] }
 0x75f   :  { %3802 = vmatpush1.bf16.msra.mxu0 %v4925_v53 }
 0x760   :  { %3804 = vmatprep.subr.bf16.mxu0 %v4937_v48  ;;  %3866 = vmatpush1.bf16.msra.mxu1 %v4349_v25  ;;  %v6742_v25 = vld [vmem:[#allocation24_spill] sm:$0xff] }
 0x761   :  { %3868 = vmatprep.subr.bf16.mxu1 %v4352_v26  ;;  %v6743_v26 = vld [vmem:[#allocation72_spill] sm:$0xff] }
 0x763   :  { %3806 = vmatpush1.bf16.msra.mxu0 %v6458_v52 }
 0x764   :  { %3808 = vmatprep.subr.bf16.mxu0 %v6459_v61  ;;  %3870 = vmatpush1.bf16.msra.mxu1 %v4367_v31  ;;  %v6744_v31 = vld [vmem:[#allocation73_spill] sm:$0xff] }
 0x765   :  { %3872 = vmatprep.subr.bf16.mxu1 %v4370_v32  ;;  %v6745_v32 = vld [vmem:[#allocation26_spill] sm:$0xff] }
 0x767   :  { %3810 = vmatpush1.bf16.msra.mxu0 %v6460_v59 }
 0x768   :  { %3812 = vmatprep.subr.bf16.mxu0 %v6461_v2  ;;  %3874 = vmatpush1.bf16.msra.mxu1 %v4397_v41  ;;  %v6746_v41 = vld [vmem:[#allocation28_spill] sm:$0xff] }
 0x769   :  { %3876 = vmatprep.subr.bf16.mxu1 %v4410_v46  ;;  %v6747_v46 = vld [vmem:[#allocation74_spill] sm:$0xff] }
 0x76b   :  { %3814 = vmatpush1.bf16.msra.mxu0 %v6462_v23 }
 0x76c   :  { %3816 = vmatprep.subr.bf16.mxu0 %v6463_v33  ;;  %3878 = vmatpush1.bf16.msra.mxu1 %v4440_v56  ;;  %v6748_v56 = vld [vmem:[#allocation75_spill] sm:$0xff] }
 0x76d   :  { %3880 = vmatprep.subr.bf16.mxu1 %v4455_v60  ;;  %v6749_v60 = vld [vmem:[#allocation30_spill] sm:$0xff] }
 0x76f   :  { %3818 = vmatpush1.bf16.msra.mxu0 %v6464_v30 }
 0x770   :  { %3820 = vmatprep.subr.bf16.mxu0 %v6465_v37  ;;  %3882 = vmatpush1.bf16.msra.mxu1 %v4486_v9  ;;  %v6750_v9 = vld [vmem:[#allocation32_spill] sm:$0xff] }
 0x771   :  { %3884 = vmatprep.subr.bf16.mxu1 %v4498_v15  ;;  %v6751_v15 = vld [vmem:[#allocation76_spill] sm:$0xff] }
 0x773   :  { %3822 = vmatpush1.bf16.msra.mxu0 %v6466_v10 }
 0x774   :  { %3824 = vmatprep.subr.bf16.mxu0 %v6508_v62  ;;  %3886 = vmatpush1.bf16.msra.mxu1 %v6509_v22  ;;  %v6754_v22 = vld [vmem:[#allocation36_spill] sm:$0xff] }
 0x775   :  { %3888 = vmatprep.subr.bf16.mxu1 %v4537_v34  ;;  %v6752_v34 = vld [vmem:[#allocation77_spill] sm:$0xff] }
 0x777   :  { %3826 = vmatpush1.bf16.msra.mxu0 %v6468_v5 }
 0x778   :  { %3828 = vmatprep.subr.bf16.mxu0 %v6510_v12  ;;  %3890 = vmatpush1.bf16.msra.mxu1 %v6511_v54  ;;  %v6755_v54 = vld [vmem:[#allocation78_spill] sm:$0xff] }
 0x779   :  { %3892 = vmatprep.subr.bf16.mxu1 %v4573_v50  ;;  %v6753_v50 = vld [vmem:[#allocation34_spill] sm:$0xff] }
 0x77b   :  { %3830 = vmatpush1.bf16.msra.mxu0 %v6470_v24 }
 0x77c   :  { %3832 = vmatprep.subr.bf16.mxu0 %v6736_v7  ;;  %3894 = vmatpush1.bf16.msra.mxu1 %v6737_v8  ;;  %v6777_v8 = vld [vmem:[#allocation33_spill] sm:$0xff] }
 0x77d   :  { %3896 = vmatprep.subr.bf16.mxu1 %v6738_v13  ;;  %v6778_v13 = vld [vmem:[#allocation35_spill] sm:$0xff] }
 0x77f   :  { %3834 = vmatpush1.bf16.msra.mxu0 %v6739_v14 }
 0x780   :  { %3836 = vmatprep.subr.bf16.mxu0 %v6740_v19  ;;  %3898 = vmatpush1.bf16.msra.mxu1 %v6741_v20  ;;  %v6779_v20 = vld [vmem:[#allocation37_spill] sm:$0xff] }
 0x781   :  { %3900 = vmatprep.subr.bf16.mxu1 %v6742_v25  ;;  %v6780_v25 = vld [vmem:[#allocation39_spill] sm:$0xff] }
 0x783   :  { %3838 = vmatpush1.bf16.msra.mxu0 %v6743_v26 }
 0x784   :  { %3840 = vmatprep.subr.bf16.mxu0 %v6744_v31  ;;  %3902 = vmatpush1.bf16.msra.mxu1 %v6745_v32  ;;  %v6781_v32 = vld [vmem:[#allocation41_spill] sm:$0xff] }
 0x785   :  { %3904 = vmatprep.subr.bf16.mxu1 %v6746_v41  ;;  %v6782_v41 = vld [vmem:[#allocation43_spill] sm:$0xff] }
 0x787   :  { %3842 = vmatpush1.bf16.msra.mxu0 %v6747_v46 }
 0x788   :  { %3844 = vmatprep.subr.bf16.mxu0 %v6748_v56  ;;  %3906 = vmatpush1.bf16.msra.mxu1 %v6749_v60  ;;  %v6783_v60 = vld [vmem:[#allocation45_spill] sm:$0xff] }
 0x789   :  { %3908 = vmatprep.subr.bf16.mxu1 %v6750_v9  ;;  %v6784_v9 = vld [vmem:[#allocation47_spill] sm:$0xff] }
 0x78b   :  { %3846 = vmatpush1.bf16.msra.mxu0 %v6751_v15 }
 0x78c   :  { %3848 = vmatprep.subr.bf16.mxu0 %v6752_v34  ;;  %3910 = vmatpush1.bf16.msra.mxu1 %v6753_v50  ;;  %v6785_v50 = vld [vmem:[#allocation49_spill] sm:$0xff] }
 0x78d   :  { %3912 = vmatprep.subr.bf16.mxu1 %v6754_v22  ;;  %v6786_v22 = vld [vmem:[#allocation51_spill] sm:$0xff] }
 0x78f   :  { %3850 = vmatpush1.bf16.msra.mxu0 %v6755_v54 }
 0x790   :  { %3916 = vmatprep.subr.bf16.mxu0 %v6756_v39  ;;  %3914 = vmatpush1.bf16.msra.mxu1 %v6757_v51  ;;  %v6787_v39 = vld [vmem:[#allocation53_spill] sm:$0xff]  ;;  %v6788_v51 = vld [vmem:[#allocation54_spill] sm:$0xff] }
 0x791   :  { %3980 = vmatprep.subr.bf16.mxu1 %v6758_v21  ;;  %v6789_v21 = vld [vmem:[#allocation55_spill] sm:$0xff] }
 0x792   :  { %2004 = vmatmul.mubr.f32.vlgmr.msra.gmra.mrb[20].mxu0 %v5890_v27 }
 0x793   :  { %3918 = vmatpush1.bf16.msra.mxu0 %v6759_v43 }
 0x794   :  { %3920 = vmatprep.subr.bf16.mxu0 %v6760_v6 }
 0x797   :  { %3922 = vmatpush1.bf16.msra.mxu0 %v6761_v17 }
 0x798   :  { %3924 = vmatprep.subr.bf16.mxu0 %v6762_v1 }
 0x79b   :  { %3926 = vmatpush1.bf16.msra.mxu0 %v6763_v0  ;;  %v2010_v0 = vld [vmem:[%s6191_s0 + $0x120] sm:$0xff] }
 0x79c   :  { %3928 = vmatprep.subr.bf16.mxu0 %v6764_v58  ;;  %v2011_v58 = vld [vmem:[%s6191_s0 + $0x128] sm:$0xff] }
 0x79f   :  { %3930 = vmatpush1.bf16.msra.mxu0 %v6765_v18 }
 0x7a0   :  { %3932 = vmatprep.subr.bf16.mxu0 %v6766_v42 }
 0x7a3   :  { %3934 = vmatpush1.bf16.msra.mxu0 %v6767_v35 }
 0x7a4   :  { %3936 = vmatprep.subr.bf16.mxu0 %v6768_v57 }
 0x7a7   :  { %3938 = vmatpush1.bf16.msra.mxu0 %v6769_v36  ;;  %v2012_v36 = vld [vmem:[%s6191_s0 + $0x130] sm:$0xff] }
 0x7a8   :  { %3940 = vmatprep.subr.bf16.mxu0 %v6770_v16  ;;  %v2013_v16 = vld [vmem:[%s6191_s0 + $0x138] sm:$0xff] }
 0x7ab   :  { %3942 = vmatpush1.bf16.msra.mxu0 %v6771_v40 }
 0x7ac   :  { %3944 = vmatprep.subr.bf16.mxu0 %v6772_v45 }
 0x7af   :  { %3946 = vmatpush1.bf16.msra.mxu0 %v6773_v11 }
 0x7b0   :  { %3948 = vmatprep.subr.bf16.mxu0 %v6774_v44 }
 0x7b3   :  { %3950 = vmatpush1.bf16.msra.mxu0 %v6775_v55 }
 0x7b4   :  { %3952 = vmatprep.subr.bf16.mxu0 %v6776_v63 }
 0x7b7   :  { %3954 = vmatpush1.bf16.msra.mxu0 %v6777_v8 }
 0x7b8   :  { %3956 = vmatprep.subr.bf16.mxu0 %v6778_v13 }
 0x7bb   :  { %3958 = vmatpush1.bf16.msra.mxu0 %v6779_v20 }
 0x7bc   :  { %3960 = vmatprep.subr.bf16.mxu0 %v6780_v25 }
 0x7bf   :  { %3962 = vmatpush1.bf16.msra.mxu0 %v6781_v32 }
 0x7c0   :  { %3964 = vmatprep.subr.bf16.mxu0 %v6782_v41  ;;  %v6790_v41 = vld [vmem:[#allocation79_spill] sm:$0xff] }
 0x7c3   :  { %3966 = vmatpush1.bf16.msra.mxu0 %v6783_v60 }
 0x7c4   :  { %3968 = vmatprep.subr.bf16.mxu0 %v6784_v9 }
 0x7c7   :  { %3970 = vmatpush1.bf16.msra.mxu0 %v6785_v50 }
 0x7c8   :  { %3972 = vmatprep.subr.bf16.mxu0 %v6786_v22  ;;  %v2014_v22 = vld [vmem:[%s6191_s0 + $0x140] sm:$0xff] }
 0x7cb   :  { %3974 = vmatpush1.bf16.msra.mxu0 %v6787_v39  ;;  %v6791_v39 = vld [vmem:[#allocation80_spill] sm:$0xff] }
 0x7cc   :  { %3976 = vmatprep.subr.bf16.mxu0 %v6788_v51 }
 0x7cf   :  { %3978 = vmatpush1.bf16.msra.mxu0 %v6789_v21 }
 0x825   :  { %v1863_v43 = vpop.f32.mrb[18].mxu0  ;;  %v1934_v6 = vpop.f32.mrb[18].mxu1 }
 0x826   :  { %v1865_v17 = vpop.f32.mrb[19].mxu0  ;;  %v1936_v1 = vpop.f32.mrb[19].mxu1  ;;  %v2016_v18 = vadd.f32 %v2010_v0, %v1863_v43  ;;  %v2030_v40 = vadd.f32 %v2012_v36, %v1934_v6  ;;  %v2015_v6 = vld [vmem:[%s6191_s0 + $0x148] sm:$0xff] }
 0x827   :  { %v2017_v42 = vadd.f32 %v2011_v58, %v1865_v17  ;;  %v2031_v45 = vadd.f32 %v2013_v16, %v1936_v1 }
 0x828   :  { %v2463_v35 = vmul.f32 -1.442695, %v2016_v18  ;;  %v2465_v55 = vmul.f32 -1.442695, %v2030_v40 }
 0x829   :  { %v2464_v57 = vmul.f32 -1.442695, %v2017_v42  ;;  %v2466_v63 = vmul.f32 -1.442695, %v2031_v45 }
 0x82a   :  { %4195 = vpow2.f32 %v2463_v35 }
 0x82b   :  { %4197 = vpow2.f32 %v2464_v57 }
 0x82c   :  { %4199 = vpow2.f32 %v2465_v55 }
 0x82d   :  { %4201 = vpow2.f32 %v2466_v63 }
 0x834   :  { %v4196_v11 = vpop.eup %4195 }
 0x835   :  { %v4198_v44 = vpop.eup %4197  ;;  %v2024_v8 = vadd.f32 1.0, %v4196_v11 }
 0x836   :  { %v2025_v13 = vadd.f32 1.0, %v4198_v44  ;;  %v4200_v20 = vpop.eup %4199 }
 0x837   :  { %4203 = vrcp.f32 %v2024_v8  ;;  %v4202_v32 = vpop.eup %4201  ;;  %v2038_v1 = vadd.f32 1.0, %v4200_v20  ;;  %v2329_v8 = vld [vmem:[%s6193_s4 + $0x50] sm:$0xff] }
 0x838   :  { %4205 = vrcp.f32 %v2025_v13  ;;  %v2039_v58 = vadd.f32 1.0, %v4202_v32  ;;  %v2330_v13 = vld [vmem:[%s6193_s4 + $0x58] sm:$0xff]  ;;  %v2348_v32 = vld [vmem:[%s6193_s4 + $0xe8] sm:$0xff] }
 0x839   :  { %v4065_v20 = vpack.c.bf16 %v2330_v13, %v2329_v8 }
 0x841   :  { %v4204_v50 = vpop.eup %4203 }
 0x842   :  { %v4206_v21 = vpop.eup %4205 }
 0x865   :  { %v2005_v25 = vpop.f32.mrb[20].mxu0 }
 0x866   :  { %v2044_v60 = vadd.f32 %v2005_v25, %v6790_v41  ;;  %v2007_v9 = vpop.f32.mrb[21].mxu0  ;;  %v2347_v25 = vld [vmem:[%s6193_s4 + $0xe0] sm:$0xff] }
 0x867   :  { %v2045_v51 = vadd.f32 %v2007_v9, %v6791_v39  ;;  %v2331_v9 = vld [vmem:[%s6193_s4 + $0x60] sm:$0xff] }
 0x868   :  { %v2046_v43 = vmul.f32 %v4204_v50, %v2044_v60  ;;  %v4067_v60 = vpack.c.bf16 %v2348_v32, %v2347_v25  ;;  %v2332_v50 = vld [vmem:[%s6193_s4 + $0x68] sm:$0xff] }
 0x869   :  { %v2047_v17 = vmul.f32 %v4206_v21, %v2045_v51  ;;  %v2349_v51 = vld [vmem:[%s6193_s4 + $0xf0] sm:$0xff]  ;;  %v2350_v21 = vld [vmem:[%s6193_s4 + $0xf8] sm:$0xff] }
 0x86a   :  { %v2048_v0 = vadd.f32 %v2046_v43, %v2014_v22  ;;  %v4069_v22 = vpack.c.bf16 %v2332_v50, %v2331_v9  ;;  %v4071_v43 = vpack.c.bf16 %v2350_v21, %v2349_v51 }
 0x86b   :  { %v2049_v18 = vadd.f32 %v2047_v17, %v2015_v6  ;;  %v2333_v6 = vld [vmem:[%s6193_s4 + $0x70] sm:$0xff]  ;;  %v2334_v17 = vld [vmem:[%s6193_s4 + $0x78] sm:$0xff] }
 0x86c   :  { %4207 = vtanh.f32 %v2048_v0 }
 0x86d   :  { %4209 = vtanh.f32 %v2049_v18 }
 0x86e   :  { %4211 = vrcp.f32 %v2038_v1  ;;  %v4073_v1 = vpack.c.bf16 %v2334_v17, %v2333_v6 }
 0x86f   :  { %4213 = vrcp.f32 %v2039_v58 }
 0x876   :  { %v4208_v42 = vpop.eup %4207 }
 0x877   :  { %v4210_v35 = vpop.eup %4209  ;;  %v2052_v57 = vsub.f32 %v5890_v27, %v4208_v42  ;;  %v6792_v27 = vld [vmem:[#allocation7_spill] sm:$0xff] }
 0x878   :  { %v4212_v36 = vpop.eup %4211  ;;  %v2053_v16 = vsub.f32 %v5892_v49, %v4210_v35  ;;  %v2325_v49 = vld [vmem:[%s6193_s4 + $0x30] sm:$0xff] }
 0x879   :  { %v4214_v40 = vpop.eup %4213  ;;  %v2054_v45 = vmul.f32 %v4212_v36, %v2052_v57  ;;  %v2272_v57 = vld [vmem:[%s6191_s0 + $0x158] sm:$0xff] }
 0x87a   :  { %v2055_v11 = vmul.f32 %v4214_v40, %v2053_v16 }
 0x87b   :  { %v6017_v44 = vadd.f32 %v4208_v42, %v2054_v45 }
 0x87c   :  { %v6019_v55 = vadd.f32 %v4210_v35, %v2055_v11  ;;  %v2271_v35 = vld [vmem:[%s6191_s0 + $0x150] sm:$0xff]  ;;  %v2273_v11 = vld [vmem:[%s6191_s0 + $0x160] sm:$0xff] }
 0x87e   :  { %2122 = vmatprep.mubr.f32.mxu1 %v6019_v55  ;;  %2193 = vmatprep.mubr.f32.mxu0 %v6019_v55 }
 0x87f   :  { %2123 = vmatmul.mubr.f32.vlgmr.msra.gmra.mrb[20].mxu1 %v6017_v44  ;;  %2194 = vmatmul.mubr.f32.vlgmr.msra.gmra.mrb[22].mxu0 %v6017_v44 }
 0x880   :  { %3982 = vmatpush1.bf16.msra.mxu1 %v6452_v29  ;;  %2264 = vmatprep.mubr.f32.mxu1 %v6019_v55  ;;  %v2319_v29 = vld [vmem:[%s6193_s4] sm:$0xff] }
 0x881   :  { %2422 = vmatprep.mubr.f32.mxu0 %v6792_v27  ;;  %3984 = vmatprep.subr.bf16.mxu1 %v6453_v38  ;;  %v2274_v27 = vld [vmem:[%s6191_s0 + $0x168] sm:$0xff] }
 0x884   :  { %3986 = vmatpush1.bf16.msra.mxu1 %v6454_v4  ;;  %v2320_v4 = vld [vmem:[%s6193_s4 + $0x8] sm:$0xff] }
 0x885   :  { %3988 = vmatprep.subr.bf16.mxu1 %v6455_v3  ;;  %v2337_v3 = vld [vmem:[%s6193_s4 + $0x90] sm:$0xff] }
 0x888   :  { %3990 = vmatpush1.bf16.msra.mxu1 %v6456_v47  ;;  %v2338_v47 = vld [vmem:[%s6193_s4 + $0x98] sm:$0xff] }
 0x889   :  { %3992 = vmatprep.subr.bf16.mxu1 %v6457_v28  ;;  %v4045_v28 = vpack.c.bf16 %v2320_v4, %v2319_v29 }
 0x88c   :  { %3994 = vmatpush1.bf16.msra.mxu1 %v4925_v53  ;;  %v2335_v53 = vld [vmem:[%s6193_s4 + $0x80] sm:$0xff] }
 0x88d   :  { %3996 = vmatprep.subr.bf16.mxu1 %v4937_v48  ;;  %v2336_v48 = vld [vmem:[%s6193_s4 + $0x88] sm:$0xff] }
 0x88e   :  { %v4043_v38 = vpack.c.bf16 %v2336_v48, %v2335_v53 }
 0x890   :  { %3998 = vmatpush1.bf16.msra.mxu1 %v6458_v52  ;;  %v4047_v52 = vpack.c.bf16 %v2338_v47, %v2337_v3  ;;  %4044 = vmatprep.subr.bf16.mxu0 %v4043_v38 }
 0x891   :  { %4000 = vmatprep.subr.bf16.mxu1 %v6459_v61  ;;  %v2321_v61 = vld [vmem:[%s6193_s4 + $0x10] sm:$0xff]  ;;  %4046 = vmatpush3.bf16.msra.mxu0 %v4045_v28 }
 0x892   :  { %4048 = vmatprep.subr.bf16.mxu0 %v4047_v52 }
 0x894   :  { %4002 = vmatpush1.bf16.msra.mxu1 %v6460_v59  ;;  %v2322_v59 = vld [vmem:[%s6193_s4 + $0x18] sm:$0xff] }
 0x895   :  { %4004 = vmatprep.subr.bf16.mxu1 %v6461_v2  ;;  %v4049_v2 = vpack.c.bf16 %v2322_v59, %v2321_v61 }
 0x897   :  { %4050 = vmatpush3.bf16.msra.mxu0 %v4049_v2 }
 0x898   :  { %4006 = vmatpush1.bf16.msra.mxu1 %v6462_v23  ;;  %v2339_v23 = vld [vmem:[%s6193_s4 + $0xa0] sm:$0xff] }
 0x899   :  { %4008 = vmatprep.subr.bf16.mxu1 %v6463_v33  ;;  %v2340_v33 = vld [vmem:[%s6193_s4 + $0xa8] sm:$0xff] }
 0x89c   :  { %4010 = vmatpush1.bf16.msra.mxu1 %v6464_v30  ;;  %v4051_v30 = vpack.c.bf16 %v2340_v33, %v2339_v23 }
 0x89d   :  { %4012 = vmatprep.subr.bf16.mxu1 %v6465_v37  ;;  %v2323_v37 = vld [vmem:[%s6193_s4 + $0x20] sm:$0xff] }
 0x89e   :  { %4052 = vmatprep.subr.bf16.mxu0 %v4051_v30  ;;  %v2275_v30 = vld [vmem:[%s6191_s0 + $0x170] sm:$0xff] }
 0x8a0   :  { %4014 = vmatpush1.bf16.msra.mxu1 %v6466_v10  ;;  %v2324_v10 = vld [vmem:[%s6193_s4 + $0x28] sm:$0xff] }
 0x8a1   :  { %4016 = vmatprep.subr.bf16.mxu1 %v6508_v62  ;;  %v2342_v62 = vld [vmem:[%s6193_s4 + $0xb8] sm:$0xff] }
 0x8a4   :  { %4018 = vmatpush1.bf16.msra.mxu1 %v6468_v5  ;;  %v4053_v5 = vpack.c.bf16 %v2324_v10, %v2323_v37 }
 0x8a5   :  { %4020 = vmatprep.subr.bf16.mxu1 %v6510_v12 }
 0x8a6   :  { %4054 = vmatpush3.bf16.msra.mxu0 %v4053_v5 }
 0x8a8   :  { %4022 = vmatpush1.bf16.msra.mxu1 %v6470_v24  ;;  %v2341_v24 = vld [vmem:[%s6193_s4 + $0xb0] sm:$0xff] }
 0x8a9   :  { %4024 = vmatprep.subr.bf16.mxu1 %v6736_v7  ;;  %v4055_v12 = vpack.c.bf16 %v2342_v62, %v2341_v24  ;;  %v2326_v7 = vld [vmem:[%s6193_s4 + $0x38] sm:$0xff] }
 0x8aa   :  { %v2276_v24 = vld [vmem:[%s6191_s0 + $0x178] sm:$0xff] }
 0x8ab   :  { %4056 = vmatprep.subr.bf16.mxu0 %v4055_v12 }
 0x8ac   :  { %4026 = vmatpush1.bf16.msra.mxu1 %v6739_v14  ;;  %v4057_v14 = vpack.c.bf16 %v2326_v7, %v2325_v49 }
 0x8ad   :  { %4028 = vmatprep.subr.bf16.mxu1 %v6740_v19  ;;  %v2343_v19 = vld [vmem:[%s6193_s4 + $0xc0] sm:$0xff] }
 0x8ae   :  { %4058 = vmatpush3.bf16.msra.mxu0 %v4057_v14 }
 0x8b0   :  { %4030 = vmatpush1.bf16.msra.mxu1 %v6743_v26  ;;  %v2344_v26 = vld [vmem:[%s6193_s4 + $0xc8] sm:$0xff] }
 0x8b1   :  { %4032 = vmatprep.subr.bf16.mxu1 %v6744_v31  ;;  %v4059_v31 = vpack.c.bf16 %v2344_v26, %v2343_v19 }
 0x8b3   :  { %4060 = vmatprep.subr.bf16.mxu0 %v4059_v31 }
 0x8b4   :  { %4034 = vmatpush1.bf16.msra.mxu1 %v6747_v46  ;;  %v2327_v46 = vld [vmem:[%s6193_s4 + $0x40] sm:$0xff] }
 0x8b5   :  { %4036 = vmatprep.subr.bf16.mxu1 %v6748_v56  ;;  %v2328_v56 = vld [vmem:[%s6193_s4 + $0x48] sm:$0xff] }
 0x8b8   :  { %4038 = vmatpush1.bf16.msra.mxu1 %v6751_v15  ;;  %v4061_v15 = vpack.c.bf16 %v2328_v56, %v2327_v46 }
 0x8b9   :  { %4040 = vmatprep.subr.bf16.mxu1 %v6752_v34  ;;  %v2345_v34 = vld [vmem:[%s6193_s4 + $0xd0] sm:$0xff] }
 0x8ba   :  { %4062 = vmatpush3.bf16.msra.mxu0 %v4061_v15 }
 0x8bc   :  { %4042 = vmatpush1.bf16.msra.mxu1 %v6755_v54  ;;  %v2346_v54 = vld [vmem:[%s6193_s4 + $0xd8] sm:$0xff] }
 0x8bd   :  { %v4063_v63 = vpack.c.bf16 %v2346_v54, %v2345_v34 }
 0x8bf   :  { %2265 = vmatmul.mubr.f32.vlgmr.msra.gmra.mrb[22].mxu1 %v6017_v44  ;;  %4064 = vmatprep.subr.bf16.mxu0 %v4063_v63 }
 0x8c0   :  { %4066 = vmatpush3.bf16.msra.mxu0 %v4065_v20 }
 0x8c1   :  { %4068 = vmatprep.subr.bf16.mxu0 %v4067_v60 }
 0x8c4   :  { %4070 = vmatpush3.bf16.msra.mxu0 %v4069_v22 }
 0x8c5   :  { %4072 = vmatprep.subr.bf16.mxu0 %v4071_v43 }
 0x8c8   :  { %4074 = vmatpush3.bf16.msra.mxu0 %v4073_v1 }
 0x952   :  { %v2124_v0 = vpop.f32.mrb[20].mxu1  ;;  %v2195_v58 = vpop.f32.mrb[22].mxu0 }
 0x953   :  { %v2126_v18 = vpop.f32.mrb[21].mxu1  ;;  %v2197_v42 = vpop.f32.mrb[23].mxu0  ;;  %v2277_v36 = vadd.f32 %v2271_v35, %v2124_v0  ;;  %v2291_v53 = vadd.f32 %v2273_v11, %v2195_v58 }
 0x954   :  { %v2278_v16 = vadd.f32 %v2272_v57, %v2126_v18  ;;  %v2292_v48 = vadd.f32 %v2274_v27, %v2197_v42 }
 0x955   :  { %v2467_v40 = vmul.f32 -1.442695, %v2277_v36  ;;  %v2469_v4 = vmul.f32 -1.442695, %v2291_v53 }
 0x956   :  { %v2468_v45 = vmul.f32 -1.442695, %v2278_v16  ;;  %v2470_v3 = vmul.f32 -1.442695, %v2292_v48 }
 0x957   :  { %4215 = vpow2.f32 %v2467_v40 }
 0x958   :  { %4217 = vpow2.f32 %v2468_v45 }
 0x959   :  { %4219 = vpow2.f32 %v2469_v4 }
 0x95a   :  { %4221 = vpow2.f32 %v2470_v3 }
 0x961   :  { %v4216_v29 = vpop.eup %4215 }
 0x962   :  { %v4218_v38 = vpop.eup %4217  ;;  %v2285_v47 = vadd.f32 1.0, %v4216_v29 }
 0x963   :  { %v2286_v28 = vadd.f32 1.0, %v4218_v38  ;;  %v4220_v52 = vpop.eup %4219 }
 0x964   :  { %4223 = vrcp.f32 %v2285_v47  ;;  %v4222_v59 = vpop.eup %4221  ;;  %v2299_v12 = vadd.f32 1.0, %v4220_v52 }
 0x965   :  { %4225 = vrcp.f32 %v2286_v28  ;;  %v2300_v7 = vadd.f32 1.0, %v4222_v59 }
 0x96e   :  { %v4224_v33 = vpop.eup %4223 }
 0x96f   :  { %v4226_v10 = vpop.eup %4225 }
 0x992   :  { %v2266_v61 = vpop.f32.mrb[22].mxu1 }
 0x993   :  { %v2305_v2 = vadd.f32 %v2266_v61, %v6790_v41  ;;  %v2268_v23 = vpop.f32.mrb[23].mxu1 }
 0x994   :  { %v2306_v37 = vadd.f32 %v2268_v23, %v6791_v39 }
 0x995   :  { %v2307_v5 = vmul.f32 %v4224_v33, %v2305_v2 }
 0x996   :  { %v2308_v62 = vmul.f32 %v4226_v10, %v2306_v37 }
 0x997   :  { %v2309_v49 = vadd.f32 %v2307_v5, %v2275_v30 }
 0x998   :  { %v2310_v14 = vadd.f32 %v2308_v62, %v2276_v24 }
 0x999   :  { %4227 = vtanh.f32 %v2309_v49 }
 0x99a   :  { %4229 = vtanh.f32 %v2310_v14 }
 0x99b   :  { %4231 = vrcp.f32 %v2299_v12 }
 0x99c   :  { %4233 = vrcp.f32 %v2300_v7 }
 0x9a3   :  { %v4228_v41 = vpop.eup %4227 }
 0x9a4   :  { %v4230_v19 = vpop.eup %4229  ;;  %v2313_v26 = vsub.f32 %v6017_v44, %v4228_v41  ;;  %v2471_v44 = vld [vmem:[%s6195_s5] ss:$0 sm:$0xff] }
 0x9a5   :  { %v4232_v39 = vpop.eup %4231  ;;  %v2314_v31 = vsub.f32 %v6019_v55, %v4230_v19 }
 0x9a6   :  { %v4234_v46 = vpop.eup %4233  ;;  %v2315_v56 = vmul.f32 %v4232_v39, %v2313_v26 }
 0x9a7   :  { %v2316_v15 = vmul.f32 %v4234_v46, %v2314_v31 }
 0x9a8   :  { %v2317_v34 = vadd.f32 %v4228_v41, %v2315_v56 }
 0x9a9   :  { %v2318_v54 = vadd.f32 %v4230_v19, %v2316_v15 }
 0x9aa   :  { %2423 = vmatmul.mubr.f32.vlgmr.msra.gmra.mrb[24].mxu0 %v2317_v34  ;;  %2429 = vst [vmem:[%s6194_s7] sm:$0xff] %v2317_v34 }
 0x9ab   :  { %2430 = vst [vmem:[%s6194_s7 + $0x8] sm:$0xff] %v2318_v54 }
 0xa7d   :  { %v2504_v63 = vpop.f32.mrb[24].mxu0 }
 0xa7e   :  { %v2505_v55 = vpop.f32.mrb[25].mxu0 }
 0xa7f   :  { %v2506_v8 = vadd.f32 %v2505_v55, %v2504_v63 }
 0xa81   :  { %v2425_v13 = vadd.f32 %v2506_v8, %v2471_v44 }
 0xa83   :  { %2428 = vst [vmem:[%s6196_s6] sm:$0xff] %v2425_v13 }

</bundles_post_ra>
